<compile_context>
chip_gen: v5e
topology: v5e:2x2
jax: 0.10.0
libtpu: 0.0.40
codegen_flags: <defaults>
</compile_context>

<pallas_src>
import numpy as np
import jax
import jax.numpy as jnp
from jax import lax
from jax.experimental import pallas as pl
from jax.experimental.pallas import tpu as pltpu

# ----------------------------- hyper-parameters -----------------------------
VOCAB = 50
EMBED = 128
NF = 128            # n_filters
HIDDEN = 128        # hidden_size
NUM_CLASSES = 5
SEQ = 100           # implied by fc1 = Linear(95 * n_filters, ...)
FS1, FS2 = 3, 8     # filter_sizes
POOL = 2
P1 = (SEQ - FS1 + 1) // POOL     # 49
P2 = (SEQ - FS2 + 1) // POOL     # 46
NPOS = P1 + P2                   # 95
NPOS_PAD = 96                    # pad to a multiple of the fc1 K-chunk
CHUNK = 32                       # fc1 reduction tile, in feature positions
NCHUNK = NPOS_PAD // CHUNK       # 3 grid steps
BATCH = 2


# ---------------------- fused conv+pool+relu+fc1+fc2 kernel ------------------
def _cnn_fused_kernel(ee_ref, eo_ref, cw1_ref, cb1_ref, cw2_ref, cb2_ref,
                      w1_ref, b1_ref, w2_ref, b2_ref, out_ref,
                      x_ref, acc_ref):
    """Grid axis = fc1 K-chunks (reduction, 'arbitrary').

    ee_ref / eo_ref : (B, SEQ//2, EMBED) embeddings at even / odd time steps (f32)
    cwX_ref         : (fsX*EMBED, NF)    im2col conv weights (bf16)
    cbX_ref         : (1, NF)            conv biases (f32)
    w1_ref          : (CHUNK*NF, HIDDEN) current bf16 chunk of permuted fc1 weight
    b1_ref          : (1, HIDDEN)
    w2_ref          : (HIDDEN, NUM_CLASSES), b2_ref : (1, NUM_CLASSES)
    out_ref         : (B, NUM_CLASSES)
    x_ref (scratch) : (NCHUNK, B, CHUNK*NF) bf16 flattened features, per chunk
    acc_ref(scratch): (B, HIDDEN) f32 fc1 accumulator
    """
    k = pl.program_id(0)
    B = ee_ref.shape[0]

    @pl.when(k == 0)
    def _compute_features():
        acc_ref[...] = jnp.zeros_like(acc_ref)

        def conv_pool_relu(cw_ref, cb_ref, fs, n_out, b):
            # conv[t] = sum_k emb[t+k] @ W[k]; pool[i] = max(conv[2i], conv[2i+1]).
            # im2col per parity: lane-concat of shifted even/odd embedding slices,
            # then one (n_out, fs*EMBED) @ (fs*EMBED, NF) bf16 matmul per parity.
            ee = ee_ref[b]                      # (SEQ//2, EMBED) f32
            eo = eo_ref[b]
            even_pieces, odd_pieces = [], []
            for kk in range(fs):
                if kk % 2 == 0:
                    even_pieces.append(ee[kk // 2: kk // 2 + n_out, :])
                    odd_pieces.append(eo[kk // 2: kk // 2 + n_out, :])
                else:
                    even_pieces.append(eo[(kk - 1) // 2: (kk - 1) // 2 + n_out, :])
                    odd_pieces.append(ee[(kk + 1) // 2: (kk + 1) // 2 + n_out, :])
            pe = jnp.concatenate(even_pieces, axis=-1)          # (n_out, fs*EMBED)
            ce = jnp.dot(pe.astype(jnp.bfloat16), cw_ref[...],
                         preferred_element_type=jnp.float32)
            po = jnp.concatenate(odd_pieces, axis=-1)
            co = jnp.dot(po.astype(jnp.bfloat16), cw_ref[...],
                         preferred_element_type=jnp.float32)
            pooled = jnp.maximum(ce, co) + cb_ref[...]          # bias commutes with max
            return jnp.maximum(pooled, 0.0)                     # ReLU  (n_out, NF) f32

        f1 = [conv_pool_relu(cw1_ref, cb1_ref, FS1, P1, b) for b in range(B)]
        f2 = [conv_pool_relu(cw2_ref, cb2_ref, FS2, P2, b) for b in range(B)]

        # Flatten features into per-chunk fc1 LHS rows (lane order = p*NF + f,
        # matching the fc1 weight permutation done at prep time).
        zero_row = jnp.zeros((1, NF), jnp.float32)
        for c in range(NCHUNK):
            for b in range(B):
                pieces = []
                for j in range(CHUNK):
                    p = c * CHUNK + j
                    if p < P1:
                        pieces.append(f1[b][p:p + 1, :])
                    elif p < NPOS:
                        q = p - P1
                        pieces.append(f2[b][q:q + 1, :])
                    else:
                        pieces.append(zero_row)                 # padded position
                row = jnp.concatenate(pieces, axis=-1)          # (1, CHUNK*NF) f32
                x_ref[c, b:b + 1, :] = row.astype(x_ref.dtype)

    # fc1 partial product for this K-chunk (overlaps the next chunk's weight DMA).
    acc_ref[...] += jnp.dot(x_ref[k], w1_ref[...],
                            preferred_element_type=jnp.float32)

    @pl.when(k == pl.num_programs(0) - 1)
    def _finalize():
        h = acc_ref[...] + b1_ref[...]                          # (B, HIDDEN)
        # TODO(synk): nn.Dropout is identity at inference; no stochastic masking.
        out_ref[...] = (jnp.dot(h, w2_ref[...], preferred_element_type=jnp.float32)
                        + b2_ref[...])


def cnn_pallas(ee, eo, cw1, cb1, cw2, cb2, w1, b1, w2, b2):
    B = ee.shape[0]
    return pl.pallas_call(
        _cnn_fused_kernel,
        out_shape=jax.ShapeDtypeStruct((B, NUM_CLASSES), jnp.float32),
        grid=(NCHUNK,),
        in_specs=[
            pl.BlockSpec((B, SEQ // 2, EMBED), lambda k: (0, 0, 0)),
            pl.BlockSpec((B, SEQ // 2, EMBED), lambda k: (0, 0, 0)),
            pl.BlockSpec((FS1 * EMBED, NF), lambda k: (0, 0)),
            pl.BlockSpec((1, NF), lambda k: (0, 0)),
            pl.BlockSpec((FS2 * EMBED, NF), lambda k: (0, 0)),
            pl.BlockSpec((1, NF), lambda k: (0, 0)),
            pl.BlockSpec((CHUNK * NF, HIDDEN), lambda k: (k, 0)),   # streamed fc1 chunks
            pl.BlockSpec((1, HIDDEN), lambda k: (0, 0)),
            pl.BlockSpec((HIDDEN, NUM_CLASSES), lambda k: (0, 0)),
            pl.BlockSpec((1, NUM_CLASSES), lambda k: (0, 0)),
        ],
        out_specs=pl.BlockSpec((B, NUM_CLASSES), lambda k: (0, 0)),
        scratch_shapes=[
            pltpu.VMEM((NCHUNK, B, CHUNK * NF), jnp.bfloat16),
            pltpu.VMEM((B, HIDDEN), jnp.float32),
        ],
        compiler_params=pltpu.CompilerParams(
            dimension_semantics=("arbitrary",),
        ),
    )(ee, eo, cw1, cb1, cw2, cb2, w1, b1, w2, b2)


# ---------------------------------- params ----------------------------------
def init_params(key):
    """PyTorch-layout parameters (used by the pure-JAX reference)."""
    ks = jax.random.split(key, 9)
    s = 0.05
    return {
        "embedding": jax.random.normal(ks[0], (VOCAB, EMBED), jnp.float32),
        "conv1_w": s * jax.random.normal(ks[1], (NF, 1, FS1, EMBED), jnp.float32),
        "conv1_b": s * jax.random.normal(ks[2], (NF,), jnp.float32),
        "conv2_w": s * jax.random.normal(ks[3], (NF, 1, FS2, EMBED), jnp.float32),
        "conv2_b": s * jax.random.normal(ks[4], (NF,), jnp.float32),
        "fc1_w": s * jax.random.normal(ks[5], (HIDDEN, NPOS * NF), jnp.float32),
        "fc1_b": s * jax.random.normal(ks[6], (HIDDEN,), jnp.float32),
        "fc2_w": s * jax.random.normal(ks[7], (NUM_CLASSES, HIDDEN), jnp.float32),
        "fc2_b": s * jax.random.normal(ks[8], (NUM_CLASSES,), jnp.float32),
    }


def prepare_params(params):
    """One-time conversion of PyTorch-layout params into kernel-friendly layouts.

    Done once at init (NOT per forward call), so no per-call weight transposes
    or transposed copies land in HBM.
    """
    # conv weights -> im2col layout (fs*EMBED, NF); patch lane order is k*EMBED+e.
    # Stored bf16 (MXU-native; f32 accumulation in-kernel).
    cw1 = jnp.transpose(params["conv1_w"].reshape(NF, FS1 * EMBED), (1, 0))
    cw2 = jnp.transpose(params["conv2_w"].reshape(NF, FS2 * EMBED), (1, 0))
    # fc1 weight: PyTorch column index = f*95 + p (filter-major flatten of (B,NF,95)).
    # Kernel produces features position-major (column = p*NF + f), so permute once.
    fc1 = params["fc1_w"].reshape(HIDDEN, NF, NPOS)
    fc1 = jnp.transpose(fc1, (2, 1, 0))                         # (NPOS, NF, HIDDEN)
    fc1 = jnp.pad(fc1, ((0, NPOS_PAD - NPOS), (0, 0), (0, 0)))  # pad position 95 with 0
    fc1 = fc1.reshape(NPOS_PAD * NF, HIDDEN).astype(jnp.bfloat16)
    return {
        "embedding": params["embedding"],
        "cw1": cw1.astype(jnp.bfloat16), "cb1": params["conv1_b"][None, :],
        "cw2": cw2.astype(jnp.bfloat16), "cb2": params["conv2_b"][None, :],
        "fc1_w": fc1, "fc1_b": params["fc1_b"][None, :],
        "fc2_w": jnp.transpose(params["fc2_w"], (1, 0)),
        "fc2_b": params["fc2_b"][None, :],
    }


@jax.jit
def cnn_forward(prep, text_ids, text_lengths):
    del text_lengths  # unused, exactly as in the PyTorch forward
    # TODO(synk): the embedding gather + even/odd split could be folded into the
    # kernel via scalar-prefetched token ids; kept in XLA (it is ~100 KiB).
    emb = jnp.take(prep["embedding"], text_ids, axis=0)         # (B, SEQ, EMBED)
    ee = emb[:, 0::2, :]                                        # (B, SEQ//2, EMBED)
    eo = emb[:, 1::2, :]
    return cnn_pallas(ee, eo,
                      prep["cw1"], prep["cb1"], prep["cw2"], prep["cb2"],
                      prep["fc1_w"], prep["fc1_b"], prep["fc2_w"], prep["fc2_b"])


# --------------------------- pure-JAX reference -----------------------------
def reference_forward(params, text_ids):
    emb = jnp.take(params["embedding"], text_ids, axis=0)[:, None]   # (B,1,S,E)

    def conv(x, w, b):
        y = lax.conv_general_dilated(
            x, w, (1, 1), "VALID",
            dimension_numbers=("NCHW", "OIHW", "NCHW"),
            precision=lax.Precision.HIGHEST)
        return y + b[None, :, None, None]

    c1 = conv(emb, params["conv1_w"], params["conv1_b"])[..., 0]     # (B,NF,98)
    c2 = conv(emb, params["conv2_w"], params["conv2_b"])[..., 0]     # (B,NF,93)

    def maxpool(x):  # MaxPool1d(kernel=2, stride=2)
        L = x.shape[-1] // 2
        return jnp.max(x[..., : 2 * L].reshape(x.shape[0], x.shape[1], L, 2), axis=-1)

    cat = jnp.concatenate([maxpool(c1), maxpool(c2)], axis=2)        # (B,NF,95)
    x = cat.reshape(cat.shape[0], -1)
    x = jnp.dot(jnp.maximum(x, 0.0), params["fc1_w"].T,
                precision=lax.Precision.HIGHEST) + params["fc1_b"]
    x = jnp.dot(x, params["fc2_w"].T,
                precision=lax.Precision.HIGHEST) + params["fc2_b"]
    return x


if __name__ == "__main__":
    key = jax.random.PRNGKey(0)
    pkey, tkey = jax.random.split(key)
    params = init_params(pkey)
    prep = prepare_params(params)   # one-time layout conversion, outside the hot path
    text_ids = jax.random.randint(tkey, (BATCH, SEQ), 0, VOCAB, dtype=jnp.int32)
    text_lengths = jnp.full((BATCH,), SEQ, dtype=jnp.int32)

    logits = cnn_forward(prep, text_ids, text_lengths)
    logits = jax.block_until_ready(logits)
    assert logits.shape == (BATCH, NUM_CLASSES)

    ref = reference_forward(params, text_ids)
    np.testing.assert_allclose(np.asarray(logits), np.asarray(ref), rtol=5e-2, atol=5e-2)
    print("KERNEL_OK")
</pallas_src>

<mosaic_0001>
module attributes {stable_mosaic.version = 11 : i64} {
  func.func @_cnn_fused_kernel(%arg0: i32, %arg1: memref<2x50x128xf32, #tpu.memory_space<vmem>>, %arg2: memref<2x50x128xf32, #tpu.memory_space<vmem>>, %arg3: memref<384x128xbf16, #tpu.memory_space<vmem>>, %arg4: memref<1x128xf32, #tpu.memory_space<vmem>>, %arg5: memref<1024x128xbf16, #tpu.memory_space<vmem>>, %arg6: memref<1x128xf32, #tpu.memory_space<vmem>>, %arg7: memref<4096x128xbf16, #tpu.memory_space<vmem>>, %arg8: memref<1x128xf32, #tpu.memory_space<vmem>>, %arg9: memref<128x5xf32, #tpu.memory_space<vmem>>, %arg10: memref<1x5xf32, #tpu.memory_space<vmem>>, %arg11: memref<2x5xf32, #tpu.memory_space<vmem>>, %arg12: memref<3x2x4096xbf16, #tpu.memory_space<vmem>>, %arg13: memref<2x128xf32, #tpu.memory_space<vmem>>) attributes {dimension_semantics = [#tpu.dimension_semantics<arbitrary>], iteration_bounds = array<i64: 3>, scalar_prefetch = 0 : i64, scratch_operands = 2 : i64, tpu.core_type = #tpu.core_type<tc>, window_params = [{pipeline_mode = #tpu.pipeline_mode<synchronous>, transform_indices = @transform_0, window_bounds = array<i64: 2, 50, 128>}, {pipeline_mode = #tpu.pipeline_mode<synchronous>, transform_indices = @transform_1, window_bounds = array<i64: 2, 50, 128>}, {pipeline_mode = #tpu.pipeline_mode<synchronous>, transform_indices = @transform_2, window_bounds = array<i64: 384, 128>}, {pipeline_mode = #tpu.pipeline_mode<synchronous>, transform_indices = @transform_3, window_bounds = array<i64: 1, 128>}, {pipeline_mode = #tpu.pipeline_mode<synchronous>, transform_indices = @transform_4, window_bounds = array<i64: 1024, 128>}, {pipeline_mode = #tpu.pipeline_mode<synchronous>, transform_indices = @transform_5, window_bounds = array<i64: 1, 128>}, {transform_indices = @transform_6, window_bounds = array<i64: 4096, 128>}, {pipeline_mode = #tpu.pipeline_mode<synchronous>, transform_indices = @transform_7, window_bounds = array<i64: 1, 128>}, {pipeline_mode = #tpu.pipeline_mode<synchronous>, transform_indices = @transform_8, window_bounds = array<i64: 128, 5>}, {pipeline_mode = #tpu.pipeline_mode<synchronous>, transform_indices = @transform_9, window_bounds = array<i64: 1, 5>}, {pipeline_mode = #tpu.pipeline_mode<synchronous>, transform_indices = @transform_10, window_bounds = array<i64: 2, 5>}]} {
    %c0_i32 = arith.constant 0 : i32
    %0 = arith.cmpi eq, %arg0, %c0_i32 : i32
    %1 = arith.extui %0 : i1 to i32
    %c0_i32_0 = arith.constant 0 : i32
    %2 = arith.cmpi ne, %1, %c0_i32_0 : i32
    scf.if %2 {
      %cst_9 = arith.constant 0.000000e+00 : f32
      %14 = vector.broadcast %cst_9 : f32 to vector<2x128xf32>
      %c0_10 = arith.constant 0 : index
      %c0_11 = arith.constant 0 : index
      %15 = vector.load %arg13[%c0_10, %c0_11] : memref<2x128xf32, #tpu.memory_space<vmem>>, vector<2x128xf32>
      tpu.vector_store %arg13[%c0_10, %c0_11], %14 {strides = array<i32>} : memref<2x128xf32, #tpu.memory_space<vmem>>, vector<2x128xf32>,
      %c0_12 = arith.constant 0 : index
      %c0_13 = arith.constant 0 : index
      %c0_14 = arith.constant 0 : index
      %16 = vector.load %arg1[%c0_12, %c0_13, %c0_14] : memref<2x50x128xf32, #tpu.memory_space<vmem>>, vector<1x50x128xf32>
      %17 = vector.shape_cast %16 : vector<1x50x128xf32> to vector<50x128xf32>
      %c0_15 = arith.constant 0 : index
      %c0_16 = arith.constant 0 : index
      %c0_17 = arith.constant 0 : index
      %18 = vector.load %arg2[%c0_15, %c0_16, %c0_17] : memref<2x50x128xf32, #tpu.memory_space<vmem>>, vector<1x50x128xf32>
      %19 = vector.shape_cast %18 : vector<1x50x128xf32> to vector<50x128xf32>
      %20 = vector.extract_strided_slice %17 {offsets = [0, 0], sizes = [49, 128], strides = [1, 1]} : vector<50x128xf32> to vector<49x128xf32>
      %21 = vector.extract_strided_slice %19 {offsets = [0, 0], sizes = [49, 128], strides = [1, 1]} : vector<50x128xf32> to vector<49x128xf32>
      %22 = vector.extract_strided_slice %19 {offsets = [0, 0], sizes = [49, 128], strides = [1, 1]} : vector<50x128xf32> to vector<49x128xf32>
      %23 = vector.extract_strided_slice %17 {offsets = [1, 0], sizes = [49, 128], strides = [1, 1]} : vector<50x128xf32> to vector<49x128xf32>
      %24 = vector.extract_strided_slice %17 {offsets = [1, 0], sizes = [49, 128], strides = [1, 1]} : vector<50x128xf32> to vector<49x128xf32>
      %25 = vector.extract_strided_slice %19 {offsets = [1, 0], sizes = [49, 128], strides = [1, 1]} : vector<50x128xf32> to vector<49x128xf32>
      %26 = tpu.concatenate %20, %22, %24 in 1 : vector<49x128xf32>, vector<49x128xf32>, vector<49x128xf32> -> vector<49x384xf32>
      %27 = arith.truncf %26 : vector<49x384xf32> to vector<49x384xbf16>
      %c0_18 = arith.constant 0 : index
      %c0_19 = arith.constant 0 : index
      %28 = vector.load %arg3[%c0_18, %c0_19] : memref<384x128xbf16, #tpu.memory_space<vmem>>, vector<384x128xbf16>
      %cst_20 = arith.constant dense<0.000000e+00> : vector<49x128xf32>
      %29 = tpu.matmul %27, %28, %cst_20 {dimension_numbers = #tpu.dot_dimension_numbers<[1], [0], [0], [1], [0, 0, 1, 1], [], []>} : vector<49x384xbf16>, vector<384x128xbf16>, vector<49x128xf32> -> vector<49x128xf32>
      %30 = tpu.concatenate %21, %23, %25 in 1 : vector<49x128xf32>, vector<49x128xf32>, vector<49x128xf32> -> vector<49x384xf32>
      %31 = arith.truncf %30 : vector<49x384xf32> to vector<49x384xbf16>
      %c0_21 = arith.constant 0 : index
      %c0_22 = arith.constant 0 : index
      %32 = vector.load %arg3[%c0_21, %c0_22] : memref<384x128xbf16, #tpu.memory_space<vmem>>, vector<384x128xbf16>
      %cst_23 = arith.constant dense<0.000000e+00> : vector<49x128xf32>
      %33 = tpu.matmul %31, %32, %cst_23 {dimension_numbers = #tpu.dot_dimension_numbers<[1], [0], [0], [1], [0, 0, 1, 1], [], []>} : vector<49x384xbf16>, vector<384x128xbf16>, vector<49x128xf32> -> vector<49x128xf32>
      %34 = arith.maximumf %29, %33 : vector<49x128xf32>
      %c0_24 = arith.constant 0 : index
      %c0_25 = arith.constant 0 : index
      %35 = vector.load %arg4[%c0_24, %c0_25] : memref<1x128xf32, #tpu.memory_space<vmem>>, vector<1x128xf32>
      %36 = vector.broadcast %35 : vector<1x128xf32> to vector<49x128xf32>
      %37 = arith.addf %34, %36 : vector<49x128xf32>
      %cst_26 = arith.constant 0.000000e+00 : f32
      %38 = vector.broadcast %cst_26 : f32 to vector<49x128xf32>
      %39 = arith.maximumf %37, %38 : vector<49x128xf32>
      %c1 = arith.constant 1 : index
      %c0_27 = arith.constant 0 : index
      %c0_28 = arith.constant 0 : index
      %40 = vector.load %arg1[%c1, %c0_27, %c0_28] : memref<2x50x128xf32, #tpu.memory_space<vmem>>, vector<1x50x128xf32>
      %41 = vector.shape_cast %40 : vector<1x50x128xf32> to vector<50x128xf32>
      %c1_29 = arith.constant 1 : index
      %c0_30 = arith.constant 0 : index
      %c0_31 = arith.constant 0 : index
      %42 = vector.load %arg2[%c1_29, %c0_30, %c0_31] : memref<2x50x128xf32, #tpu.memory_space<vmem>>, vector<1x50x128xf32>
      %43 = vector.shape_cast %42 : vector<1x50x128xf32> to vector<50x128xf32>
      %44 = vector.extract_strided_slice %41 {offsets = [0, 0], sizes = [49, 128], strides = [1, 1]} : vector<50x128xf32> to vector<49x128xf32>
      %45 = vector.extract_strided_slice %43 {offsets = [0, 0], sizes = [49, 128], strides = [1, 1]} : vector<50x128xf32> to vector<49x128xf32>
      %46 = vector.extract_strided_slice %43 {offsets = [0, 0], sizes = [49, 128], strides = [1, 1]} : vector<50x128xf32> to vector<49x128xf32>
      %47 = vector.extract_strided_slice %41 {offsets = [1, 0], sizes = [49, 128], strides = [1, 1]} : vector<50x128xf32> to vector<49x128xf32>
      %48 = vector.extract_strided_slice %41 {offsets = [1, 0], sizes = [49, 128], strides = [1, 1]} : vector<50x128xf32> to vector<49x128xf32>
      %49 = vector.extract_strided_slice %43 {offsets = [1, 0], sizes = [49, 128], strides = [1, 1]} : vector<50x128xf32> to vector<49x128xf32>
      %50 = tpu.concatenate %44, %46, %48 in 1 : vector<49x128xf32>, vector<49x128xf32>, vector<49x128xf32> -> vector<49x384xf32>
      %51 = arith.truncf %50 : vector<49x384xf32> to vector<49x384xbf16>
      %c0_32 = arith.constant 0 : index
      %c0_33 = arith.constant 0 : index
      %52 = vector.load %arg3[%c0_32, %c0_33] : memref<384x128xbf16, #tpu.memory_space<vmem>>, vector<384x128xbf16>
      %cst_34 = arith.constant dense<0.000000e+00> : vector<49x128xf32>
      %53 = tpu.matmul %51, %52, %cst_34 {dimension_numbers = #tpu.dot_dimension_numbers<[1], [0], [0], [1], [0, 0, 1, 1], [], []>} : vector<49x384xbf16>, vector<384x128xbf16>, vector<49x128xf32> -> vector<49x128xf32>
      %54 = tpu.concatenate %45, %47, %49 in 1 : vector<49x128xf32>, vector<49x128xf32>, vector<49x128xf32> -> vector<49x384xf32>
      %55 = arith.truncf %54 : vector<49x384xf32> to vector<49x384xbf16>
      %c0_35 = arith.constant 0 : index
      %c0_36 = arith.constant 0 : index
      %56 = vector.load %arg3[%c0_35, %c0_36] : memref<384x128xbf16, #tpu.memory_space<vmem>>, vector<384x128xbf16>
      %cst_37 = arith.constant dense<0.000000e+00> : vector<49x128xf32>
      %57 = tpu.matmul %55, %56, %cst_37 {dimension_numbers = #tpu.dot_dimension_numbers<[1], [0], [0], [1], [0, 0, 1, 1], [], []>} : vector<49x384xbf16>, vector<384x128xbf16>, vector<49x128xf32> -> vector<49x128xf32>
      %58 = arith.maximumf %53, %57 : vector<49x128xf32>
      %c0_38 = arith.constant 0 : index
      %c0_39 = arith.constant 0 : index
      %59 = vector.load %arg4[%c0_38, %c0_39] : memref<1x128xf32, #tpu.memory_space<vmem>>, vector<1x128xf32>
      %60 = vector.broadcast %59 : vector<1x128xf32> to vector<49x128xf32>
      %61 = arith.addf %58, %60 : vector<49x128xf32>
      %cst_40 = arith.constant 0.000000e+00 : f32
      %62 = vector.broadcast %cst_40 : f32 to vector<49x128xf32>
      %63 = arith.maximumf %61, %62 : vector<49x128xf32>
      %c0_41 = arith.constant 0 : index
      %c0_42 = arith.constant 0 : index
      %c0_43 = arith.constant 0 : index
      %64 = vector.load %arg1[%c0_41, %c0_42, %c0_43] : memref<2x50x128xf32, #tpu.memory_space<vmem>>, vector<1x50x128xf32>
      %65 = vector.shape_cast %64 : vector<1x50x128xf32> to vector<50x128xf32>
      %c0_44 = arith.constant 0 : index
      %c0_45 = arith.constant 0 : index
      %c0_46 = arith.constant 0 : index
      %66 = vector.load %arg2[%c0_44, %c0_45, %c0_46] : memref<2x50x128xf32, #tpu.memory_space<vmem>>, vector<1x50x128xf32>
      %67 = vector.shape_cast %66 : vector<1x50x128xf32> to vector<50x128xf32>
      %68 = vector.extract_strided_slice %65 {offsets = [0, 0], sizes = [46, 128], strides = [1, 1]} : vector<50x128xf32> to vector<46x128xf32>
      %69 = vector.extract_strided_slice %67 {offsets = [0, 0], sizes = [46, 128], strides = [1, 1]} : vector<50x128xf32> to vector<46x128xf32>
      %70 = vector.extract_strided_slice %67 {offsets = [0, 0], sizes = [46, 128], strides = [1, 1]} : vector<50x128xf32> to vector<46x128xf32>
      %71 = vector.extract_strided_slice %65 {offsets = [1, 0], sizes = [46, 128], strides = [1, 1]} : vector<50x128xf32> to vector<46x128xf32>
      %72 = vector.extract_strided_slice %65 {offsets = [1, 0], sizes = [46, 128], strides = [1, 1]} : vector<50x128xf32> to vector<46x128xf32>
      %73 = vector.extract_strided_slice %67 {offsets = [1, 0], sizes = [46, 128], strides = [1, 1]} : vector<50x128xf32> to vector<46x128xf32>
      %74 = vector.extract_strided_slice %67 {offsets = [1, 0], sizes = [46, 128], strides = [1, 1]} : vector<50x128xf32> to vector<46x128xf32>
      %75 = vector.extract_strided_slice %65 {offsets = [2, 0], sizes = [46, 128], strides = [1, 1]} : vector<50x128xf32> to vector<46x128xf32>
      %76 = vector.extract_strided_slice %65 {offsets = [2, 0], sizes = [46, 128], strides = [1, 1]} : vector<50x128xf32> to vector<46x128xf32>
      %77 = vector.extract_strided_slice %67 {offsets = [2, 0], sizes = [46, 128], strides = [1, 1]} : vector<50x128xf32> to vector<46x128xf32>
      %78 = vector.extract_strided_slice %67 {offsets = [2, 0], sizes = [46, 128], strides = [1, 1]} : vector<50x128xf32> to vector<46x128xf32>
      %79 = vector.extract_strided_slice %65 {offsets = [3, 0], sizes = [46, 128], strides = [1, 1]} : vector<50x128xf32> to vector<46x128xf32>
      %80 = vector.extract_strided_slice %65 {offsets = [3, 0], sizes = [46, 128], strides = [1, 1]} : vector<50x128xf32> to vector<46x128xf32>
      %81 = vector.extract_strided_slice %67 {offsets = [3, 0], sizes = [46, 128], strides = [1, 1]} : vector<50x128xf32> to vector<46x128xf32>
      %82 = vector.extract_strided_slice %67 {offsets = [3, 0], sizes = [46, 128], strides = [1, 1]} : vector<50x128xf32> to vector<46x128xf32>
      %83 = vector.extract_strided_slice %65 {offsets = [4, 0], sizes = [46, 128], strides = [1, 1]} : vector<50x128xf32> to vector<46x128xf32>
      %84 = tpu.concatenate %68, %70, %72, %74, %76, %78, %80, %82 in 1 : vector<46x128xf32>, vector<46x128xf32>, vector<46x128xf32>, vector<46x128xf32>, vector<46x128xf32>, vector<46x128xf32>, vector<46x128xf32>, vector<46x128xf32> -> vector<46x1024xf32>
      %85 = arith.truncf %84 : vector<46x1024xf32> to vector<46x1024xbf16>
      %c0_47 = arith.constant 0 : index
      %c0_48 = arith.constant 0 : index
      %86 = vector.load %arg5[%c0_47, %c0_48] : memref<1024x128xbf16, #tpu.memory_space<vmem>>, vector<1024x128xbf16>
      %cst_49 = arith.constant dense<0.000000e+00> : vector<46x128xf32>
      %87 = tpu.matmul %85, %86, %cst_49 {dimension_numbers = #tpu.dot_dimension_numbers<[1], [0], [0], [1], [0, 0, 1, 1], [], []>} : vector<46x1024xbf16>, vector<1024x128xbf16>, vector<46x128xf32> -> vector<46x128xf32>
      %88 = tpu.concatenate %69, %71, %73, %75, %77, %79, %81, %83 in 1 : vector<46x128xf32>, vector<46x128xf32>, vector<46x128xf32>, vector<46x128xf32>, vector<46x128xf32>, vector<46x128xf32>, vector<46x128xf32>, vector<46x128xf32> -> vector<46x1024xf32>
      %89 = arith.truncf %88 : vector<46x1024xf32> to vector<46x1024xbf16>
      %c0_50 = arith.constant 0 : index
      %c0_51 = arith.constant 0 : index
      %90 = vector.load %arg5[%c0_50, %c0_51] : memref<1024x128xbf16, #tpu.memory_space<vmem>>, vector<1024x128xbf16>
      %cst_52 = arith.constant dense<0.000000e+00> : vector<46x128xf32>
      %91 = tpu.matmul %89, %90, %cst_52 {dimension_numbers = #tpu.dot_dimension_numbers<[1], [0], [0], [1], [0, 0, 1, 1], [], []>} : vector<46x1024xbf16>, vector<1024x128xbf16>, vector<46x128xf32> -> vector<46x128xf32>
      %92 = arith.maximumf %87, %91 : vector<46x128xf32>
      %c0_53 = arith.constant 0 : index
      %c0_54 = arith.constant 0 : index
      %93 = vector.load %arg6[%c0_53, %c0_54] : memref<1x128xf32, #tpu.memory_space<vmem>>, vector<1x128xf32>
      %94 = vector.broadcast %93 : vector<1x128xf32> to vector<46x128xf32>
      %95 = arith.addf %92, %94 : vector<46x128xf32>
      %cst_55 = arith.constant 0.000000e+00 : f32
      %96 = vector.broadcast %cst_55 : f32 to vector<46x128xf32>
      %97 = arith.maximumf %95, %96 : vector<46x128xf32>
      %c1_56 = arith.constant 1 : index
      %c0_57 = arith.constant 0 : index
      %c0_58 = arith.constant 0 : index
      %98 = vector.load %arg1[%c1_56, %c0_57, %c0_58] : memref<2x50x128xf32, #tpu.memory_space<vmem>>, vector<1x50x128xf32>
      %99 = vector.shape_cast %98 : vector<1x50x128xf32> to vector<50x128xf32>
      %c1_59 = arith.constant 1 : index
      %c0_60 = arith.constant 0 : index
      %c0_61 = arith.constant 0 : index
      %100 = vector.load %arg2[%c1_59, %c0_60, %c0_61] : memref<2x50x128xf32, #tpu.memory_space<vmem>>, vector<1x50x128xf32>
      %101 = vector.shape_cast %100 : vector<1x50x128xf32> to vector<50x128xf32>
      %102 = vector.extract_strided_slice %99 {offsets = [0, 0], sizes = [46, 128], strides = [1, 1]} : vector<50x128xf32> to vector<46x128xf32>
      %103 = vector.extract_strided_slice %101 {offsets = [0, 0], sizes = [46, 128], strides = [1, 1]} : vector<50x128xf32> to vector<46x128xf32>
      %104 = vector.extract_strided_slice %101 {offsets = [0, 0], sizes = [46, 128], strides = [1, 1]} : vector<50x128xf32> to vector<46x128xf32>
      %105 = vector.extract_strided_slice %99 {offsets = [1, 0], sizes = [46, 128], strides = [1, 1]} : vector<50x128xf32> to vector<46x128xf32>
      %106 = vector.extract_strided_slice %99 {offsets = [1, 0], sizes = [46, 128], strides = [1, 1]} : vector<50x128xf32> to vector<46x128xf32>
      %107 = vector.extract_strided_slice %101 {offsets = [1, 0], sizes = [46, 128], strides = [1, 1]} : vector<50x128xf32> to vector<46x128xf32>
      %108 = vector.extract_strided_slice %101 {offsets = [1, 0], sizes = [46, 128], strides = [1, 1]} : vector<50x128xf32> to vector<46x128xf32>
      %109 = vector.extract_strided_slice %99 {offsets = [2, 0], sizes = [46, 128], strides = [1, 1]} : vector<50x128xf32> to vector<46x128xf32>
      %110 = vector.extract_strided_slice %99 {offsets = [2, 0], sizes = [46, 128], strides = [1, 1]} : vector<50x128xf32> to vector<46x128xf32>
      %111 = vector.extract_strided_slice %101 {offsets = [2, 0], sizes = [46, 128], strides = [1, 1]} : vector<50x128xf32> to vector<46x128xf32>
      %112 = vector.extract_strided_slice %101 {offsets = [2, 0], sizes = [46, 128], strides = [1, 1]} : vector<50x128xf32> to vector<46x128xf32>
      %113 = vector.extract_strided_slice %99 {offsets = [3, 0], sizes = [46, 128], strides = [1, 1]} : vector<50x128xf32> to vector<46x128xf32>
      %114 = vector.extract_strided_slice %99 {offsets = [3, 0], sizes = [46, 128], strides = [1, 1]} : vector<50x128xf32> to vector<46x128xf32>
      %115 = vector.extract_strided_slice %101 {offsets = [3, 0], sizes = [46, 128], strides = [1, 1]} : vector<50x128xf32> to vector<46x128xf32>
      %116 = vector.extract_strided_slice %101 {offsets = [3, 0], sizes = [46, 128], strides = [1, 1]} : vector<50x128xf32> to vector<46x128xf32>
      %117 = vector.extract_strided_slice %99 {offsets = [4, 0], sizes = [46, 128], strides = [1, 1]} : vector<50x128xf32> to vector<46x128xf32>
      %118 = tpu.concatenate %102, %104, %106, %108, %110, %112, %114, %116 in 1 : vector<46x128xf32>, vector<46x128xf32>, vector<46x128xf32>, vector<46x128xf32>, vector<46x128xf32>, vector<46x128xf32>, vector<46x128xf32>, vector<46x128xf32> -> vector<46x1024xf32>
      %119 = arith.truncf %118 : vector<46x1024xf32> to vector<46x1024xbf16>
      %c0_62 = arith.constant 0 : index
      %c0_63 = arith.constant 0 : index
      %120 = vector.load %arg5[%c0_62, %c0_63] : memref<1024x128xbf16, #tpu.memory_space<vmem>>, vector<1024x128xbf16>
      %cst_64 = arith.constant dense<0.000000e+00> : vector<46x128xf32>
      %121 = tpu.matmul %119, %120, %cst_64 {dimension_numbers = #tpu.dot_dimension_numbers<[1], [0], [0], [1], [0, 0, 1, 1], [], []>} : vector<46x1024xbf16>, vector<1024x128xbf16>, vector<46x128xf32> -> vector<46x128xf32>
      %122 = tpu.concatenate %103, %105, %107, %109, %111, %113, %115, %117 in 1 : vector<46x128xf32>, vector<46x128xf32>, vector<46x128xf32>, vector<46x128xf32>, vector<46x128xf32>, vector<46x128xf32>, vector<46x128xf32>, vector<46x128xf32> -> vector<46x1024xf32>
      %123 = arith.truncf %122 : vector<46x1024xf32> to vector<46x1024xbf16>
      %c0_65 = arith.constant 0 : index
      %c0_66 = arith.constant 0 : index
      %124 = vector.load %arg5[%c0_65, %c0_66] : memref<1024x128xbf16, #tpu.memory_space<vmem>>, vector<1024x128xbf16>
      %cst_67 = arith.constant dense<0.000000e+00> : vector<46x128xf32>
      %125 = tpu.matmul %123, %124, %cst_67 {dimension_numbers = #tpu.dot_dimension_numbers<[1], [0], [0], [1], [0, 0, 1, 1], [], []>} : vector<46x1024xbf16>, vector<1024x128xbf16>, vector<46x128xf32> -> vector<46x128xf32>
      %126 = arith.maximumf %121, %125 : vector<46x128xf32>
      %c0_68 = arith.constant 0 : index
      %c0_69 = arith.constant 0 : index
      %127 = vector.load %arg6[%c0_68, %c0_69] : memref<1x128xf32, #tpu.memory_space<vmem>>, vector<1x128xf32>
      %128 = vector.broadcast %127 : vector<1x128xf32> to vector<46x128xf32>
      %129 = arith.addf %126, %128 : vector<46x128xf32>
      %cst_70 = arith.constant 0.000000e+00 : f32
      %130 = vector.broadcast %cst_70 : f32 to vector<46x128xf32>
      %131 = arith.maximumf %129, %130 : vector<46x128xf32>
      %cst_71 = arith.constant 0.000000e+00 : f32
      %132 = vector.broadcast %cst_71 : f32 to vector<1x128xf32>
      %133 = vector.extract_strided_slice %39 {offsets = [0, 0], sizes = [1, 128], strides = [1, 1]} : vector<49x128xf32> to vector<1x128xf32>
      %134 = vector.extract_strided_slice %39 {offsets = [1, 0], sizes = [1, 128], strides = [1, 1]} : vector<49x128xf32> to vector<1x128xf32>
      %135 = vector.extract_strided_slice %39 {offsets = [2, 0], sizes = [1, 128], strides = [1, 1]} : vector<49x128xf32> to vector<1x128xf32>
      %136 = vector.extract_strided_slice %39 {offsets = [3, 0], sizes = [1, 128], strides = [1, 1]} : vector<49x128xf32> to vector<1x128xf32>
      %137 = vector.extract_strided_slice %39 {offsets = [4, 0], sizes = [1, 128], strides = [1, 1]} : vector<49x128xf32> to vector<1x128xf32>
      %138 = vector.extract_strided_slice %39 {offsets = [5, 0], sizes = [1, 128], strides = [1, 1]} : vector<49x128xf32> to vector<1x128xf32>
      %139 = vector.extract_strided_slice %39 {offsets = [6, 0], sizes = [1, 128], strides = [1, 1]} : vector<49x128xf32> to vector<1x128xf32>
      %140 = vector.extract_strided_slice %39 {offsets = [7, 0], sizes = [1, 128], strides = [1, 1]} : vector<49x128xf32> to vector<1x128xf32>
      %141 = vector.extract_strided_slice %39 {offsets = [8, 0], sizes = [1, 128], strides = [1, 1]} : vector<49x128xf32> to vector<1x128xf32>
      %142 = vector.extract_strided_slice %39 {offsets = [9, 0], sizes = [1, 128], strides = [1, 1]} : vector<49x128xf32> to vector<1x128xf32>
      %143 = vector.extract_strided_slice %39 {offsets = [10, 0], sizes = [1, 128], strides = [1, 1]} : vector<49x128xf32> to vector<1x128xf32>
      %144 = vector.extract_strided_slice %39 {offsets = [11, 0], sizes = [1, 128], strides = [1, 1]} : vector<49x128xf32> to vector<1x128xf32>
      %145 = vector.extract_strided_slice %39 {offsets = [12, 0], sizes = [1, 128], strides = [1, 1]} : vector<49x128xf32> to vector<1x128xf32>
      %146 = vector.extract_strided_slice %39 {offsets = [13, 0], sizes = [1, 128], strides = [1, 1]} : vector<49x128xf32> to vector<1x128xf32>
      %147 = vector.extract_strided_slice %39 {offsets = [14, 0], sizes = [1, 128], strides = [1, 1]} : vector<49x128xf32> to vector<1x128xf32>
      %148 = vector.extract_strided_slice %39 {offsets = [15, 0], sizes = [1, 128], strides = [1, 1]} : vector<49x128xf32> to vector<1x128xf32>
      %149 = vector.extract_strided_slice %39 {offsets = [16, 0], sizes = [1, 128], strides = [1, 1]} : vector<49x128xf32> to vector<1x128xf32>
      %150 = vector.extract_strided_slice %39 {offsets = [17, 0], sizes = [1, 128], strides = [1, 1]} : vector<49x128xf32> to vector<1x128xf32>
      %151 = vector.extract_strided_slice %39 {offsets = [18, 0], sizes = [1, 128], strides = [1, 1]} : vector<49x128xf32> to vector<1x128xf32>
      %152 = vector.extract_strided_slice %39 {offsets = [19, 0], sizes = [1, 128], strides = [1, 1]} : vector<49x128xf32> to vector<1x128xf32>
      %153 = vector.extract_strided_slice %39 {offsets = [20, 0], sizes = [1, 128], strides = [1, 1]} : vector<49x128xf32> to vector<1x128xf32>
      %154 = vector.extract_strided_slice %39 {offsets = [21, 0], sizes = [1, 128], strides = [1, 1]} : vector<49x128xf32> to vector<1x128xf32>
      %155 = vector.extract_strided_slice %39 {offsets = [22, 0], sizes = [1, 128], strides = [1, 1]} : vector<49x128xf32> to vector<1x128xf32>
      %156 = vector.extract_strided_slice %39 {offsets = [23, 0], sizes = [1, 128], strides = [1, 1]} : vector<49x128xf32> to vector<1x128xf32>
      %157 = vector.extract_strided_slice %39 {offsets = [24, 0], sizes = [1, 128], strides = [1, 1]} : vector<49x128xf32> to vector<1x128xf32>
      %158 = vector.extract_strided_slice %39 {offsets = [25, 0], sizes = [1, 128], strides = [1, 1]} : vector<49x128xf32> to vector<1x128xf32>
      %159 = vector.extract_strided_slice %39 {offsets = [26, 0], sizes = [1, 128], strides = [1, 1]} : vector<49x128xf32> to vector<1x128xf32>
      %160 = vector.extract_strided_slice %39 {offsets = [27, 0], sizes = [1, 128], strides = [1, 1]} : vector<49x128xf32> to vector<1x128xf32>
      %161 = vector.extract_strided_slice %39 {offsets = [28, 0], sizes = [1, 128], strides = [1, 1]} : vector<49x128xf32> to vector<1x128xf32>
      %162 = vector.extract_strided_slice %39 {offsets = [29, 0], sizes = [1, 128], strides = [1, 1]} : vector<49x128xf32> to vector<1x128xf32>
      %163 = vector.extract_strided_slice %39 {offsets = [30, 0], sizes = [1, 128], strides = [1, 1]} : vector<49x128xf32> to vector<1x128xf32>
      %164 = vector.extract_strided_slice %39 {offsets = [31, 0], sizes = [1, 128], strides = [1, 1]} : vector<49x128xf32> to vector<1x128xf32>
      %165 = tpu.concatenate %133, %134, %135, %136, %137, %138, %139, %140, %141, %142, %143, %144, %145, %146, %147, %148 in 1 : vector<1x128xf32>, vector<1x128xf32>, vector<1x128xf32>, vector<1x128xf32>, vector<1x128xf32>, vector<1x128xf32>, vector<1x128xf32>, vector<1x128xf32>, vector<1x128xf32>, vector<1x128xf32>, vector<1x128xf32>, vector<1x128xf32>, vector<1x128xf32>, vector<1x128xf32>, vector<1x128xf32>, vector<1x128xf32> -> vector<1x2048xf32>
      %166 = tpu.concatenate %149, %150, %151, %152, %153, %154, %155, %156, %157, %158, %159, %160, %161, %162, %163, %164 in 1 : vector<1x128xf32>, vector<1x128xf32>, vector<1x128xf32>, vector<1x128xf32>, vector<1x128xf32>, vector<1x128xf32>, vector<1x128xf32>, vector<1x128xf32>, vector<1x128xf32>, vector<1x128xf32>, vector<1x128xf32>, vector<1x128xf32>, vector<1x128xf32>, vector<1x128xf32>, vector<1x128xf32>, vector<1x128xf32> -> vector<1x2048xf32>
      %167 = tpu.concatenate %165, %166 in 1 : vector<1x2048xf32>, vector<1x2048xf32> -> vector<1x4096xf32>
      %168 = arith.truncf %167 : vector<1x4096xf32> to vector<1x4096xbf16>
      %c0_72 = arith.constant 0 : index
      %c0_73 = arith.constant 0 : index
      %c0_74 = arith.constant 0 : index
      %169 = vector.load %arg12[%c0_72, %c0_73, %c0_74] : memref<3x2x4096xbf16, #tpu.memory_space<vmem>>, vector<1x1x4096xbf16>
      %170 = vector.shape_cast %169 : vector<1x1x4096xbf16> to vector<1x4096xbf16>
      %171 = vector.shape_cast %168 : vector<1x4096xbf16> to vector<1x1x4096xbf16>
      tpu.vector_store %arg12[%c0_72, %c0_73, %c0_74], %171 {strides = array<i32>} : memref<3x2x4096xbf16, #tpu.memory_space<vmem>>, vector<1x1x4096xbf16>,
      %172 = vector.extract_strided_slice %63 {offsets = [0, 0], sizes = [1, 128], strides = [1, 1]} : vector<49x128xf32> to vector<1x128xf32>
      %173 = vector.extract_strided_slice %63 {offsets = [1, 0], sizes = [1, 128], strides = [1, 1]} : vector<49x128xf32> to vector<1x128xf32>
      %174 = vector.extract_strided_slice %63 {offsets = [2, 0], sizes = [1, 128], strides = [1, 1]} : vector<49x128xf32> to vector<1x128xf32>
      %175 = vector.extract_strided_slice %63 {offsets = [3, 0], sizes = [1, 128], strides = [1, 1]} : vector<49x128xf32> to vector<1x128xf32>
      %176 = vector.extract_strided_slice %63 {offsets = [4, 0], sizes = [1, 128], strides = [1, 1]} : vector<49x128xf32> to vector<1x128xf32>
      %177 = vector.extract_strided_slice %63 {offsets = [5, 0], sizes = [1, 128], strides = [1, 1]} : vector<49x128xf32> to vector<1x128xf32>
      %178 = vector.extract_strided_slice %63 {offsets = [6, 0], sizes = [1, 128], strides = [1, 1]} : vector<49x128xf32> to vector<1x128xf32>
      %179 = vector.extract_strided_slice %63 {offsets = [7, 0], sizes = [1, 128], strides = [1, 1]} : vector<49x128xf32> to vector<1x128xf32>
      %180 = vector.extract_strided_slice %63 {offsets = [8, 0], sizes = [1, 128], strides = [1, 1]} : vector<49x128xf32> to vector<1x128xf32>
      %181 = vector.extract_strided_slice %63 {offsets = [9, 0], sizes = [1, 128], strides = [1, 1]} : vector<49x128xf32> to vector<1x128xf32>
      %182 = vector.extract_strided_slice %63 {offsets = [10, 0], sizes = [1, 128], strides = [1, 1]} : vector<49x128xf32> to vector<1x128xf32>
      %183 = vector.extract_strided_slice %63 {offsets = [11, 0], sizes = [1, 128], strides = [1, 1]} : vector<49x128xf32> to vector<1x128xf32>
      %184 = vector.extract_strided_slice %63 {offsets = [12, 0], sizes = [1, 128], strides = [1, 1]} : vector<49x128xf32> to vector<1x128xf32>
      %185 = vector.extract_strided_slice %63 {offsets = [13, 0], sizes = [1, 128], strides = [1, 1]} : vector<49x128xf32> to vector<1x128xf32>
      %186 = vector.extract_strided_slice %63 {offsets = [14, 0], sizes = [1, 128], strides = [1, 1]} : vector<49x128xf32> to vector<1x128xf32>
      %187 = vector.extract_strided_slice %63 {offsets = [15, 0], sizes = [1, 128], strides = [1, 1]} : vector<49x128xf32> to vector<1x128xf32>
      %188 = vector.extract_strided_slice %63 {offsets = [16, 0], sizes = [1, 128], strides = [1, 1]} : vector<49x128xf32> to vector<1x128xf32>
      %189 = vector.extract_strided_slice %63 {offsets = [17, 0], sizes = [1, 128], strides = [1, 1]} : vector<49x128xf32> to vector<1x128xf32>
      %190 = vector.extract_strided_slice %63 {offsets = [18, 0], sizes = [1, 128], strides = [1, 1]} : vector<49x128xf32> to vector<1x128xf32>
      %191 = vector.extract_strided_slice %63 {offsets = [19, 0], sizes = [1, 128], strides = [1, 1]} : vector<49x128xf32> to vector<1x128xf32>
      %192 = vector.extract_strided_slice %63 {offsets = [20, 0], sizes = [1, 128], strides = [1, 1]} : vector<49x128xf32> to vector<1x128xf32>
      %193 = vector.extract_strided_slice %63 {offsets = [21, 0], sizes = [1, 128], strides = [1, 1]} : vector<49x128xf32> to vector<1x128xf32>
      %194 = vector.extract_strided_slice %63 {offsets = [22, 0], sizes = [1, 128], strides = [1, 1]} : vector<49x128xf32> to vector<1x128xf32>
      %195 = vector.extract_strided_slice %63 {offsets = [23, 0], sizes = [1, 128], strides = [1, 1]} : vector<49x128xf32> to vector<1x128xf32>
      %196 = vector.extract_strided_slice %63 {offsets = [24, 0], sizes = [1, 128], strides = [1, 1]} : vector<49x128xf32> to vector<1x128xf32>
      %197 = vector.extract_strided_slice %63 {offsets = [25, 0], sizes = [1, 128], strides = [1, 1]} : vector<49x128xf32> to vector<1x128xf32>
      %198 = vector.extract_strided_slice %63 {offsets = [26, 0], sizes = [1, 128], strides = [1, 1]} : vector<49x128xf32> to vector<1x128xf32>
      %199 = vector.extract_strided_slice %63 {offsets = [27, 0], sizes = [1, 128], strides = [1, 1]} : vector<49x128xf32> to vector<1x128xf32>
      %200 = vector.extract_strided_slice %63 {offsets = [28, 0], sizes = [1, 128], strides = [1, 1]} : vector<49x128xf32> to vector<1x128xf32>
      %201 = vector.extract_strided_slice %63 {offsets = [29, 0], sizes = [1, 128], strides = [1, 1]} : vector<49x128xf32> to vector<1x128xf32>
      %202 = vector.extract_strided_slice %63 {offsets = [30, 0], sizes = [1, 128], strides = [1, 1]} : vector<49x128xf32> to vector<1x128xf32>
      %203 = vector.extract_strided_slice %63 {offsets = [31, 0], sizes = [1, 128], strides = [1, 1]} : vector<49x128xf32> to vector<1x128xf32>
      %204 = tpu.concatenate %172, %173, %174, %175, %176, %177, %178, %179, %180, %181, %182, %183, %184, %185, %186, %187 in 1 : vector<1x128xf32>, vector<1x128xf32>, vector<1x128xf32>, vector<1x128xf32>, vector<1x128xf32>, vector<1x128xf32>, vector<1x128xf32>, vector<1x128xf32>, vector<1x128xf32>, vector<1x128xf32>, vector<1x128xf32>, vector<1x128xf32>, vector<1x128xf32>, vector<1x128xf32>, vector<1x128xf32>, vector<1x128xf32> -> vector<1x2048xf32>
      %205 = tpu.concatenate %188, %189, %190, %191, %192, %193, %194, %195, %196, %197, %198, %199, %200, %201, %202, %203 in 1 : vector<1x128xf32>, vector<1x128xf32>, vector<1x128xf32>, vector<1x128xf32>, vector<1x128xf32>, vector<1x128xf32>, vector<1x128xf32>, vector<1x128xf32>, vector<1x128xf32>, vector<1x128xf32>, vector<1x128xf32>, vector<1x128xf32>, vector<1x128xf32>, vector<1x128xf32>, vector<1x128xf32>, vector<1x128xf32> -> vector<1x2048xf32>
      %206 = tpu.concatenate %204, %205 in 1 : vector<1x2048xf32>, vector<1x2048xf32> -> vector<1x4096xf32>
      %207 = arith.truncf %206 : vector<1x4096xf32> to vector<1x4096xbf16>
      %c0_75 = arith.constant 0 : index
      %c1_76 = arith.constant 1 : index
      %c0_77 = arith.constant 0 : index
      %208 = vector.load %arg12[%c0_75, %c1_76, %c0_77] : memref<3x2x4096xbf16, #tpu.memory_space<vmem>>, vector<1x1x4096xbf16>
      %209 = vector.shape_cast %208 : vector<1x1x4096xbf16> to vector<1x4096xbf16>
      %210 = vector.shape_cast %207 : vector<1x4096xbf16> to vector<1x1x4096xbf16>
      tpu.vector_store %arg12[%c0_75, %c1_76, %c0_77], %210 {strides = array<i32>} : memref<3x2x4096xbf16, #tpu.memory_space<vmem>>, vector<1x1x4096xbf16>,
      %211 = vector.extract_strided_slice %39 {offsets = [32, 0], sizes = [1, 128], strides = [1, 1]} : vector<49x128xf32> to vector<1x128xf32>
      %212 = vector.extract_strided_slice %39 {offsets = [33, 0], sizes = [1, 128], strides = [1, 1]} : vector<49x128xf32> to vector<1x128xf32>
      %213 = vector.extract_strided_slice %39 {offsets = [34, 0], sizes = [1, 128], strides = [1, 1]} : vector<49x128xf32> to vector<1x128xf32>
      %214 = vector.extract_strided_slice %39 {offsets = [35, 0], sizes = [1, 128], strides = [1, 1]} : vector<49x128xf32> to vector<1x128xf32>
      %215 = vector.extract_strided_slice %39 {offsets = [36, 0], sizes = [1, 128], strides = [1, 1]} : vector<49x128xf32> to vector<1x128xf32>
      %216 = vector.extract_strided_slice %39 {offsets = [37, 0], sizes = [1, 128], strides = [1, 1]} : vector<49x128xf32> to vector<1x128xf32>
      %217 = vector.extract_strided_slice %39 {offsets = [38, 0], sizes = [1, 128], strides = [1, 1]} : vector<49x128xf32> to vector<1x128xf32>
      %218 = vector.extract_strided_slice %39 {offsets = [39, 0], sizes = [1, 128], strides = [1, 1]} : vector<49x128xf32> to vector<1x128xf32>
      %219 = vector.extract_strided_slice %39 {offsets = [40, 0], sizes = [1, 128], strides = [1, 1]} : vector<49x128xf32> to vector<1x128xf32>
      %220 = vector.extract_strided_slice %39 {offsets = [41, 0], sizes = [1, 128], strides = [1, 1]} : vector<49x128xf32> to vector<1x128xf32>
      %221 = vector.extract_strided_slice %39 {offsets = [42, 0], sizes = [1, 128], strides = [1, 1]} : vector<49x128xf32> to vector<1x128xf32>
      %222 = vector.extract_strided_slice %39 {offsets = [43, 0], sizes = [1, 128], strides = [1, 1]} : vector<49x128xf32> to vector<1x128xf32>
      %223 = vector.extract_strided_slice %39 {offsets = [44, 0], sizes = [1, 128], strides = [1, 1]} : vector<49x128xf32> to vector<1x128xf32>
      %224 = vector.extract_strided_slice %39 {offsets = [45, 0], sizes = [1, 128], strides = [1, 1]} : vector<49x128xf32> to vector<1x128xf32>
      %225 = vector.extract_strided_slice %39 {offsets = [46, 0], sizes = [1, 128], strides = [1, 1]} : vector<49x128xf32> to vector<1x128xf32>
      %226 = vector.extract_strided_slice %39 {offsets = [47, 0], sizes = [1, 128], strides = [1, 1]} : vector<49x128xf32> to vector<1x128xf32>
      %227 = vector.extract_strided_slice %39 {offsets = [48, 0], sizes = [1, 128], strides = [1, 1]} : vector<49x128xf32> to vector<1x128xf32>
      %228 = vector.extract_strided_slice %97 {offsets = [0, 0], sizes = [1, 128], strides = [1, 1]} : vector<46x128xf32> to vector<1x128xf32>
      %229 = vector.extract_strided_slice %97 {offsets = [1, 0], sizes = [1, 128], strides = [1, 1]} : vector<46x128xf32> to vector<1x128xf32>
      %230 = vector.extract_strided_slice %97 {offsets = [2, 0], sizes = [1, 128], strides = [1, 1]} : vector<46x128xf32> to vector<1x128xf32>
      %231 = vector.extract_strided_slice %97 {offsets = [3, 0], sizes = [1, 128], strides = [1, 1]} : vector<46x128xf32> to vector<1x128xf32>
      %232 = vector.extract_strided_slice %97 {offsets = [4, 0], sizes = [1, 128], strides = [1, 1]} : vector<46x128xf32> to vector<1x128xf32>
      %233 = vector.extract_strided_slice %97 {offsets = [5, 0], sizes = [1, 128], strides = [1, 1]} : vector<46x128xf32> to vector<1x128xf32>
      %234 = vector.extract_strided_slice %97 {offsets = [6, 0], sizes = [1, 128], strides = [1, 1]} : vector<46x128xf32> to vector<1x128xf32>
      %235 = vector.extract_strided_slice %97 {offsets = [7, 0], sizes = [1, 128], strides = [1, 1]} : vector<46x128xf32> to vector<1x128xf32>
      %236 = vector.extract_strided_slice %97 {offsets = [8, 0], sizes = [1, 128], strides = [1, 1]} : vector<46x128xf32> to vector<1x128xf32>
      %237 = vector.extract_strided_slice %97 {offsets = [9, 0], sizes = [1, 128], strides = [1, 1]} : vector<46x128xf32> to vector<1x128xf32>
      %238 = vector.extract_strided_slice %97 {offsets = [10, 0], sizes = [1, 128], strides = [1, 1]} : vector<46x128xf32> to vector<1x128xf32>
      %239 = vector.extract_strided_slice %97 {offsets = [11, 0], sizes = [1, 128], strides = [1, 1]} : vector<46x128xf32> to vector<1x128xf32>
      %240 = vector.extract_strided_slice %97 {offsets = [12, 0], sizes = [1, 128], strides = [1, 1]} : vector<46x128xf32> to vector<1x128xf32>
      %241 = vector.extract_strided_slice %97 {offsets = [13, 0], sizes = [1, 128], strides = [1, 1]} : vector<46x128xf32> to vector<1x128xf32>
      %242 = vector.extract_strided_slice %97 {offsets = [14, 0], sizes = [1, 128], strides = [1, 1]} : vector<46x128xf32> to vector<1x128xf32>
      %243 = tpu.concatenate %211, %212, %213, %214, %215, %216, %217, %218, %219, %220, %221, %222, %223, %224, %225, %226 in 1 : vector<1x128xf32>, vector<1x128xf32>, vector<1x128xf32>, vector<1x128xf32>, vector<1x128xf32>, vector<1x128xf32>, vector<1x128xf32>, vector<1x128xf32>, vector<1x128xf32>, vector<1x128xf32>, vector<1x128xf32>, vector<1x128xf32>, vector<1x128xf32>, vector<1x128xf32>, vector<1x128xf32>, vector<1x128xf32> -> vector<1x2048xf32>
      %244 = tpu.concatenate %227, %228, %229, %230, %231, %232, %233, %234, %235, %236, %237, %238, %239, %240, %241, %242 in 1 : vector<1x128xf32>, vector<1x128xf32>, vector<1x128xf32>, vector<1x128xf32>, vector<1x128xf32>, vector<1x128xf32>, vector<1x128xf32>, vector<1x128xf32>, vector<1x128xf32>, vector<1x128xf32>, vector<1x128xf32>, vector<1x128xf32>, vector<1x128xf32>, vector<1x128xf32>, vector<1x128xf32>, vector<1x128xf32> -> vector<1x2048xf32>
      %245 = tpu.concatenate %243, %244 in 1 : vector<1x2048xf32>, vector<1x2048xf32> -> vector<1x4096xf32>
      %246 = arith.truncf %245 : vector<1x4096xf32> to vector<1x4096xbf16>
      %c1_78 = arith.constant 1 : index
      %c0_79 = arith.constant 0 : index
      %c0_80 = arith.constant 0 : index
      %247 = vector.load %arg12[%c1_78, %c0_79, %c0_80] : memref<3x2x4096xbf16, #tpu.memory_space<vmem>>, vector<1x1x4096xbf16>
      %248 = vector.shape_cast %247 : vector<1x1x4096xbf16> to vector<1x4096xbf16>
      %249 = vector.shape_cast %246 : vector<1x4096xbf16> to vector<1x1x4096xbf16>
      tpu.vector_store %arg12[%c1_78, %c0_79, %c0_80], %249 {strides = array<i32>} : memref<3x2x4096xbf16, #tpu.memory_space<vmem>>, vector<1x1x4096xbf16>,
      %250 = vector.extract_strided_slice %63 {offsets = [32, 0], sizes = [1, 128], strides = [1, 1]} : vector<49x128xf32> to vector<1x128xf32>
      %251 = vector.extract_strided_slice %63 {offsets = [33, 0], sizes = [1, 128], strides = [1, 1]} : vector<49x128xf32> to vector<1x128xf32>
      %252 = vector.extract_strided_slice %63 {offsets = [34, 0], sizes = [1, 128], strides = [1, 1]} : vector<49x128xf32> to vector<1x128xf32>
      %253 = vector.extract_strided_slice %63 {offsets = [35, 0], sizes = [1, 128], strides = [1, 1]} : vector<49x128xf32> to vector<1x128xf32>
      %254 = vector.extract_strided_slice %63 {offsets = [36, 0], sizes = [1, 128], strides = [1, 1]} : vector<49x128xf32> to vector<1x128xf32>
      %255 = vector.extract_strided_slice %63 {offsets = [37, 0], sizes = [1, 128], strides = [1, 1]} : vector<49x128xf32> to vector<1x128xf32>
      %256 = vector.extract_strided_slice %63 {offsets = [38, 0], sizes = [1, 128], strides = [1, 1]} : vector<49x128xf32> to vector<1x128xf32>
      %257 = vector.extract_strided_slice %63 {offsets = [39, 0], sizes = [1, 128], strides = [1, 1]} : vector<49x128xf32> to vector<1x128xf32>
      %258 = vector.extract_strided_slice %63 {offsets = [40, 0], sizes = [1, 128], strides = [1, 1]} : vector<49x128xf32> to vector<1x128xf32>
      %259 = vector.extract_strided_slice %63 {offsets = [41, 0], sizes = [1, 128], strides = [1, 1]} : vector<49x128xf32> to vector<1x128xf32>
      %260 = vector.extract_strided_slice %63 {offsets = [42, 0], sizes = [1, 128], strides = [1, 1]} : vector<49x128xf32> to vector<1x128xf32>
      %261 = vector.extract_strided_slice %63 {offsets = [43, 0], sizes = [1, 128], strides = [1, 1]} : vector<49x128xf32> to vector<1x128xf32>
      %262 = vector.extract_strided_slice %63 {offsets = [44, 0], sizes = [1, 128], strides = [1, 1]} : vector<49x128xf32> to vector<1x128xf32>
      %263 = vector.extract_strided_slice %63 {offsets = [45, 0], sizes = [1, 128], strides = [1, 1]} : vector<49x128xf32> to vector<1x128xf32>
      %264 = vector.extract_strided_slice %63 {offsets = [46, 0], sizes = [1, 128], strides = [1, 1]} : vector<49x128xf32> to vector<1x128xf32>
      %265 = vector.extract_strided_slice %63 {offsets = [47, 0], sizes = [1, 128], strides = [1, 1]} : vector<49x128xf32> to vector<1x128xf32>
      %266 = vector.extract_strided_slice %63 {offsets = [48, 0], sizes = [1, 128], strides = [1, 1]} : vector<49x128xf32> to vector<1x128xf32>
      %267 = vector.extract_strided_slice %131 {offsets = [0, 0], sizes = [1, 128], strides = [1, 1]} : vector<46x128xf32> to vector<1x128xf32>
      %268 = vector.extract_strided_slice %131 {offsets = [1, 0], sizes = [1, 128], strides = [1, 1]} : vector<46x128xf32> to vector<1x128xf32>
      %269 = vector.extract_strided_slice %131 {offsets = [2, 0], sizes = [1, 128], strides = [1, 1]} : vector<46x128xf32> to vector<1x128xf32>
      %270 = vector.extract_strided_slice %131 {offsets = [3, 0], sizes = [1, 128], strides = [1, 1]} : vector<46x128xf32> to vector<1x128xf32>
      %271 = vector.extract_strided_slice %131 {offsets = [4, 0], sizes = [1, 128], strides = [1, 1]} : vector<46x128xf32> to vector<1x128xf32>
      %272 = vector.extract_strided_slice %131 {offsets = [5, 0], sizes = [1, 128], strides = [1, 1]} : vector<46x128xf32> to vector<1x128xf32>
      %273 = vector.extract_strided_slice %131 {offsets = [6, 0], sizes = [1, 128], strides = [1, 1]} : vector<46x128xf32> to vector<1x128xf32>
      %274 = vector.extract_strided_slice %131 {offsets = [7, 0], sizes = [1, 128], strides = [1, 1]} : vector<46x128xf32> to vector<1x128xf32>
      %275 = vector.extract_strided_slice %131 {offsets = [8, 0], sizes = [1, 128], strides = [1, 1]} : vector<46x128xf32> to vector<1x128xf32>
      %276 = vector.extract_strided_slice %131 {offsets = [9, 0], sizes = [1, 128], strides = [1, 1]} : vector<46x128xf32> to vector<1x128xf32>
      %277 = vector.extract_strided_slice %131 {offsets = [10, 0], sizes = [1, 128], strides = [1, 1]} : vector<46x128xf32> to vector<1x128xf32>
      %278 = vector.extract_strided_slice %131 {offsets = [11, 0], sizes = [1, 128], strides = [1, 1]} : vector<46x128xf32> to vector<1x128xf32>
      %279 = vector.extract_strided_slice %131 {offsets = [12, 0], sizes = [1, 128], strides = [1, 1]} : vector<46x128xf32> to vector<1x128xf32>
      %280 = vector.extract_strided_slice %131 {offsets = [13, 0], sizes = [1, 128], strides = [1, 1]} : vector<46x128xf32> to vector<1x128xf32>
      %281 = vector.extract_strided_slice %131 {offsets = [14, 0], sizes = [1, 128], strides = [1, 1]} : vector<46x128xf32> to vector<1x128xf32>
      %282 = tpu.concatenate %250, %251, %252, %253, %254, %255, %256, %257, %258, %259, %260, %261, %262, %263, %264, %265 in 1 : vector<1x128xf32>, vector<1x128xf32>, vector<1x128xf32>, vector<1x128xf32>, vector<1x128xf32>, vector<1x128xf32>, vector<1x128xf32>, vector<1x128xf32>, vector<1x128xf32>, vector<1x128xf32>, vector<1x128xf32>, vector<1x128xf32>, vector<1x128xf32>, vector<1x128xf32>, vector<1x128xf32>, vector<1x128xf32> -> vector<1x2048xf32>
      %283 = tpu.concatenate %266, %267, %268, %269, %270, %271, %272, %273, %274, %275, %276, %277, %278, %279, %280, %281 in 1 : vector<1x128xf32>, vector<1x128xf32>, vector<1x128xf32>, vector<1x128xf32>, vector<1x128xf32>, vector<1x128xf32>, vector<1x128xf32>, vector<1x128xf32>, vector<1x128xf32>, vector<1x128xf32>, vector<1x128xf32>, vector<1x128xf32>, vector<1x128xf32>, vector<1x128xf32>, vector<1x128xf32>, vector<1x128xf32> -> vector<1x2048xf32>
      %284 = tpu.concatenate %282, %283 in 1 : vector<1x2048xf32>, vector<1x2048xf32> -> vector<1x4096xf32>
      %285 = arith.truncf %284 : vector<1x4096xf32> to vector<1x4096xbf16>
      %c1_81 = arith.constant 1 : index
      %c1_82 = arith.constant 1 : index
      %c0_83 = arith.constant 0 : index
      %286 = vector.load %arg12[%c1_81, %c1_82, %c0_83] : memref<3x2x4096xbf16, #tpu.memory_space<vmem>>, vector<1x1x4096xbf16>
      %287 = vector.shape_cast %286 : vector<1x1x4096xbf16> to vector<1x4096xbf16>
      %288 = vector.shape_cast %285 : vector<1x4096xbf16> to vector<1x1x4096xbf16>
      tpu.vector_store %arg12[%c1_81, %c1_82, %c0_83], %288 {strides = array<i32>} : memref<3x2x4096xbf16, #tpu.memory_space<vmem>>, vector<1x1x4096xbf16>,
      %289 = vector.extract_strided_slice %97 {offsets = [15, 0], sizes = [1, 128], strides = [1, 1]} : vector<46x128xf32> to vector<1x128xf32>
      %290 = vector.extract_strided_slice %97 {offsets = [16, 0], sizes = [1, 128], strides = [1, 1]} : vector<46x128xf32> to vector<1x128xf32>
      %291 = vector.extract_strided_slice %97 {offsets = [17, 0], sizes = [1, 128], strides = [1, 1]} : vector<46x128xf32> to vector<1x128xf32>
      %292 = vector.extract_strided_slice %97 {offsets = [18, 0], sizes = [1, 128], strides = [1, 1]} : vector<46x128xf32> to vector<1x128xf32>
      %293 = vector.extract_strided_slice %97 {offsets = [19, 0], sizes = [1, 128], strides = [1, 1]} : vector<46x128xf32> to vector<1x128xf32>
      %294 = vector.extract_strided_slice %97 {offsets = [20, 0], sizes = [1, 128], strides = [1, 1]} : vector<46x128xf32> to vector<1x128xf32>
      %295 = vector.extract_strided_slice %97 {offsets = [21, 0], sizes = [1, 128], strides = [1, 1]} : vector<46x128xf32> to vector<1x128xf32>
      %296 = vector.extract_strided_slice %97 {offsets = [22, 0], sizes = [1, 128], strides = [1, 1]} : vector<46x128xf32> to vector<1x128xf32>
      %297 = vector.extract_strided_slice %97 {offsets = [23, 0], sizes = [1, 128], strides = [1, 1]} : vector<46x128xf32> to vector<1x128xf32>
      %298 = vector.extract_strided_slice %97 {offsets = [24, 0], sizes = [1, 128], strides = [1, 1]} : vector<46x128xf32> to vector<1x128xf32>
      %299 = vector.extract_strided_slice %97 {offsets = [25, 0], sizes = [1, 128], strides = [1, 1]} : vector<46x128xf32> to vector<1x128xf32>
      %300 = vector.extract_strided_slice %97 {offsets = [26, 0], sizes = [1, 128], strides = [1, 1]} : vector<46x128xf32> to vector<1x128xf32>
      %301 = vector.extract_strided_slice %97 {offsets = [27, 0], sizes = [1, 128], strides = [1, 1]} : vector<46x128xf32> to vector<1x128xf32>
      %302 = vector.extract_strided_slice %97 {offsets = [28, 0], sizes = [1, 128], strides = [1, 1]} : vector<46x128xf32> to vector<1x128xf32>
      %303 = vector.extract_strided_slice %97 {offsets = [29, 0], sizes = [1, 128], strides = [1, 1]} : vector<46x128xf32> to vector<1x128xf32>
      %304 = vector.extract_strided_slice %97 {offsets = [30, 0], sizes = [1, 128], strides = [1, 1]} : vector<46x128xf32> to vector<1x128xf32>
      %305 = vector.extract_strided_slice %97 {offsets = [31, 0], sizes = [1, 128], strides = [1, 1]} : vector<46x128xf32> to vector<1x128xf32>
      %306 = vector.extract_strided_slice %97 {offsets = [32, 0], sizes = [1, 128], strides = [1, 1]} : vector<46x128xf32> to vector<1x128xf32>
      %307 = vector.extract_strided_slice %97 {offsets = [33, 0], sizes = [1, 128], strides = [1, 1]} : vector<46x128xf32> to vector<1x128xf32>
      %308 = vector.extract_strided_slice %97 {offsets = [34, 0], sizes = [1, 128], strides = [1, 1]} : vector<46x128xf32> to vector<1x128xf32>
      %309 = vector.extract_strided_slice %97 {offsets = [35, 0], sizes = [1, 128], strides = [1, 1]} : vector<46x128xf32> to vector<1x128xf32>
      %310 = vector.extract_strided_slice %97 {offsets = [36, 0], sizes = [1, 128], strides = [1, 1]} : vector<46x128xf32> to vector<1x128xf32>
      %311 = vector.extract_strided_slice %97 {offsets = [37, 0], sizes = [1, 128], strides = [1, 1]} : vector<46x128xf32> to vector<1x128xf32>
      %312 = vector.extract_strided_slice %97 {offsets = [38, 0], sizes = [1, 128], strides = [1, 1]} : vector<46x128xf32> to vector<1x128xf32>
      %313 = vector.extract_strided_slice %97 {offsets = [39, 0], sizes = [1, 128], strides = [1, 1]} : vector<46x128xf32> to vector<1x128xf32>
      %314 = vector.extract_strided_slice %97 {offsets = [40, 0], sizes = [1, 128], strides = [1, 1]} : vector<46x128xf32> to vector<1x128xf32>
      %315 = vector.extract_strided_slice %97 {offsets = [41, 0], sizes = [1, 128], strides = [1, 1]} : vector<46x128xf32> to vector<1x128xf32>
      %316 = vector.extract_strided_slice %97 {offsets = [42, 0], sizes = [1, 128], strides = [1, 1]} : vector<46x128xf32> to vector<1x128xf32>
      %317 = vector.extract_strided_slice %97 {offsets = [43, 0], sizes = [1, 128], strides = [1, 1]} : vector<46x128xf32> to vector<1x128xf32>
      %318 = vector.extract_strided_slice %97 {offsets = [44, 0], sizes = [1, 128], strides = [1, 1]} : vector<46x128xf32> to vector<1x128xf32>
      %319 = vector.extract_strided_slice %97 {offsets = [45, 0], sizes = [1, 128], strides = [1, 1]} : vector<46x128xf32> to vector<1x128xf32>
      %320 = tpu.concatenate %289, %290, %291, %292, %293, %294, %295, %296, %297, %298, %299, %300, %301, %302, %303, %304 in 1 : vector<1x128xf32>, vector<1x128xf32>, vector<1x128xf32>, vector<1x128xf32>, vector<1x128xf32>, vector<1x128xf32>, vector<1x128xf32>, vector<1x128xf32>, vector<1x128xf32>, vector<1x128xf32>, vector<1x128xf32>, vector<1x128xf32>, vector<1x128xf32>, vector<1x128xf32>, vector<1x128xf32>, vector<1x128xf32> -> vector<1x2048xf32>
      %321 = tpu.concatenate %305, %306, %307, %308, %309, %310, %311, %312, %313, %314, %315, %316, %317, %318, %319, %132 in 1 : vector<1x128xf32>, vector<1x128xf32>, vector<1x128xf32>, vector<1x128xf32>, vector<1x128xf32>, vector<1x128xf32>, vector<1x128xf32>, vector<1x128xf32>, vector<1x128xf32>, vector<1x128xf32>, vector<1x128xf32>, vector<1x128xf32>, vector<1x128xf32>, vector<1x128xf32>, vector<1x128xf32>, vector<1x128xf32> -> vector<1x2048xf32>
      %322 = tpu.concatenate %320, %321 in 1 : vector<1x2048xf32>, vector<1x2048xf32> -> vector<1x4096xf32>
      %323 = arith.truncf %322 : vector<1x4096xf32> to vector<1x4096xbf16>
      %c2 = arith.constant 2 : index
      %c0_84 = arith.constant 0 : index
      %c0_85 = arith.constant 0 : index
      %324 = vector.load %arg12[%c2, %c0_84, %c0_85] : memref<3x2x4096xbf16, #tpu.memory_space<vmem>>, vector<1x1x4096xbf16>
      %325 = vector.shape_cast %324 : vector<1x1x4096xbf16> to vector<1x4096xbf16>
      %326 = vector.shape_cast %323 : vector<1x4096xbf16> to vector<1x1x4096xbf16>
      tpu.vector_store %arg12[%c2, %c0_84, %c0_85], %326 {strides = array<i32>} : memref<3x2x4096xbf16, #tpu.memory_space<vmem>>, vector<1x1x4096xbf16>,
      %327 = vector.extract_strided_slice %131 {offsets = [15, 0], sizes = [1, 128], strides = [1, 1]} : vector<46x128xf32> to vector<1x128xf32>
      %328 = vector.extract_strided_slice %131 {offsets = [16, 0], sizes = [1, 128], strides = [1, 1]} : vector<46x128xf32> to vector<1x128xf32>
      %329 = vector.extract_strided_slice %131 {offsets = [17, 0], sizes = [1, 128], strides = [1, 1]} : vector<46x128xf32> to vector<1x128xf32>
      %330 = vector.extract_strided_slice %131 {offsets = [18, 0], sizes = [1, 128], strides = [1, 1]} : vector<46x128xf32> to vector<1x128xf32>
      %331 = vector.extract_strided_slice %131 {offsets = [19, 0], sizes = [1, 128], strides = [1, 1]} : vector<46x128xf32> to vector<1x128xf32>
      %332 = vector.extract_strided_slice %131 {offsets = [20, 0], sizes = [1, 128], strides = [1, 1]} : vector<46x128xf32> to vector<1x128xf32>
      %333 = vector.extract_strided_slice %131 {offsets = [21, 0], sizes = [1, 128], strides = [1, 1]} : vector<46x128xf32> to vector<1x128xf32>
      %334 = vector.extract_strided_slice %131 {offsets = [22, 0], sizes = [1, 128], strides = [1, 1]} : vector<46x128xf32> to vector<1x128xf32>
      %335 = vector.extract_strided_slice %131 {offsets = [23, 0], sizes = [1, 128], strides = [1, 1]} : vector<46x128xf32> to vector<1x128xf32>
      %336 = vector.extract_strided_slice %131 {offsets = [24, 0], sizes = [1, 128], strides = [1, 1]} : vector<46x128xf32> to vector<1x128xf32>
      %337 = vector.extract_strided_slice %131 {offsets = [25, 0], sizes = [1, 128], strides = [1, 1]} : vector<46x128xf32> to vector<1x128xf32>
      %338 = vector.extract_strided_slice %131 {offsets = [26, 0], sizes = [1, 128], strides = [1, 1]} : vector<46x128xf32> to vector<1x128xf32>
      %339 = vector.extract_strided_slice %131 {offsets = [27, 0], sizes = [1, 128], strides = [1, 1]} : vector<46x128xf32> to vector<1x128xf32>
      %340 = vector.extract_strided_slice %131 {offsets = [28, 0], sizes = [1, 128], strides = [1, 1]} : vector<46x128xf32> to vector<1x128xf32>
      %341 = vector.extract_strided_slice %131 {offsets = [29, 0], sizes = [1, 128], strides = [1, 1]} : vector<46x128xf32> to vector<1x128xf32>
      %342 = vector.extract_strided_slice %131 {offsets = [30, 0], sizes = [1, 128], strides = [1, 1]} : vector<46x128xf32> to vector<1x128xf32>
      %343 = vector.extract_strided_slice %131 {offsets = [31, 0], sizes = [1, 128], strides = [1, 1]} : vector<46x128xf32> to vector<1x128xf32>
      %344 = vector.extract_strided_slice %131 {offsets = [32, 0], sizes = [1, 128], strides = [1, 1]} : vector<46x128xf32> to vector<1x128xf32>
      %345 = vector.extract_strided_slice %131 {offsets = [33, 0], sizes = [1, 128], strides = [1, 1]} : vector<46x128xf32> to vector<1x128xf32>
      %346 = vector.extract_strided_slice %131 {offsets = [34, 0], sizes = [1, 128], strides = [1, 1]} : vector<46x128xf32> to vector<1x128xf32>
      %347 = vector.extract_strided_slice %131 {offsets = [35, 0], sizes = [1, 128], strides = [1, 1]} : vector<46x128xf32> to vector<1x128xf32>
      %348 = vector.extract_strided_slice %131 {offsets = [36, 0], sizes = [1, 128], strides = [1, 1]} : vector<46x128xf32> to vector<1x128xf32>
      %349 = vector.extract_strided_slice %131 {offsets = [37, 0], sizes = [1, 128], strides = [1, 1]} : vector<46x128xf32> to vector<1x128xf32>
      %350 = vector.extract_strided_slice %131 {offsets = [38, 0], sizes = [1, 128], strides = [1, 1]} : vector<46x128xf32> to vector<1x128xf32>
      %351 = vector.extract_strided_slice %131 {offsets = [39, 0], sizes = [1, 128], strides = [1, 1]} : vector<46x128xf32> to vector<1x128xf32>
      %352 = vector.extract_strided_slice %131 {offsets = [40, 0], sizes = [1, 128], strides = [1, 1]} : vector<46x128xf32> to vector<1x128xf32>
      %353 = vector.extract_strided_slice %131 {offsets = [41, 0], sizes = [1, 128], strides = [1, 1]} : vector<46x128xf32> to vector<1x128xf32>
      %354 = vector.extract_strided_slice %131 {offsets = [42, 0], sizes = [1, 128], strides = [1, 1]} : vector<46x128xf32> to vector<1x128xf32>
      %355 = vector.extract_strided_slice %131 {offsets = [43, 0], sizes = [1, 128], strides = [1, 1]} : vector<46x128xf32> to vector<1x128xf32>
      %356 = vector.extract_strided_slice %131 {offsets = [44, 0], sizes = [1, 128], strides = [1, 1]} : vector<46x128xf32> to vector<1x128xf32>
      %357 = vector.extract_strided_slice %131 {offsets = [45, 0], sizes = [1, 128], strides = [1, 1]} : vector<46x128xf32> to vector<1x128xf32>
      %358 = tpu.concatenate %327, %328, %329, %330, %331, %332, %333, %334, %335, %336, %337, %338, %339, %340, %341, %342 in 1 : vector<1x128xf32>, vector<1x128xf32>, vector<1x128xf32>, vector<1x128xf32>, vector<1x128xf32>, vector<1x128xf32>, vector<1x128xf32>, vector<1x128xf32>, vector<1x128xf32>, vector<1x128xf32>, vector<1x128xf32>, vector<1x128xf32>, vector<1x128xf32>, vector<1x128xf32>, vector<1x128xf32>, vector<1x128xf32> -> vector<1x2048xf32>
      %359 = tpu.concatenate %343, %344, %345, %346, %347, %348, %349, %350, %351, %352, %353, %354, %355, %356, %357, %132 in 1 : vector<1x128xf32>, vector<1x128xf32>, vector<1x128xf32>, vector<1x128xf32>, vector<1x128xf32>, vector<1x128xf32>, vector<1x128xf32>, vector<1x128xf32>, vector<1x128xf32>, vector<1x128xf32>, vector<1x128xf32>, vector<1x128xf32>, vector<1x128xf32>, vector<1x128xf32>, vector<1x128xf32>, vector<1x128xf32> -> vector<1x2048xf32>
      %360 = tpu.concatenate %358, %359 in 1 : vector<1x2048xf32>, vector<1x2048xf32> -> vector<1x4096xf32>
      %361 = arith.truncf %360 : vector<1x4096xf32> to vector<1x4096xbf16>
      %c2_86 = arith.constant 2 : index
      %c1_87 = arith.constant 1 : index
      %c0_88 = arith.constant 0 : index
      %362 = vector.load %arg12[%c2_86, %c1_87, %c0_88] : memref<3x2x4096xbf16, #tpu.memory_space<vmem>>, vector<1x1x4096xbf16>
      %363 = vector.shape_cast %362 : vector<1x1x4096xbf16> to vector<1x4096xbf16>
      %364 = vector.shape_cast %361 : vector<1x4096xbf16> to vector<1x1x4096xbf16>
      tpu.vector_store %arg12[%c2_86, %c1_87, %c0_88], %364 {strides = array<i32>} : memref<3x2x4096xbf16, #tpu.memory_space<vmem>>, vector<1x1x4096xbf16>,
    } else {
    }
    %c0 = arith.constant 0 : index
    %c0_1 = arith.constant 0 : index
    %3 = vector.load %arg13[%c0, %c0_1] : memref<2x128xf32, #tpu.memory_space<vmem>>, vector<2x128xf32>
    %4 = arith.index_cast %arg0 : i32 to index
    %c0_2 = arith.constant 0 : index
    %c0_3 = arith.constant 0 : index
    %5 = vector.load %arg12[%4, %c0_2, %c0_3] : memref<3x2x4096xbf16, #tpu.memory_space<vmem>>, vector<1x2x4096xbf16>
    %6 = vector.shape_cast %5 : vector<1x2x4096xbf16> to vector<2x4096xbf16>
    %c0_4 = arith.constant 0 : index
    %c0_5 = arith.constant 0 : index
    %7 = vector.load %arg7[%c0_4, %c0_5] : memref<4096x128xbf16, #tpu.memory_space<vmem>>, vector<4096x128xbf16>
    %cst = arith.constant dense<0.000000e+00> : vector<2x128xf32>
    %8 = tpu.matmul %6, %7, %cst {dimension_numbers = #tpu.dot_dimension_numbers<[1], [0], [0], [1], [0, 0, 1, 1], [], []>} : vector<2x4096xbf16>, vector<4096x128xbf16>, vector<2x128xf32> -> vector<2x128xf32>
    %9 = arith.addf %3, %8 : vector<2x128xf32>
    %c0_6 = arith.constant 0 : index
    %c0_7 = arith.constant 0 : index
    %10 = vector.load %arg13[%c0_6, %c0_7] : memref<2x128xf32, #tpu.memory_space<vmem>>, vector<2x128xf32>
    tpu.vector_store %arg13[%c0_6, %c0_7], %9 {strides = array<i32>} : memref<2x128xf32, #tpu.memory_space<vmem>>, vector<2x128xf32>,
    %c2_i32 = arith.constant 2 : i32
    %11 = arith.cmpi eq, %arg0, %c2_i32 : i32
    %12 = arith.extui %11 : i1 to i32
    %c0_i32_8 = arith.constant 0 : i32
    %13 = arith.cmpi ne, %12, %c0_i32_8 : i32
    scf.if %13 {
      %c0_9 = arith.constant 0 : index
      %c0_10 = arith.constant 0 : index
      %14 = vector.load %arg13[%c0_9, %c0_10] : memref<2x128xf32, #tpu.memory_space<vmem>>, vector<2x128xf32>
      %c0_11 = arith.constant 0 : index
      %c0_12 = arith.constant 0 : index
      %15 = vector.load %arg8[%c0_11, %c0_12] : memref<1x128xf32, #tpu.memory_space<vmem>>, vector<1x128xf32>
      %16 = vector.broadcast %15 : vector<1x128xf32> to vector<2x128xf32>
      %17 = arith.addf %14, %16 : vector<2x128xf32>
      %c0_13 = arith.constant 0 : index
      %c0_14 = arith.constant 0 : index
      %18 = vector.load %arg9[%c0_13, %c0_14] : memref<128x5xf32, #tpu.memory_space<vmem>>, vector<128x5xf32>
      %cst_15 = arith.constant dense<0.000000e+00> : vector<2x5xf32>
      %19 = tpu.matmul %17, %18, %cst_15 {dimension_numbers = #tpu.dot_dimension_numbers<[1], [0], [0], [1], [0, 0, 1, 1], [], []>} : vector<2x128xf32>, vector<128x5xf32>, vector<2x5xf32> -> vector<2x5xf32>
      %c0_16 = arith.constant 0 : index
      %c0_17 = arith.constant 0 : index
      %20 = vector.load %arg10[%c0_16, %c0_17] : memref<1x5xf32, #tpu.memory_space<vmem>>, vector<1x5xf32>
      %21 = vector.broadcast %20 : vector<1x5xf32> to vector<2x5xf32>
      %22 = arith.addf %19, %21 : vector<2x5xf32>
      %c0_18 = arith.constant 0 : index
      %c0_19 = arith.constant 0 : index
      %23 = vector.load %arg11[%c0_18, %c0_19] : memref<2x5xf32, #tpu.memory_space<vmem>>, vector<2x5xf32>
      tpu.vector_store %arg11[%c0_18, %c0_19], %22 {strides = array<i32>} : memref<2x5xf32, #tpu.memory_space<vmem>>, vector<2x5xf32>,
    } else {
    }
    return
  }
  func.func @transform_0(%arg0: i32) -> (i32, i32, i32) {
    %c0_i32 = arith.constant 0 : i32
    %c0_i32_0 = arith.constant 0 : i32
    %c0_i32_1 = arith.constant 0 : i32
    %c0_i32_2 = arith.constant 0 : i32
    return %c0_i32, %c0_i32_0, %c0_i32_1 : i32, i32, i32
  }
  func.func @transform_1(%arg0: i32) -> (i32, i32, i32) {
    %c0_i32 = arith.constant 0 : i32
    %c0_i32_0 = arith.constant 0 : i32
    %c0_i32_1 = arith.constant 0 : i32
    %c0_i32_2 = arith.constant 0 : i32
    return %c0_i32, %c0_i32_0, %c0_i32_1 : i32, i32, i32
  }
  func.func @transform_2(%arg0: i32) -> (i32, i32) {
    %c0_i32 = arith.constant 0 : i32
    %c0_i32_0 = arith.constant 0 : i32
    %c0_i32_1 = arith.constant 0 : i32
    return %c0_i32, %c0_i32_0 : i32, i32
  }
  func.func @transform_3(%arg0: i32) -> (i32, i32) {
    %c0_i32 = arith.constant 0 : i32
    %c0_i32_0 = arith.constant 0 : i32
    %c0_i32_1 = arith.constant 0 : i32
    return %c0_i32, %c0_i32_0 : i32, i32
  }
  func.func @transform_4(%arg0: i32) -> (i32, i32) {
    %c0_i32 = arith.constant 0 : i32
    %c0_i32_0 = arith.constant 0 : i32
    %c0_i32_1 = arith.constant 0 : i32
    return %c0_i32, %c0_i32_0 : i32, i32
  }
  func.func @transform_5(%arg0: i32) -> (i32, i32) {
    %c0_i32 = arith.constant 0 : i32
    %c0_i32_0 = arith.constant 0 : i32
    %c0_i32_1 = arith.constant 0 : i32
    return %c0_i32, %c0_i32_0 : i32, i32
  }
  func.func @transform_6(%arg0: i32) -> (i32, i32) {
    %c0_i32 = arith.constant 0 : i32
    %c0_i32_0 = arith.constant 0 : i32
    return %arg0, %c0_i32 : i32, i32
  }
  func.func @transform_7(%arg0: i32) -> (i32, i32) {
    %c0_i32 = arith.constant 0 : i32
    %c0_i32_0 = arith.constant 0 : i32
    %c0_i32_1 = arith.constant 0 : i32
    return %c0_i32, %c0_i32_0 : i32, i32
  }
  func.func @transform_8(%arg0: i32) -> (i32, i32) {
    %c0_i32 = arith.constant 0 : i32
    %c0_i32_0 = arith.constant 0 : i32
    %c0_i32_1 = arith.constant 0 : i32
    return %c0_i32, %c0_i32_0 : i32, i32
  }
  func.func @transform_9(%arg0: i32) -> (i32, i32) {
    %c0_i32 = arith.constant 0 : i32
    %c0_i32_0 = arith.constant 0 : i32
    %c0_i32_1 = arith.constant 0 : i32
    return %c0_i32, %c0_i32_0 : i32, i32
  }
  func.func @transform_10(%arg0: i32) -> (i32, i32) {
    %c0_i32 = arith.constant 0 : i32
    %c0_i32_0 = arith.constant 0 : i32
    %c0_i32_1 = arith.constant 0 : i32
    return %c0_i32, %c0_i32_0 : i32, i32
  }
}

</mosaic_0001>

<bundles_post_ra>
// kernel: cnn_forward.1
= control target key start
LH: loop header
LB: loop body
LE: loop exit
PB: predicated region body
PF: predicated region fallthrough
CT: control target
= control target key end

     0   :  { %s11727_s0 = inlined_call_operand.vmem [shape: f32[2,50,128], index: 0, kind: input, shape index: {}]   ;;  %s11728_s1 = inlined_call_operand.vmem [shape: f32[2,50,128], index: 1, kind: input, shape index: {}]   ;;  %s11729_s2 = inlined_call_operand.hbm [shape: bf16[384,128], index: 2, kind: input, shape index: {}]   ;;  %s11730_s3 = inlined_call_operand.hbm [shape: f32[1,128], index: 3, kind: input, shape index: {}]   ;;  %s11731_s4 = inlined_call_operand.hbm [shape: bf16[1024,128], index: 4, kind: input, shape index: {}]   ;;  %s11732_s5 = inlined_call_operand.hbm [shape: f32[1,128], index: 5, kind: input, shape index: {}]   ;;  %s11733_s6 = inlined_call_operand.hbm [shape: bf16[12288,128], index: 6, kind: input, shape index: {}]   ;;  %s11734_s7 = inlined_call_operand.hbm [shape: f32[1,128], index: 7, kind: input, shape index: {}]   ;;  %s11735_s8 = inlined_call_operand.vmem [shape: f32[128,5], index: 8, kind: input, shape index: {}]   ;;  %s11736_s9 = inlined_call_operand.hbm [shape: f32[1,5], index: 9, kind: input, shape index: {}]   ;;  %s11737_s10 = inlined_call_operand.hbm [shape: f32[2,5], index: 10, kind: output, shape index: {}]  }
   0x1   :  { %11865 = sst [smem:[#allocation87_spill]] %s11729_s2 }
   0x2   :  { %15 = vsyncpa [#allocation5], 0 }
   0x3   :  { %16 = vsyncpa [#allocation8], 0 }
   0x4   :  { %17 = vsyncpa [#allocation11], 0 }
   0x5   :  { %18 = vsyncpa [#allocation6], 0  ;;  %s8927_s13 = smov 0   ;;  %s8929_s14 = smov 0  }
   0x6   :  { %s8931_s15 = smov 0   ;;  %s8933_s16 = smov 0  }
   0x7 LB: > { %s297_s19 = sshll.u32 %s11730_s3, 4  ;;  %s8951_s20 = sadd.s32 4294967295, %s8860_s16   ;;  %s8860_s16 = sphi %s8933_s16, %s12252_s16   ;;  %s8856_s15 = sphi %s8931_s15, %s12251_s15   ;;  %s8852_s14 = sphi %s8929_s14, %s12250_s14   ;;  %s8848_s13 = sphi %s8927_s13, %s12249_s13   ;;  %s298_s19 = int_to_ptr.hbm [resolvable:$true] %s297_s19 }
   0x8   : > { %p6595_p0 = scmp.ge.s32.totalorder %s8860_s16, 1  ;;  %p171_p1 = scmp.eq.s32.totalorder %s8951_s20, 0 }
   0x9   : > { %p265_p2 = scmp.lt.s32.totalorder %s8860_s16, 4  ;;  %p6596_p3 = scmp.ne.s32.totalorder %s8951_s20, 0 }
   0xa   : > { %s8862_s22 = smov [#allocation7]   ;;  %s11867_s2 = sld [smem:[#allocation87_spill]] }
   0xb   : > { %p8957_p4 = pnand %p6595_p0, %p265_p2  ;;  %s299_s23 = sshll.u32 %s8862_s22, 4  ;;  %s300_s23 = int_to_ptr.vmem [resolvable:$true] %s299_s23 }
   0xc   : > { %s8863_s28 = smov [#allocation4]   ;;  %s11738_s30 = smov 64  }
   0xd   : > { %p8390_p5 = pneg %p8957_p4  ;;  %s284_s29 = sshll.u32 %s8863_s28, 4  ;;  %s285_s29 = int_to_ptr.vmem [resolvable:$true] %s284_s29 }
   0xe   : > { %s11739_s11 = smov 4   ;;  %s308_s18 = sshll.u32 %s11731_s4, 4  ;;  %s309_s18 = int_to_ptr.hbm [resolvable:$true] %s308_s18 }
   0xf   : > { %p8968_p6 = pnand %p8390_p5, %p171_p1  ;;  %s8866_s22 = smov [#allocation9]  }
  0x10   : > { %s282_s26 = sshll.u32 %s11867_s2, 4  ;;  %s310_s24 = sshll.u32 %s8866_s22, 4  ;;  %s283_s26 = int_to_ptr.hbm [resolvable:$true] %s282_s26  ;;  %s311_s24 = int_to_ptr.vmem [resolvable:$true] %s310_s24 }
  0x11   : > { %8396 = dma.hbm_to_vmem [thread:$0]  (!%p8968_p6), %s298_s19, 16, %s300_s23, [#allocation8]  }
  0x12   : > { %8393 = dma.hbm_to_vmem [thread:$0]  (!%p8968_p6), %s283_s26, 3072, %s285_s29, [#allocation5], %s11738_s30, %s11738_s30, %s11739_s11  }
  0x13   : > { %s323_s19 = sshll.u32 %s11732_s5, 4  ;;  %s8867_s23 = smov [#allocation10]   ;;  %s324_s19 = int_to_ptr.hbm [resolvable:$true] %s323_s19 }
  0x14   : > { %8399 = dma.hbm_to_vmem [thread:$0]  (!%p8968_p6), %s309_s18, 8192, %s311_s24, [#allocation8], %s11738_s30, %s11738_s30, %s11739_s11  }
  0x15   : > { %s325_s26 = sshll.u32 %s8867_s23, 4  ;;  %s335_s17 = sshll.u32 %s11734_s7, 4  ;;  %s326_s26 = int_to_ptr.vmem [resolvable:$true] %s325_s26  ;;  %s336_s17 = int_to_ptr.hbm [resolvable:$true] %s335_s17 }
  0x16   : > { %8402 = dma.hbm_to_vmem [thread:$0]  (!%p8968_p6), %s324_s19, 16, %s326_s26, [#allocation11]  }
  0x17   : > { %s350_s18 = sshll.u32 %s11736_s9, 4  ;;  %s8868_s24 = smov [#allocation13]   ;;  %s351_s18 = int_to_ptr.hbm [resolvable:$true] %s350_s18 }
  0x18   : > { %s337_s28 = sshll.u32 %s8868_s24, 4  ;;  %s8869_s23 = smov [#allocation14]   ;;  %s338_s28 = int_to_ptr.vmem [resolvable:$true] %s337_s28 }
  0x19   : > { %8405 = dma.hbm_to_vmem [thread:$0]  (!%p8968_p6), %s336_s17, 16, %s338_s28, [#allocation8]  }
  0x1a   : > { %s352_s19 = sshll.u32 %s8869_s23, 4  ;;  %s9003_s26 = sadd.s32 1, %s8860_s16   ;;  %s353_s19 = int_to_ptr.vmem [resolvable:$true] %s352_s19 }
  0x1b   : > { %8408 = dma.hbm_to_vmem [thread:$0]  (!%p8968_p6), %s351_s18, 16, %s353_s19, [#allocation11]  }
  0x1c   : > { %s157_s29 = sadd.s32 1, %s8856_s15  ;;  %s154_s12 = ssub.s32 %s8860_s16, %s9003_s26 }
  0x1d   : > { %p164_p7 = scmp.ne.s32.totalorder %s8856_s15, %s8852_s14  ;;  %p155_p8 = scmp.eq.s32.totalorder %s154_s12, 0 }
  0x1e   : > { %p165_p9 = scmp.eq.s32.totalorder %s8860_s16, 0  ;;  %p170_p10 = scmp.ne.s32.totalorder %s8852_s14, %s8848_s13 }
  0x1f   : > { %p8419_p11 = scmp.lt.s32.totalorder %s8860_s16, 3  ;;  %s363_s27 = sand.u32 1, %s8860_s16  }
  0x20   : > { %s9015_s17 = scalar_select %p155_p8, %s8856_s15, %s157_s29  }
  0x21   : > { %p166_p12 = por %p165_p9, %p164_p7  ;;  %p9019_p13 = por %p171_p1, %p170_p10 }
  0x22   : > { %s365_s25 = sand.u32 1, %s8856_s15   ;;  %s8015_s24 = sshll.u32 %s8860_s16, 11 }
  0x23   : > { %s6603_s18 = sshll.u32 %s365_s25, 11  ;;  %s372_s19 = scalar_lea.hbm %s11733_s6, %s8015_s24 }
  0x24   : > { %s367_s12 = scalar_lea.vmem [#allocation12], %s6603_s18  ;;  %s373_s13 = sshll.u32 %s372_s19, 4  ;;  %s374_s13 = int_to_ptr.hbm [resolvable:$true] %s373_s13 }
  0x25   : > { %s375_s30 = sshll.u32 %s367_s12, 4  ;;  %p9031_p0 = pnand %p8419_p11, %p166_p12  ;;  %s376_s30 = int_to_ptr.vmem [resolvable:$true] %s375_s30 }
  0x26   : > { %s364_s11 = scalar_lea.sflag [#allocation5], %s363_s27  ;;  %s8744_s2 = sshra.s32 %s374_s13, 4  ;;  %s8745_s2 = int_to_ptr.hbm [resolvable:$true] %s8744_s2 }
  0x27   : > { %s8746_s25 = scalar_lea.hbm %s8745_s2, 2048  ;;  %p8748_p5 = pneg %p9031_p0 }
  0x28   : > { %p8747_p2 = scmp.ne.s32.totalorder %s8745_s2, %s8746_s25  ;;  %s8751_s28 = scalar_lea.hbm %s11733_s6, 6144 }
  0x29   : > { %p8752_p8 = scmp.lt.s32.totalorder %s8745_s2, %s11733_s6  ;;  %p8753_p9 = scmp.lt.s32.totalorder %s8751_s28, %s8746_s25 }
  0x2a   : > { %p8749_p6 = pnand %p8748_p5, %p8747_p2 }
  0x2b   : > { %p8754_p10 = por %p8753_p9, %p8752_p8 }
  0x2c   : > { %p8750_p7 = pneg %p8749_p6 }
  0x2e   : > { %p8755_p11 = pnand %p8754_p10, %p8750_p7 }
  0x30   : > { %8758 = shalt.err (!%p8755_p11)
}
  0x31   : > { %s11871_s27 = smov 4   ;;  %s11872_s19 = smov 64  }
  0x32   : > { %8412 = dma.hbm_to_vmem [thread:$0]  (!%p9031_p0), %s374_s13, 32768, %s376_s30, %s364_s11, %s11872_s19, %s11872_s19, %s11871_s27  }
  0x33   : > { %387 = sbr.rel (%p8957_p4) target bundleno = 1411 (0x583), region = 60 }
  0x38   : > { %8819 = dma.done.wait (%p171_p1), [#allocation5], 3072  }
  0x39   : > { %8821 = vsyncadd (%p171_p1), [#allocation5], 4294964224 }
  0x3a   : > { %8823 = dma.done.wait (%p171_p1), [#allocation8], 8208  }
  0x3b   : > { %8825 = vsyncadd (%p171_p1), [#allocation8], 4294959088 }
  0x3c   : > { %8827 = dma.done.wait (%p171_p1), [#allocation11], 16  }
  0x3d   : > { %8829 = vsyncadd (%p171_p1), [#allocation11], 4294967280  ;;  %s409_s2 = sand.u32 1, %s8951_s20   ;;  %s411_s21 = sand.u32 1, %s8852_s14  }
  0x3e   : > { %s6611_s30 = sshll.u32 %s411_s21, 11  ;;  %s410_s11 = scalar_lea.sflag [#allocation5], %s409_s2 }
  0x3f   : > { %s9064_s12 = scalar_lea.vmem [#allocation12], %s6611_s30 }
  0x40   : > { %8831 = dma.done.wait (%p9019_p13), %s410_s11, 32768  }
  0x41   : > { %8833 = vsyncadd (%p9019_p13), %s410_s11, 4294934528 }
  0x42   : > { %8835 = dma.done.wait (%p171_p1), [#allocation8], 16  }
  0x43   : > { %8837 = vsyncadd (%p171_p1), [#allocation8], 4294967280 }
  0x44   : > { %8839 = dma.done.wait (%p171_p1), [#allocation11], 16  }
  0x45   : > { %8841 = vsyncadd (%p171_p1), [#allocation11], 4294967280  ;;  %460 = sbr.rel (%p6596_p3) target bundleno = 846 (0x34e), region = 92 }
  0x4a   : > { %v9080_v0 = vld [vmem:[#allocation4 + $0x38] sm:$0xff]  ;;  %v8870_v3 = vmov 0.0   ;;  %v9088_v4 = vld [vmem:[#allocation4 + $0x30] sm:$0xff]  ;;  %v9098_v7 = vld [vmem:[#allocation4 + $0x28] sm:$0xff]  ;;  %vm483_vm0 = vcmask 1046528   ;;  %vm11809_vm1 = vcmask 1045504  }
  0x4b   : > { %v9082_v1 = vld [vmem:[#allocation4 + $0x78] sm:$0xff]  ;;  %461 = vst [vmem:[#allocation3] sm:$0x3] %v8870_v3  ;;  %708 = vmatpush.bf16.msra.mxu0 %v9080_v0  ;;  %v9090_v5 = vld [vmem:[#allocation4 + $0x70] sm:$0xff]  ;;  %823 = vmatpush.bf16.msra.mxu3 %v9080_v0  ;;  %v9100_v8 = vld [vmem:[#allocation4 + $0x68] sm:$0xff]  ;;  %vm11812_vm2 = vcmask 1040384  }
  0x4c   : > { %v9084_v2 = vld [vmem:[#allocation4 + $0xb8] sm:$0xff]  ;;  %736 = vmatpush.bf16.msra.mxu1 %v9082_v1  ;;  %v9094_v6 = vld [vmem:[#allocation4 + $0xb0] sm:$0xff]  ;;  %v9104_v9 = vld [vmem:[#allocation4 + $0xa8] sm:$0xff]  ;;  %vm2874_vm3 = vcmask 1042434   ;;  %vm2880_vm4 = vcmask 1044484   ;;  %vm2878_vm5 = vcmask 1041408  }
  0x4d   : > { %764 = vmatpush.bf16.msra.mxu2 %v9084_v2  ;;  %v9108_v10 = vld [vmem:[#allocation4 + $0x20] sm:$0xff]  ;;  %v9118_v13 = vld [vmem:[#allocation4 + $0x18] sm:$0xff]  ;;  %v9128_v16 = vld [vmem:[#allocation4 + $0x10] sm:$0xff]  ;;  %vm2941_vm6 = vsmask.f32 256  ;;  %vm11810_vm7 = vcmask 1041409  }
  0x4e   : > { %v9110_v11 = vld [vmem:[#allocation4 + $0x60] sm:$0xff]  ;;  %v9120_v14 = vld [vmem:[#allocation4 + $0x58] sm:$0xff]  ;;  %v9130_v17 = vld [vmem:[#allocation4 + $0x50] sm:$0xff]  ;;  %vm2944_vm8 = vsmask.f32 1280  ;;  %vm11811_vm9 = vcmask 1046534  }
  0x4f   : > { %709 = vmatpush.bf16.msra.mxu0 %v9088_v4  ;;  %824 = vmatpush.bf16.msra.mxu3 %v9088_v4  ;;  %v9114_v12 = vld [vmem:[#allocation4 + $0xa0] sm:$0xff]  ;;  %v9124_v15 = vld [vmem:[#allocation4 + $0x98] sm:$0xff]  ;;  %v9134_v18 = vld [vmem:[#allocation4 + $0x90] sm:$0xff]  ;;  %vm2888_vm10 = vcmask 1045508   ;;  %vm2948_vm11 = vsmask.f32 2304 }
  0x50   : > { %737 = vmatpush.bf16.msra.mxu1 %v9090_v5  ;;  %v9139_v19 = vld [vmem:[%s11727_s0] sm:$0xff]  ;;  %v9144_v20 = vld [vmem:[%s11727_s0 + $0x8] sm:$0xff]  ;;  %v9149_v21 = vld [vmem:[%s11727_s0 + $0x10] sm:$0xff]  ;;  %vm11815_vm12 = vcmask 1043456   ;;  %vm11813_vm13 = vcmask 1043459  }
  0x51   : > { %765 = vmatpush.bf16.msra.mxu2 %v9094_v6  ;;  %v9153_v22 = vld [vmem:[#allocation4 + $0x8] sm:$0xff]  ;;  %v484_v25 = vrot.slane %v9139_v19, 1  ;;  %v485_v26 = vrot.slane %v9144_v20, 1  ;;  %v487_v27 = vrot.slane %v9149_v21, 1  ;;  %v9164_v28 = vld [vmem:[#allocation4] sm:$0xff]  ;;  %v9173_v30 = vld [vmem:[%s11728_s1] sm:$0xff]  ;;  %v9198_v37 = vpack.c.bf16 %v9144_v20, %v9139_v19 }
  0x52   : > { %v9155_v23 = vld [vmem:[#allocation4 + $0x48] sm:$0xff]  ;;  %v9166_v29 = vld [vmem:[#allocation4 + $0x40] sm:$0xff]  ;;  %v9194_v36 = vld [vmem:[%s11727_s0 + $0x20] sm:$0xff]  ;;  %vm2952_vm14 = vsmask.f32 3328 }
  0x53   : > { %710 = vmatpush.bf16.msra.mxu0 %v9098_v7  ;;  %825 = vmatpush.bf16.msra.mxu3 %v9098_v7  ;;  %v9159_v24 = vld [vmem:[#allocation4 + $0x88] sm:$0xff]  ;;  %v9178_v31 = vld [vmem:[%s11728_s1 + $0x8] sm:$0xff]  ;;  %v486_v34 = vsel %vm483_vm0, %v484_v25, %v485_v26  ;;  %v488_v35 = vsel %vm483_vm0, %v485_v26, %v487_v27  ;;  %v491_v41 = vrot.slane %v9194_v36, 1  ;;  %v468_v53 = vld [vmem:[%s11727_s0 + $0x30] sm:$0x3] }
  0x54   : > { %738 = vmatpush.bf16.msra.mxu1 %v9100_v8  ;;  %v9183_v32 = vld [vmem:[%s11727_s0 + $0x28] sm:$0xff]  ;;  %v9202_v38 = vpack.c.bf16 %v9178_v31, %v9173_v30  ;;  %v9207_v40 = vpack.c.bf16 %v488_v35, %v486_v34  ;;  %v465_v44 = vld [vmem:[%s11727_s0 + $0x18] sm:$0xff]  ;;  %v9235_v46 = vld [vmem:[%s11728_s1 + $0x10] sm:$0xff]  ;;  %v495_v54 = vrot.slane %v468_v53, 1  ;;  %v513_v62 = vpack.c.bf16 %v468_v53, %v468_v53 }
  0x55   : > { %766 = vmatpush.bf16.msra.mxu2 %v9104_v9  ;;  %v9187_v33 = vld [vmem:[#allocation4 + $0x80] sm:$0xff]  ;;  %v493_v39 = vrot.slane %v9183_v32, 1  ;;  %v489_v45 = vrot.slane %v465_v44, 1  ;;  %v9240_v47 = vld [vmem:[%s11728_s1 + $0x18] sm:$0xff]  ;;  %v9249_v50 = vpack.c.bf16 %v465_v44, %v9149_v21  ;;  %v9279_v55 = vld [vmem:[%s11728_s1 + $0x20] sm:$0xff]  ;;  %v9293_v58 = vpack.c.bf16 %v9183_v32, %v9194_v36 }
  0x56   : > { %11873 = vst [vmem:[#allocation23_spill] sm:$0xff] %v9202_v38  ;;  %v9253_v51 = vpack.c.bf16 %v9240_v47, %v9235_v46  ;;  %v9284_v56 = vld [vmem:[%s11728_s1 + $0x28] sm:$0xff]  ;;  %v475_v61 = vld [vmem:[%s11728_s1 + $0x30] sm:$0x3]  ;;  %v802_v3 = vrot.slane %v9235_v46, 1  ;;  %v9430_v34 = vld [vmem:[%s11727_s0 + $0x58] sm:$0xff] }
  0x57   : > { %711 = vmatpush.bf16.msra.mxu0 %v9108_v10  ;;  %826 = vmatpush.bf16.msra.mxu3 %v9108_v10  ;;  %11874 = vst [vmem:[#allocation24_spill] sm:$0xff] %v9207_v40  ;;  %v494_v42 = vsel %vm483_vm0, %v491_v41, %v493_v39  ;;  %v490_v48 = vsel %vm483_vm0, %v487_v27, %v489_v45  ;;  %v9405_v25 = vld [vmem:[%s11728_s1 + $0x48] sm:$0xff]  ;;  %v9410_v26 = vld [vmem:[%s11728_s1 + $0x50] sm:$0xff]  ;;  %v810_v32 = vrot.slane %v475_v61, 1  ;;  %v6716_v35 = vld [vmem:[%s11727_s0 + $0x60] sm:$0xff] }
  0x58   : > { %739 = vmatpush.bf16.msra.mxu1 %v9110_v11  ;;  %v9219_v43 = vpack.c.bf16 %v493_v39, %v494_v42  ;;  %v492_v49 = vsel %vm483_vm0, %v489_v45, %v491_v41  ;;  %11875 = vst [vmem:[#allocation25_spill] sm:$0xff] %v9253_v51  ;;  %v496_v57 = vsel %vm483_vm0, %v493_v39, %v495_v54  ;;  %v9438_v36 = vld [vmem:[%s11728_s1 + $0x58] sm:$0xff]  ;;  %v6723_v39 = vld [vmem:[%s11728_s1 + $0x60] sm:$0xff]  ;;  %vm9871_vm15 = vmand %vm11812_vm2, %vm2941_vm6 }
  0x59   : > { %767 = vmatpush.bf16.msra.mxu2 %v9114_v12  ;;  %v9255_v52 = vpack.c.bf16 %v492_v49, %v490_v48  ;;  %v9297_v59 = vpack.c.bf16 %v9284_v56, %v9279_v55  ;;  %v9301_v60 = vpack.c.bf16 %v496_v57, %v494_v42  ;;  %v514_v63 = vpack.c.bf16 %v475_v61, %v475_v61  ;;  %v9452_v45 = vld [vmem:[#allocation9 + $0xb8] sm:$0xff]  ;;  %v9463_v53 = vld [vmem:[#allocation9 + $0xb0] sm:$0xff] }
  0x5a   : > { %v9444_v42 = vpack.c.bf16 %v6716_v35, %v9430_v34  ;;  %v9447_v44 = vpack.c.bf16 %v6723_v39, %v9438_v36  ;;  %v9456_v48 = vld [vmem:[#allocation9 + $0xf8] sm:$0xff] }
  0x5b   : > { %712 = vmatpush.bf16.msra.mxu0 %v9118_v13  ;;  %827 = vmatpush.bf16.msra.mxu3 %v9118_v13  ;;  %11876 = vst [vmem:[#allocation26_spill] sm:$0xff] %v9255_v52  ;;  %v9461_v49 = vld [vmem:[#allocation9 + $0x78] sm:$0xff] }
  0x5c   : > { %740 = vmatpush.bf16.msra.mxu1 %v9120_v14  ;;  %11883 = vst [vmem:[#allocation33_spill] sm:$0xff] %v9444_v42  ;;  %v9481_v57 = vld [vmem:[%s11728_s1 + $0x68] sm:$0x3] }
  0x5d   : > { %768 = vmatpush.bf16.msra.mxu2 %v9124_v15  ;;  %11884 = vst [vmem:[#allocation34_spill] sm:$0xff] %v9447_v44 }
  0x5f   : > { %713 = vmatpush.bf16.msra.mxu0 %v9128_v16  ;;  %828 = vmatpush.bf16.msra.mxu3 %v9128_v16 }
  0x60   : > { %741 = vmatpush.bf16.msra.mxu1 %v9130_v17 }
  0x61   : > { %769 = vmatpush.bf16.msra.mxu2 %v9134_v18 }
  0x63   : > { %714 = vmatpush.bf16.msra.mxu0 %v9153_v22  ;;  %829 = vmatpush.bf16.msra.mxu3 %v9153_v22 }
  0x64   : > { %742 = vmatpush.bf16.msra.mxu1 %v9155_v23 }
  0x65   : > { %770 = vmatpush.bf16.msra.mxu2 %v9159_v24 }
  0x67   : > { %715 = vmatpush.bf16.msra.mxu0 %v9164_v28  ;;  %830 = vmatpush.bf16.msra.mxu3 %v9164_v28 }
  0x68   : > { %743 = vmatpush.bf16.msra.mxu1 %v9166_v29 }
  0x69   : > { %771 = vmatpush.bf16.msra.mxu2 %v9187_v33 }
  0x6a   : > { %716 = vmatmul.bf16.vlgmr.msra.gmra.mxu0 %v9198_v37  ;;  %831 = vmatmul.bf16.vlgmr.msra.gmra.mxu3 %v9202_v38 }
  0x6b   : > { %851 = vmatpush.bf16.msrb.mxu0 %v9082_v1  ;;  %744 = vmatmul.bf16.vlgmr.msra.gmra.mxu1 %v9202_v38 }
  0x6c   : > { %772 = vmatmul.bf16.vlgmr.msra.gmra.mxu2 %v9207_v40  ;;  %1015 = vmatpush.bf16.msrb.mxu3 %v9082_v1 }
  0x6d   : > { %987 = vmatpush.bf16.msrb.mxu2 %v9080_v0  ;;  %879 = vmatpush.bf16.msrb.mxu1 %v9084_v2 }
  0x6f   : > { %852 = vmatpush.bf16.msrb.mxu0 %v9090_v5 }
  0x70   : > { %1016 = vmatpush.bf16.msrb.mxu3 %v9090_v5 }
  0x71   : > { %988 = vmatpush.bf16.msrb.mxu2 %v9088_v4  ;;  %880 = vmatpush.bf16.msrb.mxu1 %v9094_v6 }
  0x73   : > { %853 = vmatpush.bf16.msrb.mxu0 %v9100_v8 }
  0x74   : > { %1017 = vmatpush.bf16.msrb.mxu3 %v9100_v8 }
  0x75   : > { %989 = vmatpush.bf16.msrb.mxu2 %v9098_v7  ;;  %881 = vmatpush.bf16.msrb.mxu1 %v9104_v9 }
  0x77   : > { %854 = vmatpush.bf16.msrb.mxu0 %v9110_v11 }
  0x78   : > { %1018 = vmatpush.bf16.msrb.mxu3 %v9110_v11 }
  0x79   : > { %990 = vmatpush.bf16.msrb.mxu2 %v9108_v10  ;;  %882 = vmatpush.bf16.msrb.mxu1 %v9114_v12 }
  0x7a   : > { %721 = vmatmul.bf16.gmra.mxu0 %v9249_v50  ;;  %836 = vmatmul.bf16.gmra.mxu3 %v9253_v51 }
  0x7b   : > { %855 = vmatpush.bf16.msrb.mxu0 %v9120_v14  ;;  %749 = vmatmul.bf16.gmra.mxu1 %v9253_v51 }
  0x7c   : > { %777 = vmatmul.bf16.gmra.mxu2 %v9255_v52  ;;  %1019 = vmatpush.bf16.msrb.mxu3 %v9120_v14 }
  0x7d   : > { %991 = vmatpush.bf16.msrb.mxu2 %v9118_v13  ;;  %883 = vmatpush.bf16.msrb.mxu1 %v9124_v15 }
  0x7f   : > { %856 = vmatpush.bf16.msrb.mxu0 %v9130_v17 }
  0x80   : > { %1020 = vmatpush.bf16.msrb.mxu3 %v9130_v17 }
  0x81   : > { %992 = vmatpush.bf16.msrb.mxu2 %v9128_v16  ;;  %884 = vmatpush.bf16.msrb.mxu1 %v9134_v18 }
  0x83   : > { %857 = vmatpush.bf16.msrb.mxu0 %v9155_v23 }
  0x84   : > { %1021 = vmatpush.bf16.msrb.mxu3 %v9155_v23 }
  0x85   : > { %993 = vmatpush.bf16.msrb.mxu2 %v9153_v22  ;;  %885 = vmatpush.bf16.msrb.mxu1 %v9159_v24 }
  0x87   : > { %858 = vmatpush.bf16.msrb.mxu0 %v9166_v29 }
  0x88   : > { %1022 = vmatpush.bf16.msrb.mxu3 %v9166_v29 }
  0x89   : > { %994 = vmatpush.bf16.msrb.mxu2 %v9164_v28  ;;  %886 = vmatpush.bf16.msrb.mxu1 %v9187_v33 }
  0x8a   : > { %726 = vmatmul.bf16.gmra.mxu0 %v9293_v58  ;;  %841 = vmatmul.bf16.gmra.mxu3 %v9297_v59 }
  0x8b   : > { %1043 = vmatpush.bf16.msra.mxu0 %v9084_v2  ;;  %754 = vmatmul.bf16.gmra.mxu1 %v9297_v59 }
  0x8c   : > { %1158 = vmatpush.bf16.msra.mxu3 %v9084_v2  ;;  %782 = vmatmul.bf16.gmra.mxu2 %v9301_v60  ;;  %v800_v2 = vrot.slane %v9178_v31, 1 }
  0x8d   : > { %1130 = vmatpush.bf16.msra.mxu2 %v9082_v1  ;;  %1102 = vmatpush.bf16.msra.mxu1 %v9080_v0  ;;  %v9326_v0 = vpack.c.bf16 %v495_v54, %v495_v54  ;;  %v799_v1 = vrot.slane %v9173_v30, 1  ;;  %v9465_v54 = vld [vmem:[#allocation9 + $0x30] sm:$0xff] }
  0x8f   : > { %1044 = vmatpush.bf16.msra.mxu0 %v9094_v6 }
  0x90   : > { %1159 = vmatpush.bf16.msra.mxu3 %v9094_v6  ;;  %v9349_v6 = vld [vmem:[%s11727_s0 + $0x38] sm:$0xff] }
  0x91   : > { %1131 = vmatpush.bf16.msra.mxu2 %v9090_v5  ;;  %1103 = vmatpush.bf16.msra.mxu1 %v9088_v4  ;;  %v801_v4 = vsel %vm483_vm0, %v799_v1, %v800_v2  ;;  %v803_v5 = vsel %vm483_vm0, %v800_v2, %v802_v3  ;;  %v9494_v1 = vld [vmem:[#allocation9 + $0xa8] sm:$0xff] }
  0x92   : > { %v9496_v2 = vld [vmem:[#allocation9 + $0x28] sm:$0xff] }
  0x93   : > { %1045 = vmatpush.bf16.msra.mxu0 %v9104_v9 }
  0x94   : > { %1160 = vmatpush.bf16.msra.mxu3 %v9104_v9  ;;  %v9364_v9 = vld [vmem:[%s11728_s1 + $0x40] sm:$0xff] }
  0x95   : > { %1132 = vmatpush.bf16.msra.mxu2 %v9100_v8  ;;  %1104 = vmatpush.bf16.msra.mxu1 %v9098_v7  ;;  %v9354_v7 = vld [vmem:[%s11727_s0 + $0x40] sm:$0xff]  ;;  %v9359_v8 = vld [vmem:[%s11728_s1 + $0x38] sm:$0xff] }
  0x97   : > { %1046 = vmatpush.bf16.msra.mxu0 %v9114_v12 }
  0x98   : > { %1161 = vmatpush.bf16.msra.mxu3 %v9114_v12  ;;  %v9375_v12 = vpack.c.bf16 %v9354_v7, %v9349_v6 }
  0x99   : > { %1133 = vmatpush.bf16.msra.mxu2 %v9110_v11  ;;  %1105 = vmatpush.bf16.msra.mxu1 %v9108_v10  ;;  %v9370_v10 = vpack.c.bf16 %v803_v5, %v801_v4  ;;  %v808_v11 = vrot.slane %v9284_v56, 1  ;;  %v9476_v56 = vld [vmem:[%s11727_s0 + $0x68] sm:$0x3]  ;;  %v955_v4 = vrot.slane %v9349_v6, 1 }
  0x9a   : > { %731 = vmatmul.bf16.gmra.mxu0 %v513_v62  ;;  %846 = vmatmul.bf16.gmra.mxu3 %v514_v63  ;;  %11878 = vst [vmem:[#allocation28_spill] sm:$0xff] %v9375_v12  ;;  %v984_v61 = vpack.c.bf16 %v9476_v56, %v9476_v56  ;;  %v9487_v62 = vpack.c.bf16 %v9481_v57, %v9481_v57 }
  0x9b   : > { %1047 = vmatpush.bf16.msra.mxu0 %v9124_v15  ;;  %759 = vmatmul.bf16.gmra.mxu1 %v514_v63  ;;  %11877 = vst [vmem:[#allocation27_spill] sm:$0xff] %v9370_v10  ;;  %v9489_v63 = vld [vmem:[#allocation9 + $0x70] sm:$0xff] }
  0x9c   : > { %1162 = vmatpush.bf16.msra.mxu3 %v9124_v15  ;;  %787 = vmatmul.bf16.gmra.mxu2 %v9326_v0 }
  0x9d   : > { %1134 = vmatpush.bf16.msra.mxu2 %v9120_v14  ;;  %1106 = vmatpush.bf16.msra.mxu1 %v9118_v13  ;;  %v9379_v13 = vpack.c.bf16 %v9364_v9, %v9359_v8  ;;  %v806_v14 = vrot.slane %v9279_v55, 1  ;;  %v9467_v55 = vld [vmem:[#allocation9 + $0xf0] sm:$0xff] }
  0x9f   : > { %1048 = vmatpush.bf16.msra.mxu0 %v9134_v18  ;;  %11879 = vst [vmem:[#allocation29_spill] sm:$0xff] %v9379_v13  ;;  %v809_v15 = vsel %vm483_vm0, %v806_v14, %v808_v11 }
  0xa0   : > { %1163 = vmatpush.bf16.msra.mxu3 %v9134_v18 }
  0xa1   : > { %1135 = vmatpush.bf16.msra.mxu2 %v9130_v17  ;;  %1107 = vmatpush.bf16.msra.mxu1 %v9128_v16  ;;  %v9385_v16 = vpack.c.bf16 %v808_v11, %v809_v15  ;;  %v804_v17 = vrot.slane %v9240_v47, 1  ;;  %v9454_v47 = vld [vmem:[#allocation9 + $0x38] sm:$0xff] }
  0xa3   : > { %1049 = vmatpush.bf16.msra.mxu0 %v9159_v24  ;;  %v805_v18 = vsel %vm483_vm0, %v802_v3, %v804_v17  ;;  %v9498_v3 = vld [vmem:[#allocation9 + $0xe8] sm:$0xff] }
  0xa4   : > { %1164 = vmatpush.bf16.msra.mxu3 %v9159_v24  ;;  %v9400_v24 = vld [vmem:[%s11727_s0 + $0x50] sm:$0xff] }
  0xa5   : > { %1136 = vmatpush.bf16.msra.mxu2 %v9155_v23  ;;  %1108 = vmatpush.bf16.msra.mxu1 %v9153_v22  ;;  %v807_v22 = vsel %vm483_vm0, %v804_v17, %v806_v14  ;;  %v9395_v23 = vld [vmem:[%s11727_s0 + $0x48] sm:$0xff]  ;;  %v1078_v14 = vrot.slane %v9359_v8, 1  ;;  %v1081_v17 = vrot.slane %v9405_v25, 1 }
  0xa6   : > { %v9412_v27 = vpack.c.bf16 %v807_v22, %v805_v18  ;;  %v958_v5 = vrot.slane %v9395_v23, 1  ;;  %v9511_v18 = vld [vmem:[#allocation9 + $0xa0] sm:$0xff] }
  0xa7   : > { %1050 = vmatpush.bf16.msra.mxu0 %v9187_v33  ;;  %v9513_v22 = vld [vmem:[#allocation9 + $0x20] sm:$0xff] }
  0xa8   : > { %1165 = vmatpush.bf16.msra.mxu3 %v9187_v33  ;;  %11880 = vst [vmem:[#allocation30_spill] sm:$0xff] %v9412_v27  ;;  %v811_v33 = vsel %vm483_vm0, %v808_v11, %v810_v32  ;;  %v9506_v11 = vld [vmem:[#allocation9 + $0x68] sm:$0xff] }
  0xa9   : > { %1137 = vmatpush.bf16.msra.mxu2 %v9166_v29  ;;  %1109 = vmatpush.bf16.msra.mxu1 %v9164_v28  ;;  %v9416_v28 = vpack.c.bf16 %v9400_v24, %v9395_v23  ;;  %v9420_v29 = vpack.c.bf16 %v9410_v26, %v9405_v25  ;;  %v821_v41 = vpack.c.bf16 %v811_v33, %v809_v15  ;;  %v1079_v15 = vrot.slane %v9364_v9, 1 }
  0xaa   : > { %859 = vmatmul.bf16.vlgmr.msrb.gmra.mxu0 %v9207_v40  ;;  %1023 = vmatmul.bf16.vlgmr.msrb.gmra.mxu3 %v9379_v13  ;;  %v9527_v25 = vrot.slane %v6716_v35, 1  ;;  %v9529_v33 = vrot.slane %v6723_v39, 1  ;;  %v9558_v39 = vld [vmem:[#allocation9 + $0x98] sm:$0xff] }
  0xab   : > { %887 = vmatmul.bf16.vlgmr.msrb.gmra.mxu1 %v9370_v10  ;;  %11881 = vst [vmem:[#allocation31_spill] sm:$0xff] %v9416_v28  ;;  %1809 = vmatpush.bf16.msrb.mxu0 %v9454_v47  ;;  %v1080_v8 = vsel %vm483_vm0, %v1078_v14, %v1079_v15  ;;  %v1082_v9 = vsel %vm483_vm0, %v1079_v15, %v1081_v17  ;;  %v9560_v15 = vld [vmem:[#allocation9 + $0x18] sm:$0xff] }
  0xac   : > { %995 = vmatmul.bf16.vlgmr.msrb.gmra.mxu2 %v9375_v12  ;;  %11882 = vst [vmem:[#allocation32_spill] sm:$0xff] %v9420_v29  ;;  %1881 = vmatpush.bf16.msrb.mxu3 %v9456_v48  ;;  %v9577_v12 = vld [vmem:[#allocation9 + $0x10] sm:$0xff] }
  0xad   : > { %1857 = vmatpush.bf16.msrb.mxu2 %v9452_v45  ;;  %1833 = vmatpush.bf16.msrb.mxu1 %v9461_v49  ;;  %11889 = vst [vmem:[#allocation39_spill] sm:$0xff] %v9558_v39 }
  0xae   : > { %11890 = vst [vmem:[#allocation40_spill] sm:$0xff] %v9560_v15 }
  0xaf   : > { %1810 = vmatpush.bf16.msrb.mxu0 %v9465_v54  ;;  %11894 = vst [vmem:[#allocation44_spill] sm:$0xff] %v9577_v12 }
  0xb0   : > { %1882 = vmatpush.bf16.msrb.mxu3 %v9467_v55 }
  0xb1   : > { %1858 = vmatpush.bf16.msrb.mxu2 %v9463_v53  ;;  %1834 = vmatpush.bf16.msrb.mxu1 %v9489_v63 }
  0xb3   : > { %1811 = vmatpush.bf16.msrb.mxu0 %v9496_v2 }
  0xb4   : > { %1883 = vmatpush.bf16.msrb.mxu3 %v9498_v3 }
  0xb5   : > { %1859 = vmatpush.bf16.msrb.mxu2 %v9494_v1  ;;  %1835 = vmatpush.bf16.msrb.mxu1 %v9506_v11 }
  0xb7   : > { %1812 = vmatpush.bf16.msrb.mxu0 %v9513_v22 }
  0xb9   : > { %1860 = vmatpush.bf16.msrb.mxu2 %v9511_v18 }
  0xba   : > { %864 = vmatmul.bf16.gmra.mxu0 %v9255_v52  ;;  %1028 = vmatmul.bf16.gmra.mxu3 %v9420_v29 }
  0xbb   : > { %892 = vmatmul.bf16.gmra.mxu1 %v9412_v27  ;;  %1813 = vmatpush.bf16.msrb.mxu0 %v9560_v15  ;;  %v9579_v15 = vld [vmem:[#allocation9 + $0xd0] sm:$0xff] }
  0xbc   : > { %1000 = vmatmul.bf16.gmra.mxu2 %v9416_v28  ;;  %v1085_v28 = vrot.slane %v9438_v36, 1 }
  0xbd   : > { %1861 = vmatpush.bf16.msrb.mxu2 %v9558_v39 }
  0xbf   : > { %1814 = vmatpush.bf16.msrb.mxu0 %v9577_v12 }
  0xca   : > { %869 = vmatmul.bf16.gmra.mxu0 %v9301_v60  ;;  %1033 = vmatmul.bf16.gmra.mxu3 %v9447_v44  ;;  %v822_v60 = vpack.c.bf16 %v810_v32, %v810_v32  ;;  %v9515_v32 = vld [vmem:[#allocation9 + $0xe0] sm:$0xff] }
  0xcb   : > { %897 = vmatmul.bf16.gmra.mxu1 %v821_v41  ;;  %1884 = vmatpush.bf16.msrb.mxu3 %v9515_v32 }
  0xcc   : > { %1005 = vmatmul.bf16.gmra.mxu2 %v9444_v42  ;;  %v9534_v42 = vld [vmem:[#allocation9 + $0x60] sm:$0xff] }
  0xcd   : > { %1836 = vmatpush.bf16.msrb.mxu1 %v9534_v42 }
  0xda   : > { %874 = vmatmul.bf16.gmra.mxu0 %v9326_v0  ;;  %1038 = vmatmul.bf16.gmra.mxu3 %v9487_v62  ;;  %v956_v0 = vrot.slane %v9354_v7, 1 }
  0xdb   : > { %902 = vmatmul.bf16.gmra.mxu1 %v822_v60 }
  0xdc   : > { %1010 = vmatmul.bf16.gmra.mxu2 %v984_v61  ;;  %v957_v6 = vsel %vm483_vm0, %v955_v4, %v956_v0  ;;  %v959_v7 = vsel %vm483_vm0, %v956_v0, %v958_v5  ;;  %v9531_v61 = vpack.c.bf16 %v1082_v9, %v1080_v8  ;;  %v962_v4 = vrot.slane %v9430_v34, 1 }
  0xdd   : > { %v9525_v23 = vpack.c.bf16 %v959_v7, %v957_v6  ;;  %v9550_v34 = vsel %vm483_vm0, %v1085_v28, %v9529_v33  ;;  %v9562_v6 = vld [vmem:[#allocation9 + $0xd8] sm:$0xff] }
  0xde   : > { %11886 = vst [vmem:[#allocation36_spill] sm:$0xff] %v9531_v61  ;;  %v9540_v14 = vsel %vm483_vm0, %v962_v4, %v9527_v25  ;;  %v9556_v36 = vpack.c.bf16 %v9529_v33, %v9550_v34  ;;  %1885 = vmatpush.bf16.msrb.mxu3 %v9562_v6 }
  0xdf   : > { %11885 = vst [vmem:[#allocation35_spill] sm:$0xff] %v9525_v23  ;;  %v9546_v35 = vpack.c.bf16 %v9527_v25, %v9540_v14 }
  0xe0   : > { %11888 = vst [vmem:[#allocation38_spill] sm:$0xff] %v9556_v36  ;;  %v960_v36 = vrot.slane %v9400_v24, 1 }
  0xe1   : > { %11887 = vst [vmem:[#allocation37_spill] sm:$0xff] %v9546_v35  ;;  %v9572_v35 = vld [vmem:[#allocation9 + $0x58] sm:$0xff] }
  0xe2   : > { %11891 = vst [vmem:[#allocation41_spill] sm:$0xff] %v9562_v6  ;;  %1837 = vmatpush.bf16.msrb.mxu1 %v9572_v35  ;;  %v963_v24 = vsel %vm483_vm0, %v960_v36, %v962_v4  ;;  %1886 = vmatpush.bf16.msrb.mxu3 %v9579_v15 }
  0xe3   : > { %11892 = vst [vmem:[#allocation42_spill] sm:$0xff] %v9572_v35 }
  0xe7   : > { %v717_v41 = vpop.f32.mrf.mxu0 }
  0xe8   : > { %v745_v60 = vpop.f32.mrf.mxu1 }
  0xe9   : > { %v746_v0 = vadd.f32 %v745_v60, %v717_v41 }
  0xea   : > { %1051 = vmatmul.bf16.vlgmr.msra.gmra.mxu0 %v9525_v23  ;;  %1166 = vmatmul.bf16.vlgmr.msra.gmra.mxu3 %v9531_v61 }
  0xeb   : > { %1110 = vmatmul.bf16.vlgmr.msra.gmra.mxu1 %v9379_v13  ;;  %v9575_v13 = vld [vmem:[#allocation9 + $0x90] sm:$0xff] }
  0xec   : > { %1138 = vmatmul.bf16.vlgmr.msra.gmra.mxu2 %v9525_v23  ;;  %v1083_v23 = vrot.slane %v9410_v26, 1  ;;  %11893 = vst [vmem:[#allocation43_spill] sm:$0xff] %v9575_v13 }
  0xed   : > { %v9566_v8 = vpop.f32.mrf.mxu3  ;;  %1862 = vmatpush.bf16.msrb.mxu2 %v9575_v13 }
  0xee   : > { %v1084_v26 = vsel %vm483_vm0, %v1081_v17, %v1083_v23  ;;  %v9606_v17 = vld [vmem:[#allocation9 + $0x8] sm:$0xff] }
  0xef   : > { %v773_v7 = vpop.f32.mrf.mxu2  ;;  %v719_v41 = vpop.f32.mrf.mxu0  ;;  %11898 = vst [vmem:[#allocation48_spill] sm:$0xff] %v9606_v17  ;;  %1815 = vmatpush.bf16.msrb.mxu0 %v9606_v17 }
  0xf0   : > { %v9569_v9 = vadd.f32 %v773_v7, %v746_v0  ;;  %v747_v60 = vpop.f32.mrf.mxu1  ;;  %v961_v0 = vsel %vm483_vm0, %v958_v5, %v960_v36  ;;  %v1086_v7 = vsel %vm483_vm0, %v1083_v23, %v1085_v28  ;;  %v9597_v5 = vld [vmem:[#allocation9 + $0x50] sm:$0xff]  ;;  %v9604_v28 = vld [vmem:[#allocation9 + $0x88] sm:$0xff] }
  0xf1   : > { %v748_v61 = vadd.f32 %v747_v60, %v719_v41  ;;  %v9591_v6 = vpack.c.bf16 %v963_v24, %v961_v0  ;;  %v9595_v12 = vpack.c.bf16 %v1086_v7, %v1084_v26  ;;  %1838 = vmatpush.bf16.msrb.mxu1 %v9597_v5  ;;  %11897 = vst [vmem:[#allocation47_spill] sm:$0xff] %v9604_v28  ;;  %v9608_v23 = vld [vmem:[#allocation9 + $0xc8] sm:$0xff]  ;;  %v966_v24 = vrot.slane %v9476_v56, 1  ;;  %v9620_v7 = vld [vmem:[#allocation9 + $0x80] sm:$0xff] }
  0xf2   : > { %11899 = vst [vmem:[#allocation49_spill] sm:$0xff] %v9608_v23  ;;  %1863 = vmatpush.bf16.msrb.mxu2 %v9604_v28  ;;  %1887 = vmatpush.bf16.msrb.mxu3 %v9608_v23  ;;  %v9618_v26 = vld [vmem:[#allocation9 + $0x48] sm:$0xff] }
  0xf3   : > { %11895 = vst [vmem:[#allocation45_spill] sm:$0xff] %v9591_v6  ;;  %v967_v56 = vsel %vm483_vm0, %v9527_v25, %v966_v24 }
  0xf4   : > { %11896 = vst [vmem:[#allocation46_spill] sm:$0xff] %v9595_v12 }
  0xf5   : > { %v9589_v60 = vpop.f32.mrf.mxu3  ;;  %11900 = vst [vmem:[#allocation50_spill] sm:$0xff] %v9618_v26  ;;  %1839 = vmatpush.bf16.msrb.mxu1 %v9618_v26 }
  0xf6   : > { %11901 = vst [vmem:[#allocation51_spill] sm:$0xff] %v9620_v7  ;;  %1864 = vmatpush.bf16.msrb.mxu2 %v9620_v7 }
  0xf7   : > { %v775_v41 = vpop.f32.mrf.mxu2  ;;  %v722_v13 = vpop.f32.mrf.mxu0 }
  0xf8   : > { %v9593_v35 = vadd.f32 %v775_v41, %v748_v61  ;;  %v750_v39 = vpop.f32.mrf.mxu1  ;;  %v9622_v41 = vld [vmem:[#allocation9] sm:$0xff] }
  0xf9   : > { %v751_v4 = vadd.f32 %v750_v39, %v722_v13  ;;  %11902 = vst [vmem:[#allocation52_spill] sm:$0xff] %v9622_v41  ;;  %1816 = vmatpush.bf16.msrb.mxu0 %v9622_v41 }
  0xfa   : > { %1056 = vmatmul.bf16.gmra.mxu0 %v9591_v6  ;;  %1171 = vmatmul.bf16.gmra.mxu3 %v9595_v12  ;;  %v1089_v12 = vrot.slane %v9481_v57, 1  ;;  %v983_v57 = vpack.c.bf16 %v967_v56, %v9540_v14 }
  0xfb   : > { %1115 = vmatmul.bf16.gmra.mxu1 %v9420_v29  ;;  %v9625_v29 = vld [vmem:[#allocation9 + $0xc0] sm:$0xff] }
  0xfc   : > { %1143 = vmatmul.bf16.gmra.mxu2 %v9591_v6  ;;  %11903 = vst [vmem:[#allocation53_spill] sm:$0xff] %v9625_v29  ;;  %1888 = vmatpush.bf16.msrb.mxu3 %v9625_v29 }
  0xfd   : > { %v9612_v61 = vpop.f32.mrf.mxu3 }
  0xff   : > { %v778_v13 = vpop.f32.mrf.mxu2  ;;  %v724_v39 = vpop.f32.mrf.mxu0 }
 0x100   : > { %v9615_v36 = vadd.f32 %v778_v13, %v751_v4  ;;  %v752_v0 = vpop.f32.mrf.mxu1  ;;  %v1090_v4 = vsel %vm483_vm0, %v9529_v33, %v1089_v12  ;;  %vm1244_vm0 = vcmask 1044480  }
 0x101   : > { %v753_v6 = vadd.f32 %v752_v0, %v724_v39  ;;  %v9638_v39 = vld [vmem:[#allocation9 + $0x40] sm:$0xff]  ;;  %v1100_v41 = vpack.c.bf16 %v1090_v4, %v9550_v34  ;;  %v986_v34 = vpack.c.bf16 %v966_v24, %v966_v24 }
 0x102   : > { %11904 = vst [vmem:[#allocation54_spill] sm:$0xff] %v9638_v39  ;;  %1840 = vmatpush.bf16.msrb.mxu1 %v9638_v39  ;;  %v1101_v39 = vpack.c.bf16 %v1089_v12, %v1089_v12 }
 0x105   : > { %v9635_v23 = vpop.f32.mrf.mxu3 }
 0x107   : > { %v780_v13 = vpop.f32.mrf.mxu2  ;;  %v727_v7 = vpop.f32.mrf.mxu0 }
 0x108   : > { %v9640_v0 = vadd.f32 %v780_v13, %v753_v6  ;;  %v755_v26 = vpop.f32.mrf.mxu1 }
 0x109   : > { %v756_v29 = vadd.f32 %v755_v26, %v727_v7 }
 0x10a   : > { %1061 = vmatmul.bf16.gmra.mxu0 %v983_v57  ;;  %1176 = vmatmul.bf16.gmra.mxu3 %v1100_v41  ;;  %v9654_v41 = vld [vmem:[#allocation9 + $0x1b8] sm:$0xff] }
 0x10b   : > { %1120 = vmatmul.bf16.gmra.mxu1 %v9447_v44  ;;  %11905 = vst [vmem:[#allocation55_spill] sm:$0xff] %v9654_v41  ;;  %1953 = vmatpush.bf16.msra.mxu2 %v9654_v41 }
 0x10c   : > { %1148 = vmatmul.bf16.gmra.mxu2 %v983_v57  ;;  %v9658_v57 = vld [vmem:[#allocation9 + $0x1f8] sm:$0xff] }
 0x10d   : > { %v9645_v33 = vpop.f32.mrf.mxu3  ;;  %11907 = vst [vmem:[#allocation57_spill] sm:$0xff] %v9658_v57  ;;  %1977 = vmatpush.bf16.msra.mxu3 %v9658_v57 }
 0x10f   : > { %v783_v25 = vpop.f32.mrf.mxu2  ;;  %v729_v56 = vpop.f32.mrf.mxu0 }
 0x110   : > { %v9647_v14 = vadd.f32 %v783_v25, %v756_v29  ;;  %v757_v6 = vpop.f32.mrf.mxu1  ;;  %v9656_v29 = vld [vmem:[#allocation9 + $0x138] sm:$0xff] }
 0x111   : > { %v758_v13 = vadd.f32 %v757_v6, %v729_v56  ;;  %11906 = vst [vmem:[#allocation56_spill] sm:$0xff] %v9656_v29  ;;  %1905 = vmatpush.bf16.msra.mxu0 %v9656_v29  ;;  %v9672_v6 = vld [vmem:[#allocation9 + $0x130] sm:$0xff] }
 0x112   : > { %11911 = vst [vmem:[#allocation61_spill] sm:$0xff] %v9672_v6 }
 0x115   : > { %v9649_v28 = vpop.f32.mrf.mxu3  ;;  %1906 = vmatpush.bf16.msra.mxu0 %v9672_v6  ;;  %v9697_v6 = vld [vmem:[#allocation9 + $0x120] sm:$0xff] }
 0x116   : > { %11919 = vst [vmem:[#allocation69_spill] sm:$0xff] %v9697_v6 }
 0x117   : > { %v785_v17 = vpop.f32.mrf.mxu2  ;;  %v732_v7 = vpop.f32.mrf.mxu0 }
 0x118   : > { %v9651_v26 = vadd.f32 %v785_v17, %v758_v13  ;;  %v760_v4 = vpop.f32.mrf.mxu1  ;;  %v9662_v17 = vld [vmem:[#allocation9 + $0x178] sm:$0xff]  ;;  %v9674_v13 = vld [vmem:[#allocation9 + $0x1f0] sm:$0xff] }
 0x119   : > { %v761_v44 = vadd.f32 %v760_v4, %v732_v7  ;;  %11908 = vst [vmem:[#allocation58_spill] sm:$0xff] %v9662_v17  ;;  %1929 = vmatpush.bf16.msra.mxu1 %v9662_v17  ;;  %1978 = vmatpush.bf16.msra.mxu3 %v9674_v13  ;;  %v9684_v7 = vld [vmem:[#allocation9 + $0x128] sm:$0xff] }
 0x11a   : > { %1066 = vmatmul.bf16.gmra.mxu0 %v986_v34  ;;  %1181 = vmatmul.bf16.gmra.mxu3 %v1101_v39  ;;  %v9670_v39 = vld [vmem:[#allocation9 + $0x1b0] sm:$0xff]  ;;  %11912 = vst [vmem:[#allocation62_spill] sm:$0xff] %v9674_v13  ;;  %v9686_v4 = vld [vmem:[#allocation9 + $0x1e8] sm:$0xff]  ;;  %v9695_v13 = vld [vmem:[#allocation9 + $0x1a0] sm:$0xff] }
 0x11b   : > { %1125 = vmatmul.bf16.gmra.mxu1 %v9487_v62  ;;  %11910 = vst [vmem:[#allocation60_spill] sm:$0xff] %v9670_v39  ;;  %1954 = vmatpush.bf16.msra.mxu2 %v9670_v39 }
 0x11c   : > { %1153 = vmatmul.bf16.gmra.mxu2 %v986_v34  ;;  %v9676_v34 = vld [vmem:[#allocation9 + $0x170] sm:$0xff]  ;;  %11915 = vst [vmem:[#allocation65_spill] sm:$0xff] %v9684_v7  ;;  %1907 = vmatpush.bf16.msra.mxu0 %v9684_v7 }
 0x11d   : > { %v9665_v24 = vpop.f32.mrf.mxu3  ;;  %11913 = vst [vmem:[#allocation63_spill] sm:$0xff] %v9676_v34  ;;  %1930 = vmatpush.bf16.msra.mxu1 %v9676_v34  ;;  %1979 = vmatpush.bf16.msra.mxu3 %v9686_v4 }
 0x11e   : > { %11916 = vst [vmem:[#allocation66_spill] sm:$0xff] %v9686_v4  ;;  %v9705_v4 = vld [vmem:[#allocation9 + $0x160] sm:$0xff] }
 0x11f   : > { %v788_v12 = vpop.f32.mrf.mxu2  ;;  %v734_v25 = vpop.f32.mrf.mxu0  ;;  %11918 = vst [vmem:[#allocation68_spill] sm:$0xff] %v9695_v13 }
 0x120   : > { %v9668_v62 = vadd.f32 %v788_v12, %v761_v44  ;;  %v762_v56 = vpop.f32.mrf.mxu1  ;;  %v9682_v44 = vld [vmem:[#allocation9 + $0x1a8] sm:$0xff]  ;;  %11921 = vst [vmem:[#allocation71_spill] sm:$0xff] %v9705_v4  ;;  %1908 = vmatpush.bf16.msra.mxu0 %v9697_v6  ;;  %v9723_v6 = vld [vmem:[#allocation9 + $0x158] sm:$0xff] }
 0x121   : > { %11914 = vst [vmem:[#allocation64_spill] sm:$0xff] %v9682_v44  ;;  %1955 = vmatpush.bf16.msra.mxu2 %v9682_v44  ;;  %v9689_v56 = vld [vmem:[#allocation9 + $0x168] sm:$0xff] }
 0x122   : > { %11909 = vst [vmem:[#allocation59_spill] sm:$0xff] %v9668_v62  ;;  %1931 = vmatpush.bf16.msra.mxu1 %v9689_v56 }
 0x123   : > { %11917 = vst [vmem:[#allocation67_spill] sm:$0xff] %v9689_v56  ;;  %v9718_v56 = vld [vmem:[#allocation9 + $0x118] sm:$0xff] }
 0x124   : > { %11924 = vst [vmem:[#allocation74_spill] sm:$0xff] %v9718_v56  ;;  %1909 = vmatpush.bf16.msra.mxu0 %v9718_v56 }
 0x125   : > { %v849_v25 = vpop.f32.mrf.mxu3  ;;  %1956 = vmatpush.bf16.msra.mxu2 %v9695_v13  ;;  %11926 = vst [vmem:[#allocation76_spill] sm:$0xff] %v9723_v6  ;;  %v1210_v13 = vrot.slane %v9139_v19, 2 }
 0x126   : > { %1932 = vmatpush.bf16.msra.mxu1 %v9705_v4  ;;  %v9730_v4 = vld [vmem:[#allocation9 + $0x190] sm:$0xff] }
 0x127   : > { %v790_v12 = vpop.f32.mrf.mxu2  ;;  %v860_v17 = vpop.f32.mrf.mxu0  ;;  %11927 = vst [vmem:[#allocation77_spill] sm:$0xff] %v9730_v4 }
 0x128   : > { %v888_v39 = vpop.f32.mrf.mxu1  ;;  %v861_v34 = vadd.f32 %v860_v17, %v9566_v8  ;;  %v9699_v12 = vld [vmem:[#allocation9 + $0x1e0] sm:$0xff]  ;;  %v9712_v17 = vld [vmem:[#allocation7] ss:$0 sm:$0xff] }
 0x129   : > { %11920 = vst [vmem:[#allocation70_spill] sm:$0xff] %v9699_v12  ;;  %1980 = vmatpush.bf16.msra.mxu3 %v9699_v12  ;;  %v9732_v12 = vld [vmem:[#allocation9 + $0x110] sm:$0xff] }
 0x12a   : > { %v889_v25 = vadd.f32 %v888_v39, %v861_v34  ;;  %1817 = vmatmul.bf16.vlgmr.msrb.gmra.mxu0 %v9198_v37  ;;  %1889 = vmatmul.bf16.vlgmr.msrb.gmra.mxu3 %v9370_v10  ;;  %11928 = vst [vmem:[#allocation78_spill] sm:$0xff] %v9732_v12 }
 0x12b   : > { %1841 = vmatmul.bf16.vlgmr.msrb.gmra.mxu1 %v9202_v38  ;;  %v9716_v38 = vld [vmem:[#allocation9 + $0x198] sm:$0xff]  ;;  %1910 = vmatpush.bf16.msra.mxu0 %v9732_v12  ;;  %v9752_v12 = vld [vmem:[#allocation9 + $0x1c8] sm:$0xff] }
 0x12c   : > { %1865 = vmatmul.bf16.vlgmr.msrb.gmra.mxu2 %v9207_v40  ;;  %v907_v8 = vmax.f32 %v9569_v9, %v889_v25  ;;  %11923 = vst [vmem:[#allocation73_spill] sm:$0xff] %v9716_v38  ;;  %v9720_v9 = vld [vmem:[#allocation9 + $0x1d8] sm:$0xff]  ;;  %1933 = vmatpush.bf16.msra.mxu1 %v9723_v6  ;;  %v9743_v6 = vld [vmem:[#allocation9 + $0x188] sm:$0xff] }
 0x12d   : > { %v1024_v39 = vpop.f32.mrf.mxu3  ;;  %11925 = vst [vmem:[#allocation75_spill] sm:$0xff] %v9720_v9  ;;  %1957 = vmatpush.bf16.msra.mxu2 %v9716_v38  ;;  %1981 = vmatpush.bf16.msra.mxu3 %v9720_v9 }
 0x12e   : > { %11931 = vst [vmem:[#allocation81_spill] sm:$0xff] %v9743_v6 }
 0x12f   : > { %v996_v37 = vpop.f32.mrf.mxu2  ;;  %v862_v40 = vpop.f32.mrf.mxu0  ;;  %11934 = vst [vmem:[#allocation84_spill] sm:$0xff] %v9752_v12 }
 0x130   : > { %v9714_v34 = vadd.f32 %v1024_v39, %v996_v37  ;;  %v890_v10 = vpop.f32.mrf.mxu1  ;;  %v863_v25 = vadd.f32 %v862_v40, %v9589_v60  ;;  %v918_v37 = vadd.f32 %v9712_v17, %v907_v8  ;;  %v9736_v40 = vld [vmem:[#allocation9 + $0x150] sm:$0xff] }
 0x131   : > { %11930 = vst [vmem:[#allocation80_spill] sm:$0xff] %v9736_v40  ;;  %1958 = vmatpush.bf16.msra.mxu2 %v9730_v4  ;;  %1934 = vmatpush.bf16.msra.mxu1 %v9736_v40 }
 0x132   : > { %11922 = vst [vmem:[#allocation72_spill] sm:$0xff] %v9714_v34  ;;  %v891_v39 = vadd.f32 %v890_v10, %v863_v25  ;;  %v9734_v34 = vld [vmem:[#allocation9 + $0x1d0] sm:$0xff]  ;;  %v925_v10 = vmax.f32 %v918_v37, 0.0 }
 0x133   : > { %11929 = vst [vmem:[#allocation79_spill] sm:$0xff] %v9734_v34  ;;  %1982 = vmatpush.bf16.msra.mxu3 %v9734_v34  ;;  %v9754_v34 = vld [vmem:[#allocation9 + $0x148] sm:$0xff] }
 0x134   : > { %v908_v60 = vmax.f32 %v9593_v35, %v891_v39  ;;  %v9750_v39 = vld [vmem:[#allocation9 + $0x108] sm:$0xff]  ;;  %11935 = vst [vmem:[#allocation85_spill] sm:$0xff] %v9754_v34  ;;  %v2753_v40 = vrot.slane %v925_v10, 2  ;;  %v2755_v37 = vrot.slane %v925_v10, 3  ;;  %v2757_v4 = vrot.slane %v925_v10, 4 }
 0x135   : > { %v1026_v56 = vpop.f32.mrf.mxu3  ;;  %1959 = vmatpush.bf16.msra.mxu2 %v9743_v6  ;;  %11933 = vst [vmem:[#allocation83_spill] sm:$0xff] %v9750_v39  ;;  %1911 = vmatpush.bf16.msra.mxu0 %v9750_v39 }
 0x136   : > { %1935 = vmatpush.bf16.msra.mxu1 %v9754_v34  ;;  %v2811_v41 = vpack.c.bf16 %v2755_v37, %v2753_v40 }
 0x137   : > { %v998_v9 = vpop.f32.mrf.mxu2  ;;  %v865_v8 = vpop.f32.mrf.mxu0  ;;  %1983 = vmatpush.bf16.msra.mxu3 %v9752_v12 }
 0x138   : > { %v893_v25 = vpop.f32.mrf.mxu1  ;;  %v9745_v38 = vadd.f32 %v1026_v56, %v998_v9  ;;  %v866_v35 = vadd.f32 %v865_v8, %v9612_v61  ;;  %v919_v56 = vadd.f32 %v9712_v17, %v908_v60  ;;  %v2751_v8 = vrot.slane %v925_v10, 1  ;;  %v9784_v60 = vld [vmem:[#allocation9 + $0x140] sm:$0xff] }
 0x139   : > { %v2761_v61 = vrot.slane %v925_v10, 6  ;;  %v2763_v9 = vrot.slane %v925_v10, 7  ;;  %11936 = vst [vmem:[#allocation86_spill] sm:$0xff] %v9784_v60 }
 0x13a   : > { %11932 = vst [vmem:[#allocation82_spill] sm:$0xff] %v9745_v38  ;;  %1822 = vmatmul.bf16.gmra.mxu0 %v9249_v50  ;;  %v9764_v6 = vadd.f32 %v893_v25, %v866_v35  ;;  %1894 = vmatmul.bf16.gmra.mxu3 %v9412_v27  ;;  %v2759_v38 = vrot.slane %v925_v10, 5  ;;  %v9773_v25 = vld [vmem:[#allocation9 + $0x180] sm:$0xff]  ;;  %v2810_v7 = vpack.c.bf16 %v2751_v8, %v925_v10 }
 0x13b   : > { %1846 = vmatmul.bf16.gmra.mxu1 %v9253_v51  ;;  %v9775_v35 = vld [vmem:[#allocation9 + $0x100] sm:$0xff]  ;;  %1960 = vmatpush.bf16.msra.mxu2 %v9773_v25 }
 0x13c   : > { %1870 = vmatmul.bf16.gmra.mxu2 %v9255_v52  ;;  %v9778_v52 = vmax.f32 %v919_v56, 0.0  ;;  %v909_v51 = vmax.f32 %v9615_v36, %v9764_v6  ;;  %v9782_v50 = vld [vmem:[#allocation9 + $0x1c0] sm:$0xff]  ;;  %v11937_v56 = vrot.slane %v9144_v20, 2  ;;  %v2812_v62 = vpack.c.bf16 %v2759_v38, %v2757_v4  ;;  %1912 = vmatpush.bf16.msra.mxu0 %v9775_v35 }
 0x13d   : > { %v1029_v39 = vpop.f32.mrf.mxu3  ;;  %1984 = vmatpush.bf16.msra.mxu3 %v9782_v50  ;;  %1936 = vmatpush.bf16.msra.mxu1 %v9784_v60  ;;  %v2842_v4 = vrot.slane %v2810_v7, 3 }
 0x13e   : > { %v9793_v36 = vsel %vm11809_vm1, %v1210_v13, %v11937_v56  ;;  %v2766_v13 = vrot.slane %v9778_v52, 1  ;;  %v2768_v10 = vrot.slane %v9778_v52, 2  ;;  %v2772_v40 = vrot.slane %v9778_v52, 4 }
 0x13f   : > { %v1001_v12 = vpop.f32.mrf.mxu2  ;;  %v867_v57 = vpop.f32.mrf.mxu0  ;;  %2072 = vmatpush.bf16.msrb.mxu2 %v9452_v45  ;;  %v2774_v37 = vrot.slane %v9778_v52, 5  ;;  %v2843_v45 = vrot.slane %v2811_v41, 6  ;;  %v2846_v8 = vrot.slane %v2812_v62, 7 }
 0x140   : > { %v9787_v44 = vadd.f32 %v1029_v39, %v1001_v12  ;;  %v895_v29 = vpop.f32.mrf.mxu1  ;;  %v2813_v12 = vpack.c.bf16 %v2763_v9, %v2761_v61  ;;  %v2770_v39 = vrot.slane %v9778_v52, 3  ;;  %v868_v38 = vadd.f32 %v867_v57, %v9635_v23  ;;  %2024 = vmatpush.bf16.msrb.mxu0 %v9454_v47 }
 0x141   : > { %2096 = vmatpush.bf16.msrb.mxu3 %v9456_v48  ;;  %2048 = vmatpush.bf16.msrb.mxu1 %v9461_v49  ;;  %v2844_v61 = vrot.slane %v2811_v41, 1  ;;  %v2845_v9 = vrot.slane %v2812_v62, 4  ;;  %v2776_v47 = vrot.slane %v9778_v52, 6  ;;  %v2778_v48 = vrot.slane %v9778_v52, 7 }
 0x142   : > { %v2847_v56 = vrot.slane %v2813_v12, 2  ;;  %v2848_v57 = vrot.slane %v2813_v12, 5  ;;  %v9815_v27 = vpack.c.bf16 %v2766_v13, %v9778_v52  ;;  %v9817_v49 = vpack.c.bf16 %v2770_v39, %v2768_v10 }
 0x143   : > { %2073 = vmatpush.bf16.msrb.mxu2 %v9463_v53  ;;  %v920_v41 = vadd.f32 %v9712_v17, %v909_v51  ;;  %v2816_v6 = vpack.c.bf16 %v2774_v37, %v2772_v40  ;;  %v896_v60 = vadd.f32 %v895_v29, %v868_v38  ;;  %v2873_v52 = vsel %vm11812_vm2, %v2810_v7, %v2842_v4 }
 0x144   : > { %2025 = vmatpush.bf16.msrb.mxu0 %v9465_v54  ;;  %v2877_v13 = vsel %vm2874_vm3, %v2843_v45, %v2844_v61  ;;  %v2883_v51 = vsel %vm2880_vm4, %v2845_v9, %v2846_v8  ;;  %v2817_v54 = vpack.c.bf16 %v2778_v48, %v2776_v47  ;;  %v11938_v29 = vrot.slane %v9149_v21, 2 }
 0x145   : > { %v1031_v34 = vpop.f32.mrf.mxu3  ;;  %2097 = vmatpush.bf16.msrb.mxu3 %v9467_v55  ;;  %2049 = vmatpush.bf16.msrb.mxu1 %v9489_v63  ;;  %v910_v55 = vmax.f32 %v9640_v0, %v896_v60  ;;  %v2887_v63 = vsel %vm11811_vm9, %v2847_v56, %v2848_v57  ;;  %v2849_v7 = vrot.slane %v9815_v27, 3  ;;  %v2850_v38 = vrot.slane %v9817_v49, 6 }
 0x146   : > { %v9839_v4 = vmax.f32 %v920_v41, 0.0  ;;  %v2851_v0 = vrot.slane %v9817_v49, 1  ;;  %v11940_v45 = vrot.slane %v9178_v31, 2  ;;  %v11942_v9 = vrot.slane %v9235_v46, 2 }
 0x147   : > { %v1003_v62 = vpop.f32.mrf.mxu2  ;;  %v870_v53 = vpop.f32.mrf.mxu0  ;;  %2074 = vmatpush.bf16.msrb.mxu2 %v9494_v1  ;;  %v921_v60 = vadd.f32 %v9712_v17, %v910_v55  ;;  %v2853_v1 = vrot.slane %v2816_v6, 7  ;;  %v2854_v47 = vrot.slane %v2817_v54, 2  ;;  %v2855_v48 = vrot.slane %v2817_v54, 5 }
 0x148   : > { %v9822_v23 = vadd.f32 %v1031_v34, %v1003_v62  ;;  %v898_v12 = vpop.f32.mrf.mxu1  ;;  %v871_v10 = vadd.f32 %v870_v53, %v9645_v33  ;;  %v11939_v34 = vrot.slane %v9144_v20, 2  ;;  %v2852_v33 = vrot.slane %v2816_v6, 4  ;;  %2026 = vmatpush.bf16.msrb.mxu0 %v9496_v2 }
 0x149   : > { %v11943_v8 = vmov %v11940_v45  ;;  %2098 = vmatpush.bf16.msrb.mxu3 %v9498_v3  ;;  %v2781_v49 = vrot.slane %v9839_v4, 1  ;;  %2050 = vmatpush.bf16.msrb.mxu1 %v9506_v11  ;;  %v2783_v2 = vrot.slane %v9839_v4, 2  ;;  %v2785_v3 = vrot.slane %v9839_v4, 3  ;;  %v11957_v11 = vld [vmem:[#allocation42_spill] sm:$0xff] }
 0x14a   : > { %v1214_v39 = vsel %vm11809_vm1, %v11939_v34, %v11938_v29  ;;  %1827 = vmatmul.bf16.gmra.mxu0 %v9293_v58  ;;  %v899_v40 = vadd.f32 %v898_v12, %v871_v10  ;;  %1899 = vmatmul.bf16.gmra.mxu3 %v9385_v16  ;;  %v11941_v58 = vrot.slane %v9173_v30, 2  ;;  %v1231_v56 = vsel %vm11809_vm1, %v11943_v8, %v11942_v9 }
 0x14b   : > { %1851 = vmatmul.bf16.gmra.mxu1 %v9297_v59  ;;  %v9848_v37 = vpack.c.bf16 %v1214_v39, %v9793_v36  ;;  %v2879_v36 = vsel %vm2878_vm5, %v2873_v52, %v2877_v13  ;;  %2075 = vmatpush.bf16.msrb.mxu2 %v9511_v18  ;;  %v9877_v53 = vmax.f32 %v921_v60, 0.0  ;;  %v2889_v13 = vsel %vm2888_vm10, %v2883_v51, %v2887_v63 }
 0x14c   : > { %1875 = vmatmul.bf16.gmra.mxu2 %v9219_v43  ;;  %v1229_v61 = vsel %vm11809_vm1, %v11941_v58, %v11940_v45  ;;  %v911_v6 = vmax.f32 %v9647_v14, %v899_v40  ;;  %vm9882_vm1 = vmand %vm11810_vm7, %vm2944_vm8  ;;  %v2893_v18 = vsel %vm11812_vm2, %v9815_v27, %v2849_v7  ;;  %v2896_v54 = vsel %vm2874_vm3, %v2850_v38, %v2851_v0  ;;  %v11950_v40 = vld [vmem:[#allocation39_spill] sm:$0xff] }
 0x14d   : > { %v9861_v57 = vpack.c.bf16 %v1231_v56, %v1229_v61  ;;  %v1034_v62 = vpop.f32.mrf.mxu3  ;;  %v2900_v55 = vsel %vm2880_vm4, %v2852_v33, %v2853_v1  ;;  %v2903_v10 = vsel %vm11811_vm9, %v2854_v47, %v2855_v48  ;;  %v2787_v29 = vrot.slane %v9839_v4, 4  ;;  %2027 = vmatpush.bf16.msrb.mxu0 %v9513_v22  ;;  %2099 = vmatpush.bf16.msrb.mxu3 %v9515_v32  ;;  %vm2946_vm6 = vmor %vm9882_vm1, %vm9871_vm15  ;;  %v11953_v61 = vld [vmem:[#allocation40_spill] sm:$0xff]  ;;  %v11958_v14 = vld [vmem:[#allocation43_spill] sm:$0xff] }
 0x14e   : > { %v2789_v34 = vrot.slane %v9839_v4, 5  ;;  %v2791_v39 = vrot.slane %v9839_v4, 6  ;;  %v2793_v63 = vrot.slane %v9839_v4, 7  ;;  %v11948_v7 = vrot.slane %v9144_v20, 3  ;;  %2051 = vmatpush.bf16.msrb.mxu1 %v9534_v42  ;;  %vm9922_vm8 = vmand %vm2874_vm3, %vm2948_vm11 }
 0x14f   : > { %v1006_v41 = vpop.f32.mrf.mxu2  ;;  %v872_v12 = vpop.f32.mrf.mxu0  ;;  %v11949_v38 = vrot.slane %v9139_v19, 3  ;;  %v9912_v22 = vpack.c.bf16 %v2781_v49, %v9839_v4  ;;  %v9914_v33 = vpack.c.bf16 %v2785_v3, %v2783_v2  ;;  %v2798_v60 = vrot.slane %v9877_v53, 2  ;;  %2076 = vmatpush.bf16.msrb.mxu2 %v11950_v40  ;;  %v11954_v49 = vld [vmem:[#allocation41_spill] sm:$0xff]  ;;  %vm9952_vm11 = vmor %vm9922_vm8, %vm2946_vm6  ;;  %v9992_v40 = vld [vmem:[%s11727_s0 + $0x10] sm:$0xff] }
 0x150   : > { %v900_v52 = vpop.f32.mrf.mxu1  ;;  %v9893_v51 = vadd.f32 %v1034_v62, %v1006_v41  ;;  %v873_v27 = vadd.f32 %v872_v12, %v9649_v28  ;;  %v2796_v28 = vrot.slane %v9877_v53, 1  ;;  %v2800_v1 = vrot.slane %v9877_v53, 3  ;;  %vm9966_vm1 = vmand %vm11813_vm13, %vm2952_vm14 }
 0x151   : > { %v9904_v0 = vsel %vm1244_vm0, %v11949_v38, %v11948_v7  ;;  %v2802_v4 = vrot.slane %v9877_v53, 4  ;;  %v2804_v45 = vrot.slane %v9877_v53, 5  ;;  %v922_v58 = vadd.f32 %v9712_v17, %v911_v6  ;;  %2028 = vmatpush.bf16.msrb.mxu0 %v11953_v61  ;;  %2100 = vmatpush.bf16.msrb.mxu3 %v11954_v49  ;;  %v11961_v7 = vld [vmem:[#allocation44_spill] sm:$0xff]  ;;  %vm2954_vm14 = vmor %vm9966_vm1, %vm9952_vm11 }
 0x152   : > { %vm2956_vm7 = vsmask.f32 4352  ;;  %vm2959_vm9 = vcmask 1045509   ;;  %vm2960_vm2 = vsmask.f32 5376  ;;  %v9930_v42 = vpack.c.bf16 %v2789_v34, %v2787_v29  ;;  %2052 = vmatpush.bf16.msrb.mxu1 %v11957_v11  ;;  %v11966_v49 = vld [vmem:[#allocation48_spill] sm:$0xff] }
 0x153   : > { %v9934_v9 = vsel %vm11815_vm12, %v2879_v36, %v2889_v13  ;;  %v9937_v8 = vsel %vm2878_vm5, %v2893_v18, %v2896_v54  ;;  %v9940_v56 = vsel %vm2888_vm10, %v2900_v55, %v2903_v10  ;;  %v9942_v47 = vpack.c.bf16 %v2793_v63, %v2791_v39  ;;  %2077 = vmatpush.bf16.msrb.mxu2 %v11958_v14  ;;  %vm10009_vm6 = vmand %vm2880_vm4, %vm2956_vm7  ;;  %v11975_v36 = vld [vmem:[#allocation49_spill] sm:$0xff]  ;;  %v11981_v54 = vld [vmem:[#allocation52_spill] sm:$0xff] }
 0x154   : > { %v2856_v41 = vrot.slane %v9912_v22, 3  ;;  %v2806_v62 = vrot.slane %v9877_v53, 6  ;;  %v2808_v2 = vrot.slane %v9877_v53, 7  ;;  %v9960_v3 = vpack.c.bf16 %v2796_v28, %v9877_v53  ;;  %vm10047_vm7 = vmor %vm10009_vm6, %vm2954_vm14 }
 0x155   : > { %v1036_v6 = vpop.f32.mrf.mxu3  ;;  %v9971_v55 = vpack.c.bf16 %v2800_v1, %v2798_v60  ;;  %v9973_v10 = vpack.c.bf16 %v2804_v45, %v2802_v4  ;;  %v9975_v53 = vmax.f32 %v922_v58, 0.0  ;;  %vm2964_vm15 = vsmask.f32 6400  ;;  %2029 = vmatpush.bf16.msrb.mxu0 %v11961_v7  ;;  %2101 = vmatpush.bf16.msrb.mxu3 %v9579_v15  ;;  %vm10062_vm11 = vmand %vm2959_vm9, %vm2960_vm2 }
 0x156   : > { %v2858_v29 = vrot.slane %v9914_v33, 1  ;;  %v2859_v34 = vrot.slane %v9930_v42, 4  ;;  %v9979_v39 = vadd.f32 %v900_v52, %v873_v27  ;;  %v2860_v38 = vrot.slane %v9930_v42, 7  ;;  %2053 = vmatpush.bf16.msrb.mxu1 %v9597_v5  ;;  %vm2962_vm14 = vmor %vm10062_vm11, %vm10047_vm7 }
 0x157   : > { %v1008_v48 = vpop.f32.mrf.mxu2  ;;  %v875_v12 = vpop.f32.mrf.mxu0  ;;  %v2861_v28 = vrot.slane %v9942_v47, 2  ;;  %v2862_v60 = vrot.slane %v9942_v47, 5  ;;  %v11814_v52 = vrot.slane %v9992_v40, 3  ;;  %v9999_v27 = vpack.c.bf16 %v2808_v2, %v2806_v62 }
 0x158   : > { %v903_v13 = vpop.f32.mrf.mxu1  ;;  %v9981_v63 = vadd.f32 %v1036_v6, %v1008_v48  ;;  %v2863_v32 = vrot.slane %v9960_v3, 3  ;;  %v876_v4 = vadd.f32 %v875_v12, %v9665_v24  ;;  %v2864_v58 = vrot.slane %v9971_v55, 6  ;;  %v11964_v48 = vld [vmem:[#allocation47_spill] sm:$0xff] }
 0x159   : > { %v2865_v42 = vrot.slane %v9971_v55, 1  ;;  %v2866_v61 = vrot.slane %v9973_v10, 4  ;;  %v3211_v47 = vrot.slane %v9975_v53, 1  ;;  %2078 = vmatpush.bf16.msrb.mxu2 %v11964_v48  ;;  %vm2967_vm8 = vcmask 1047559   ;;  %2030 = vmatpush.bf16.msrb.mxu0 %v11966_v49 }
 0x15a   : > { %1913 = vmatmul.bf16.vlgmr.msra.gmra.mxu0 %v9848_v37  ;;  %vm2968_vm13 = vsmask.f32 7424  ;;  %v2867_v15 = vrot.slane %v9973_v10, 7  ;;  %v3213_v5 = vrot.slane %v9975_v53, 2  ;;  %v3215_v24 = vrot.slane %v9975_v53, 3  ;;  %2102 = vmatpush.bf16.msrb.mxu3 %v11975_v36 }
 0x15b   : > { %1937 = vmatmul.bf16.vlgmr.msra.gmra.mxu1 %v9861_v57  ;;  %v10021_v6 = vadd.f32 %v903_v13, %v876_v4  ;;  %v3217_v62 = vrot.slane %v9975_v53, 4  ;;  %v11967_v2 = vrot.slane %v9144_v20, 3  ;;  %v11968_v11 = vrot.slane %v9178_v31, 3  ;;  %vm10161_vm7 = vmand %vm2967_vm8, %vm2968_vm13 }
 0x15c   : > { %v11969_v14 = vrot.slane %v9173_v30, 3  ;;  %v11970_v10 = vrot.slane %v9235_v46, 3  ;;  %v3219_v30 = vrot.slane %v9975_v53, 5  ;;  %v3268_v1 = vpack.c.bf16 %v3211_v47, %v9975_v53 }
 0x15d   : > { %11965 = vst [vmem:[#allocation39_spill] sm:$0xff] %v10021_v6  ;;  %v1249_v12 = vsel %vm1244_vm0, %v11967_v2, %v11814_v52  ;;  %v11971_v13 = vmov %v11968_v11  ;;  %v1039_v48 = vpop.f32.mrf.mxu3  ;;  %v3221_v2 = vrot.slane %v9975_v53, 6  ;;  %v3223_v52 = vrot.slane %v9975_v53, 7  ;;  %2031 = vmatpush.bf16.msrb.mxu0 %v11981_v54 }
 0x15e   : > { %v1266_v55 = vsel %vm1244_vm0, %v11969_v14, %v11968_v11  ;;  %v1268_v7 = vsel %vm1244_vm0, %v11971_v13, %v11970_v10  ;;  %v10056_v14 = vpack.c.bf16 %v1249_v12, %v9904_v0  ;;  %v11976_v13 = vld [vmem:[#allocation50_spill] sm:$0xff]  ;;  %v11979_v12 = vld [vmem:[#allocation51_spill] sm:$0xff]  ;;  %vm11980_vm1 = vcmask 1040384  }
 0x15f   : > { %v1011_v4 = vpop.f32.mrf.mxu2  ;;  %v877_v18 = vpop.f32.mrf.mxu0  ;;  %2054 = vmatpush.bf16.msrb.mxu1 %v11976_v13  ;;  %v10068_v11 = vpack.c.bf16 %v1268_v7, %v1266_v55  ;;  %2079 = vmatpush.bf16.msrb.mxu2 %v11979_v12  ;;  %v2869_v36 = vrot.slane %v9999_v27, 5  ;;  %v3269_v13 = vpack.c.bf16 %v3215_v24, %v3213_v5  ;;  %v11982_v53 = vrot.slane %v9914_v33, 6  ;;  %vm11986_vm6 = vmmov %vm11980_vm1 }
 0x160   : > { %v905_v10 = vpop.f32.mrf.mxu1  ;;  %v10070_v0 = vadd.f32 %v1039_v48, %v1011_v4  ;;  %v2908_v18 = vsel %vm11980_vm1, %v9912_v22, %v2856_v41  ;;  %1961 = vmatmul.bf16.vlgmr.msra.gmra.mxu2 %v10056_v14  ;;  %v2915_v55 = vsel %vm2880_vm4, %v2859_v34, %v2860_v38  ;;  %vm11983_vm2 = vcmask 1046534   ;;  %v10090_v22 = vld [vmem:[%s11727_s0 + $0x18] sm:$0xff]  ;;  %v10104_v34 = vld [vmem:[%s11727_s0 + $0x20] sm:$0xff] }
 0x161   : > { %v2868_v10 = vrot.slane %v9999_v27, 2  ;;  %v2911_v47 = vsel %vm2874_vm3, %v11982_v53, %v2858_v29  ;;  %v2918_v7 = vsel %vm11983_vm2, %v2861_v28, %v2862_v60  ;;  %1985 = vmatmul.bf16.vlgmr.msra.gmra.mxu3 %v10068_v11  ;;  %11984 = vst [vmem:[#allocation40_spill] sm:$0xff] %v10090_v22  ;;  %v1215_v41 = vrot.slane %v10090_v22, 2  ;;  %v11985_v27 = vld [vmem:[#allocation55_spill] sm:$0xff]  ;;  %v11988_v28 = vld [vmem:[#allocation53_spill] sm:$0xff]  ;;  %v11989_v60 = vld [vmem:[#allocation54_spill] sm:$0xff] }
 0x162   : > { %v2923_v33 = vsel %vm11986_vm6, %v9960_v3, %v2863_v32  ;;  %v2926_v54 = vsel %vm2874_vm3, %v2864_v58, %v2865_v42  ;;  %v3270_v29 = vpack.c.bf16 %v3219_v30, %v3217_v62  ;;  %11987 = vst [vmem:[#allocation41_spill] sm:$0xff] %v10104_v34  ;;  %v1217_v38 = vrot.slane %v10104_v34, 2  ;;  %2103 = vmatpush.bf16.msrb.mxu3 %v11988_v28  ;;  %vm11990_vm1 = vmmov %vm11983_vm2  ;;  %v8475_v42 = vld [vmem:[%s11728_s1 + $0x18] sm:$0xff]  ;;  %v11994_v4 = vld [vmem:[#allocation57_spill] sm:$0xff] }
 0x163   : > { %2168 = vmatpush.bf16.msra.mxu2 %v11985_v27  ;;  %2055 = vmatpush.bf16.msrb.mxu1 %v11989_v60  ;;  %vm10111_vm2 = vmand %vm11990_vm1, %vm2964_vm15  ;;  %v2930_v3 = vsel %vm2880_vm4, %v2866_v61, %v2867_v15  ;;  %v3271_v32 = vpack.c.bf16 %v3223_v52, %v3221_v2  ;;  %v3300_v58 = vrot.slane %v3268_v1, 3  ;;  %v1232_v24 = vrot.slane %v8475_v42, 2  ;;  %v11993_v62 = vld [vmem:[#allocation56_spill] sm:$0xff]  ;;  %v11996_v61 = vld [vmem:[#allocation58_spill] sm:$0xff] }
 0x164   : > { %2120 = vmatpush.bf16.msra.mxu0 %v11993_v62  ;;  %vm11995_vm6 = vmmov %vm11990_vm1  ;;  %v3301_v30 = vrot.slane %v3269_v13, 6  ;;  %v3302_v12 = vrot.slane %v3269_v13, 1  ;;  %v10125_v53 = vld [vmem:[%s11728_s1 + $0x20] sm:$0xff]  ;;  %v10130_v15 = vsel %vm2878_vm5, %v2908_v18, %v2911_v47  ;;  %v2919_v2 = vsel %vm2888_vm10, %v2915_v55, %v2918_v7 }
 0x165   : > { %v2933_v48 = vsel %vm11995_vm6, %v2868_v10, %v2869_v36  ;;  %v1234_v52 = vrot.slane %v10125_v53, 2  ;;  %v10134_v27 = vsel %vm2878_vm5, %v2923_v33, %v2926_v54  ;;  %v1041_v36 = vpop.f32.mrf.mxu3  ;;  %v11997_v13 = vrot.slane %v9149_v21, 2  ;;  %v11999_v60 = vld [vmem:[#allocation60_spill] sm:$0xff]  ;;  %vm10147_vm1 = vmor %vm10111_vm2, %vm2962_vm14 }
 0x166   : > { %2192 = vmatpush.bf16.msra.mxu3 %v11994_v4  ;;  %vm11998_vm15 = vcmask 1045504   ;;  %v3303_v47 = vrot.slane %v3270_v29, 4  ;;  %v3304_v55 = vrot.slane %v3270_v29, 7  ;;  %v12003_v45 = vrot.slane %v9235_v46, 2  ;;  %vm10189_vm13 = vmor %vm10161_vm7, %vm10147_vm1 }
 0x167   : > { %2144 = vmatpush.bf16.msra.mxu1 %v11996_v61  ;;  %v1013_v10 = vpop.f32.mrf.mxu2  ;;  %v1216_v28 = vsel %vm11998_vm15, %v11997_v13, %v1215_v41  ;;  %2169 = vmatpush.bf16.msra.mxu2 %v11999_v60  ;;  %v10151_v7 = vpop.f32.mrf.mxu0  ;;  %vm12002_vm6 = vmmov %vm11998_vm15  ;;  %v2934_v5 = vsel %vm2888_vm10, %v2930_v3, %v2933_v48  ;;  %v3305_v29 = vrot.slane %v3271_v32, 2  ;;  %v3306_v62 = vrot.slane %v3271_v32, 5  ;;  %v12008_v61 = vld [vmem:[#allocation61_spill] sm:$0xff]  ;;  %v12010_v60 = vld [vmem:[#allocation62_spill] sm:$0xff] }
 0x168   : > { %v1111_v21 = vpop.f32.mrf.mxu1  ;;  %v1218_v33 = vsel %vm12002_vm6, %v1215_v41, %v1217_v38  ;;  %vm12004_vm15 = vmmov %vm12002_vm6  ;;  %vm12007_vm11 = vcmask 1040384   ;;  %2121 = vmatpush.bf16.msra.mxu0 %v12008_v61  ;;  %v3333_v41 = vsel %vm2874_vm3, %v3301_v30, %v3302_v12  ;;  %v1250_v13 = vrot.slane %v10090_v22, 3  ;;  %v12014_v30 = vld [vmem:[#allocation64_spill] sm:$0xff]  ;;  %v12068_v22 = vld [vmem:[#allocation83_spill] sm:$0xff] }
 0x169   : > { %v1233_v49 = vsel %vm12004_vm15, %v12003_v45, %v1232_v24  ;;  %v3330_v4 = vsel %vm12007_vm11, %v3268_v1, %v3300_v58  ;;  %v10169_v10 = vpack.c.bf16 %v1218_v33, %v1216_v28  ;;  %vm12009_vm14 = vmmov %vm12002_vm6  ;;  %v12011_v45 = vld [vmem:[#allocation63_spill] sm:$0xff]  ;;  %v12012_v3 = vmax.f32 %v9651_v26, %v9979_v39 }
 0x16a   : > { %v1235_v36 = vsel %vm12009_vm14, %v1232_v24, %v1234_v52  ;;  %2193 = vmatpush.bf16.msra.mxu3 %v12010_v60  ;;  %v11817_v58 = vrot.slane %v10104_v34, 3  ;;  %v1269_v48 = vrot.slane %v8475_v42, 3  ;;  %v12015_v24 = vmov 0  ;;  %vm12020_vm1 = vmmov %vm12007_vm11  ;;  %v12029_v60 = vld [vmem:[#allocation66_spill] sm:$0xff] }
 0x16b   : > { %2145 = vmatpush.bf16.msra.mxu1 %v12011_v45  ;;  %v923_v1 = vadd.f32 %v9712_v17, %v12012_v3  ;;  %v10181_v32 = vpack.c.bf16 %v1235_v36, %v1233_v49  ;;  %2170 = vmatpush.bf16.msra.mxu2 %v12014_v30  ;;  %v12016_v24 = vsel %vm10189_vm13, 4294967295, %v12015_v24  ;;  %v3337_v12 = vsel %vm2880_vm4, %v3303_v47, %v3304_v55  ;;  %v12023_v55 = vld [vmem:[#allocation65_spill] sm:$0xff]  ;;  %v10215_v49 = vld [vmem:[%s11728_s1 + $0x30] sm:$0x3]  ;;  %v12030_v45 = vld [vmem:[#allocation67_spill] sm:$0xff] }
 0x16c   : > { %12017 = vst [vmem:[#allocation43_spill] sm:$0xff] %v12016_v24  ;;  %1918 = vmatmul.bf16.gmra.mxu0 %v10169_v10  ;;  %v12018_v26 = vrot.slane %v9992_v40, 3  ;;  %v11816_v42 = vrot.slane %v10125_v53, 3  ;;  %vm3175_vm2 = vsmask.f32 7938  ;;  %v1253_v28 = vsel %vm1244_vm0, %v1250_v13, %v11817_v58  ;;  %v10231_v3 = vld [vmem:[#allocation2] sm:$0xff] }
 0x16d   : > { %12013 = vst [vmem:[#allocation42_spill] sm:$0xff] %v10181_v32  ;;  %1942 = vmatmul.bf16.gmra.mxu1 %v10181_v32  ;;  %v12019_v18 = vrot.slane %v9235_v46, 3  ;;  %vm10207_vm6 = vmand %vm12020_vm1, %vm3175_vm2  ;;  %vm3177_vm15 = vsmask.f32 7942  ;;  %vm3180_vm7 = vsmask.f32 7946  ;;  %2122 = vmatpush.bf16.msra.mxu0 %v12023_v55 }
 0x16e   : > { %v1251_v39 = vsel %vm1244_vm0, %v12018_v26, %v1250_v13  ;;  %vm12024_vm11 = vcmask 1046534   ;;  %v1272_v36 = vsel %vm1244_vm0, %v1269_v48, %v11816_v42  ;;  %vm12026_vm14 = vcmask 1041409   ;;  %2194 = vmatpush.bf16.msra.mxu3 %v12029_v60  ;;  %v10795_v24 = vld [vmem:[#allocation9 + $0x1e0] sm:$0xff] }
 0x16f   : > { %v1270_v33 = vsel %vm1244_vm0, %v12019_v18, %v1269_v48  ;;  %v3340_v46 = vsel %vm12024_vm11, %v3305_v29, %v3306_v62  ;;  %v10219_v61 = vpack.c.bf16 %v1253_v28, %v1251_v39  ;;  %vm10225_vm2 = vmand %vm12026_vm14, %vm3177_vm15  ;;  %2146 = vmatpush.bf16.msra.mxu1 %v12030_v45  ;;  %v10236_v29 = vsel %vm11815_vm12, %v9937_v8, %v9940_v56  ;;  %v10238_v62 = vld [vmem:[#allocation2 + $0x8] sm:$0xff]  ;;  %v1139_v26 = vpop.f32.mrf.mxu2  ;;  %v1167_v39 = vpop.f32.mrf.mxu3  ;;  %v12032_v28 = vld [vmem:[#allocation68_spill] sm:$0xff] }
 0x170   : > { %v10240_v30 = vmax.f32 %v923_v1, 0.0  ;;  %v10242_v48 = vpack.c.bf16 %v1272_v36, %v1270_v33  ;;  %vm3179_vm1 = vmor %vm10225_vm2, %vm10207_vm6  ;;  %vm3183_vm15 = vsmask.f32 7950  ;;  %2171 = vmatpush.bf16.msra.mxu2 %v12032_v28  ;;  %v10251_v8 = vsel %vm11815_vm12, %v10130_v15, %v2919_v2  ;;  %v10253_v56 = vld [vmem:[#allocation2 + $0x10] sm:$0xff]  ;;  %v10259_v18 = vld [vmem:[#allocation2 + $0x18] sm:$0xff]  ;;  %v1054_v55 = vpop.f32.mrf.mxu0  ;;  %v1113_v36 = vpop.f32.mrf.mxu1  ;;  %12140 = vst [vmem:[#allocation63_spill] sm:$0xff] %v10795_v24 }
 0x171   : > { %12025 = vst [vmem:[#allocation44_spill] sm:$0xff] %v10219_v61  ;;  %v10257_v1 = vsel %vm11815_vm12, %v10134_v27, %v2934_v5  ;;  %v3334_v33 = vsel %vm2878_vm5, %v3330_v4, %v3333_v41  ;;  %v1140_v47 = vadd.f32 %v1139_v26, %v1111_v21  ;;  %vm3181_vm6 = vmand %vm2874_vm3, %vm3180_vm7  ;;  %v3341_v13 = vsel %vm2888_vm10, %v3337_v12, %v3340_v46  ;;  %v10272_v2 = vld [vmem:[%s11727_s0 + $0x28] sm:$0xff]  ;;  %v12037_v46 = vld [vmem:[#allocation72_spill] sm:$0xff] }
 0x172   : > { %12031 = vst [vmem:[#allocation47_spill] sm:$0xff] %v10242_v48  ;;  %vm10265_vm11 = vmor %vm3181_vm6, %vm3179_vm1  ;;  %vm3186_vm14 = vsmask.f32 7954  ;;  %v1219_v27 = vrot.slane %v10272_v2, 2  ;;  %v8479_v21 = vld [vmem:[%s11728_s1 + $0x28] sm:$0xff]  ;;  %v1053_v60 = vadd.f32 %v10151_v7, %v12037_v46  ;;  %1966 = vmatmul.bf16.gmra.mxu2 %v10219_v61  ;;  %vm12038_vm7 = vcmask 1043459   ;;  %1990 = vmatmul.bf16.gmra.mxu3 %v10242_v48 }
 0x173   : > { %12035 = vst [vmem:[#allocation48_spill] sm:$0xff] %v10272_v2  ;;  %v1236_v5 = vrot.slane %v8479_v21, 2  ;;  %v12036_v4 = vld [vmem:[#allocation69_spill] sm:$0xff]  ;;  %v1168_v45 = vadd.f32 %v1167_v39, %v1140_v47  ;;  %vm10292_vm2 = vmand %vm12038_vm7, %vm3183_vm15  ;;  %v3226_v7 = vrot.slane %v10240_v30, 1  ;;  %v1254_v39 = vrot.slane %v10272_v2, 3  ;;  %v12043_v12 = vld [vmem:[#allocation70_spill] sm:$0xff] }
 0x174   : > { %2123 = vmatpush.bf16.msra.mxu0 %v12036_v4  ;;  %vm3185_vm1 = vmor %vm10292_vm2, %vm10265_vm11  ;;  %v10312_v47 = vsel %vm11815_vm12, %v3334_v33, %v3341_v13  ;;  %vm3189_vm6 = vsmask.f32 7958  ;;  %2195 = vmatpush.bf16.msra.mxu3 %v12043_v12  ;;  %v12044_v41 = vld [vmem:[#allocation71_spill] sm:$0xff]  ;;  %vm12045_vm7 = vcmask 1045504   ;;  %v10332_v13 = vld [vmem:[%s11727_s0 + $0x30] sm:$0x3] }
 0x175   : > { %v1186_v28 = vmax.f32 %v1053_v60, %v1168_v45  ;;  %vm10317_vm15 = vmand %vm2880_vm4, %vm3186_vm14  ;;  %2147 = vmatpush.bf16.msra.mxu1 %v12044_v41  ;;  %v1220_v54 = vsel %vm12045_vm7, %v1217_v38, %v1219_v27  ;;  %12047 = vst [vmem:[#allocation49_spill] sm:$0xff] %v10332_v13  ;;  %v1256_v60 = vrot.slane %v10332_v13, 3  ;;  %v1273_v45 = vrot.slane %v8479_v21, 3  ;;  %v12048_v46 = vld [vmem:[#allocation73_spill] sm:$0xff]  ;;  %v12049_v12 = vld [vmem:[#allocation74_spill] sm:$0xff] }
 0x176   : > { %vm12046_vm12 = vmmov %vm12045_vm7  ;;  %2172 = vmatpush.bf16.msra.mxu2 %v12048_v46  ;;  %v10343_v6 = vpack.c.bf16 %v3226_v7, %v10240_v30  ;;  %v12052_v46 = vld [vmem:[#allocation82_spill] sm:$0xff]  ;;  %v12053_v58 = vrot.slane %v10104_v34, 3  ;;  %v10368_v31 = vpack.c.bf16 %v1219_v27, %v1220_v54  ;;  %v12057_v13 = vld [vmem:[#allocation76_spill] sm:$0xff]  ;;  %vm3192_vm11 = vsmask.f32 7962 }
 0x177   : > { %v1237_v33 = vsel %vm12046_vm12, %v1234_v52, %v1236_v5  ;;  %v1193_v52 = vadd.f32 %v9712_v17, %v1186_v28  ;;  %vm10352_vm12 = vmor %vm10317_vm15, %vm3185_vm1  ;;  %v1141_v42 = vpop.f32.mrf.mxu2  ;;  %v1169_v28 = vpop.f32.mrf.mxu3  ;;  %v12060_v48 = vld [vmem:[#allocation77_spill] sm:$0xff]  ;;  %v12061_v54 = vld [vmem:[#allocation78_spill] sm:$0xff]  ;;  %vm12062_vm2 = vcmask 1046534   ;;  %vm3195_vm15 = vsmask.f32 7966 }
 0x178   : > { %2124 = vmatpush.bf16.msra.mxu0 %v12049_v12  ;;  %v1055_v12 = vadd.f32 %v1054_v55, %v12052_v46  ;;  %v1255_v7 = vsel %vm1244_vm0, %v12053_v58, %v1254_v39  ;;  %vm10362_vm14 = vmand %vm2959_vm9, %vm3189_vm6  ;;  %v1142_v26 = vadd.f32 %v1141_v42, %v1113_v36  ;;  %v10366_v4 = vpop.f32.mrf.mxu0  ;;  %v1116_v41 = vpop.f32.mrf.mxu1  ;;  %v10370_v55 = vpack.c.bf16 %v1236_v5, %v1237_v33  ;;  %v12056_v46 = vld [vmem:[#allocation75_spill] sm:$0xff]  ;;  %v12067_v34 = vld [vmem:[#allocation80_spill] sm:$0xff] }
 0x179   : > { %v1200_v38 = vmax.f32 %v1193_v52, 0.0  ;;  %2196 = vmatpush.bf16.msra.mxu3 %v12056_v46  ;;  %2148 = vmatpush.bf16.msra.mxu1 %v12057_v13  ;;  %v1257_v58 = vsel %vm1244_vm0, %v1254_v39, %v1256_v60  ;;  %v12058_v52 = vrot.slane %v10125_v53, 3  ;;  %v12059_v42 = vrot.slane %v10215_v49, 3  ;;  %vm3191_vm9 = vmor %vm10362_vm14, %vm10352_vm12 }
 0x17a   : > { %2173 = vmatpush.bf16.msra.mxu2 %v12060_v48  ;;  %v1170_v53 = vadd.f32 %v1169_v28, %v1142_v26  ;;  %v3238_v49 = vrot.slane %v10240_v30, 7  ;;  %vm10390_vm1 = vmand %vm12062_vm2, %vm3192_vm11  ;;  %vm12071_vm7 = vcmask 1040384   ;;  %vm12082_vm12 = vcmask 1043456  }
 0x17b   : > { %v1274_v2 = vsel %vm1244_vm0, %v12058_v52, %v1273_v45  ;;  %v1276_v36 = vsel %vm1244_vm0, %v1273_v45, %v12059_v42  ;;  %v2984_v27 = vrot.slane %v1200_v38, 1  ;;  %v2986_v5 = vrot.slane %v1200_v38, 2  ;;  %v12065_v52 = vld [vmem:[#allocation79_spill] sm:$0xff]  ;;  %vm10411_vm6 = vmor %vm10390_vm1, %vm3191_vm9 }
 0x17c   : > { %2125 = vmatpush.bf16.msra.mxu0 %v12061_v54  ;;  %v2988_v33 = vrot.slane %v1200_v38, 3  ;;  %v2990_v46 = vrot.slane %v1200_v38, 4  ;;  %v2992_v13 = vrot.slane %v1200_v38, 5  ;;  %v2994_v61 = vrot.slane %v1200_v38, 6  ;;  %vm10419_vm11 = vmand %vm2967_vm8, %vm3195_vm15 }
 0x17d   : > { %v2996_v32 = vrot.slane %v1200_v38, 7  ;;  %v3043_v39 = vpack.c.bf16 %v2984_v27, %v1200_v38  ;;  %1923 = vmatmul.bf16.gmra.mxu0 %v10368_v31  ;;  %v10395_v45 = vpack.c.bf16 %v1257_v58, %v1255_v7  ;;  %2197 = vmatpush.bf16.msra.mxu3 %v12065_v52  ;;  %v1187_v28 = vmax.f32 %v1055_v12, %v1170_v53  ;;  %v12066_v38 = vld [vmem:[#allocation81_spill] sm:$0xff]  ;;  %v12074_v53 = vld [vmem:[#allocation84_spill] sm:$0xff]  ;;  %vm12077_vm8 = vmmov %vm12062_vm2 }
 0x17e   : > { %v3044_v60 = vpack.c.bf16 %v2988_v33, %v2986_v5  ;;  %v3045_v42 = vpack.c.bf16 %v2992_v13, %v2990_v46  ;;  %1947 = vmatmul.bf16.gmra.mxu1 %v10370_v55  ;;  %2174 = vmatpush.bf16.msra.mxu2 %v12066_v38  ;;  %v10400_v33 = vpack.c.bf16 %v1276_v36, %v1274_v2  ;;  %vm10456_vm14 = vmor %vm10419_vm11, %vm10411_vm6 }
 0x17f   : > { %v3046_v54 = vpack.c.bf16 %v2996_v32, %v2994_v61  ;;  %v3075_v26 = vrot.slane %v3043_v39, 3  ;;  %2149 = vmatpush.bf16.msra.mxu1 %v12067_v34  ;;  %v1144_v61 = vpop.f32.mrf.mxu2  ;;  %v1172_v2 = vpop.f32.mrf.mxu3  ;;  %v1194_v21 = vadd.f32 %v9712_v17, %v1187_v28  ;;  %v12078_v17 = vrot.slane %v10240_v30, 4  ;;  %vm12088_vm9 = vmmov %vm12071_vm7 }
 0x180   : > { %v3076_v27 = vrot.slane %v3044_v60, 6  ;;  %v3077_v5 = vrot.slane %v3044_v60, 1  ;;  %2126 = vmatpush.bf16.msra.mxu0 %v12068_v22  ;;  %v3078_v7 = vrot.slane %v3045_v42, 4  ;;  %v3079_v58 = vrot.slane %v3045_v42, 7  ;;  %v10424_v36 = vpop.f32.mrf.mxu0  ;;  %v1118_v13 = vpop.f32.mrf.mxu1  ;;  %vm12090_vm1 = vmmov %vm12082_vm12 }
 0x181   : > { %v3080_v52 = vrot.slane %v3046_v54, 2  ;;  %v3081_v46 = vrot.slane %v3046_v54, 5  ;;  %v3105_v34 = vsel %vm12071_vm7, %v3043_v39, %v3075_v26  ;;  %v1145_v15 = vadd.f32 %v1144_v61, %v1116_v41  ;;  %2198 = vmatpush.bf16.msra.mxu3 %v12074_v53  ;;  %v12080_v61 = vld [vmem:[#allocation85_spill] sm:$0xff]  ;;  %vm12093_vm15 = vmmov %vm12071_vm7 }
 0x182   : > { %v3108_v22 = vsel %vm2874_vm3, %v3076_v27, %v3077_v5  ;;  %v12075_v60 = vrot.slane %v10240_v30, 2  ;;  %v12076_v39 = vrot.slane %v10240_v30, 3  ;;  %v3112_v54 = vsel %vm2880_vm4, %v3078_v7, %v3079_v58  ;;  %2175 = vmatpush.bf16.msra.mxu2 %v9773_v25  ;;  %1995 = vmatmul.bf16.gmra.mxu3 %v10400_v33  ;;  %vm12095_vm6 = vmmov %vm12062_vm2 }
 0x183   : > { %v3109_v42 = vsel %vm2878_vm5, %v3105_v34, %v3108_v22  ;;  %v3115_v38 = vsel %vm12077_vm8, %v3080_v52, %v3081_v46  ;;  %v12079_v41 = vrot.slane %v10240_v30, 5  ;;  %v1201_v27 = vmax.f32 %v1194_v21, 0.0  ;;  %1971 = vmatmul.bf16.gmra.mxu2 %v10395_v45  ;;  %2150 = vmatpush.bf16.msra.mxu1 %v12080_v61  ;;  %vm12096_vm11 = vmmov %vm12090_vm1 }
 0x184   : > { %v10431_v48 = vpack.c.bf16 %v12076_v39, %v12075_v60  ;;  %v3116_v26 = vsel %vm2888_vm10, %v3112_v54, %v3115_v38  ;;  %v1173_v5 = vadd.f32 %v1172_v2, %v1145_v15  ;;  %v12081_v7 = vrot.slane %v10240_v30, 6  ;;  %2127 = vmatpush.bf16.msra.mxu0 %v9775_v35  ;;  %v12087_v39 = vld [vmem:[#allocation86_spill] sm:$0xff]  ;;  %vm12102_vm8 = vmmov %vm12071_vm7 }
 0x185   : > { %v10441_v28 = vpack.c.bf16 %v12079_v41, %v12078_v17  ;;  %v3307_v25 = vrot.slane %v10343_v6, 3  ;;  %v3117_v52 = vsel %vm12082_vm12, %v3109_v42, %v3116_v26  ;;  %v12083_v46 = vmov 0  ;;  %2199 = vmatpush.bf16.msra.mxu3 %v9782_v50  ;;  %vm12105_vm12 = vmmov %vm12062_vm2 }
 0x186   : > { %v10448_v58 = vpack.c.bf16 %v3238_v49, %v12081_v7  ;;  %v12084_v46 = vsel %vm10456_vm14, 4294967295, %v12083_v46  ;;  %v1058_v2 = vadd.f32 %v10366_v4, %v9787_v44  ;;  %v3163_v30 = vshll.u32 %v3117_v52, 16 }
 0x187   : > { %12085 = vst [vmem:[#allocation50_spill] sm:$0xff] %v12084_v46  ;;  %v2999_v49 = vrot.slane %v1201_v27, 1  ;;  %v3001_v34 = vrot.slane %v1201_v27, 2  ;;  %v3003_v22 = vrot.slane %v1201_v27, 3  ;;  %v3005_v32 = vrot.slane %v1201_v27, 4  ;;  %2151 = vmatpush.bf16.msra.mxu1 %v12087_v39  ;;  %v1146_v17 = vpop.f32.mrf.mxu2  ;;  %v1174_v41 = vpop.f32.mrf.mxu3 }
 0x188   : > { %v3007_v21 = vrot.slane %v1201_v27, 5  ;;  %v3009_v12 = vrot.slane %v1201_v27, 6  ;;  %v3011_v15 = vrot.slane %v1201_v27, 7  ;;  %v12086_v53 = vsel %vm10189_vm13, %v9934_v9, %v10231_v3  ;;  %v10475_v3 = vld [vmem:[#allocation7] ss:$0 sm:$0xff]  ;;  %v1062_v7 = vpop.f32.mrf.mxu0 }
 0x189   : > { %v3199_v44 = vsel %vm10456_vm14, %v3163_v30, %v12086_v53  ;;  %v3047_v4 = vpack.c.bf16 %v2999_v49, %v1201_v27  ;;  %v3048_v35 = vpack.c.bf16 %v3003_v22, %v3001_v34  ;;  %v1188_v60 = vmax.f32 %v1058_v2, %v1173_v5  ;;  %v1121_v5 = vpop.f32.mrf.mxu1 }
 0x18a   : > { %v3308_v42 = vrot.slane %v10431_v48, 6  ;;  %v3309_v50 = vrot.slane %v10431_v48, 1  ;;  %3200 = vst [vmem:[#allocation2] sm:$0xff] %v3199_v44  ;;  %v3049_v54 = vpack.c.bf16 %v3007_v21, %v3005_v32  ;;  %v3050_v38 = vpack.c.bf16 %v3011_v15, %v3009_v12 }
 0x18b   : > { %v3082_v26 = vrot.slane %v3047_v4, 3  ;;  %v3083_v61 = vrot.slane %v3048_v35, 6  ;;  %v3084_v9 = vrot.slane %v3048_v35, 1  ;;  %v1195_v27 = vadd.f32 %v10475_v3, %v1188_v60 }
 0x18c   : > { %v3085_v52 = vrot.slane %v3049_v54, 4  ;;  %v3086_v2 = vrot.slane %v3049_v54, 7  ;;  %v3087_v30 = vrot.slane %v3050_v38, 2  ;;  %v3088_v49 = vrot.slane %v3050_v38, 5  ;;  %v12089_v38 = vld [vmem:[#allocation23_spill] sm:$0xff] }
 0x18d   : > { %v3120_v22 = vsel %vm12088_vm9, %v3047_v4, %v3082_v26  ;;  %v3123_v32 = vsel %vm2874_vm3, %v3083_v61, %v3084_v9  ;;  %v1202_v21 = vmax.f32 %v1195_v27, 0.0  ;;  %v1147_v44 = vadd.f32 %v1146_v17, %v1118_v13  ;;  %2032 = vmatmul.bf16.vlgmr.msrb.gmra.mxu0 %v12089_v38  ;;  %v12091_v9 = vld [vmem:[#allocation24_spill] sm:$0xff]  ;;  %v10488_v27 = vld [vmem:[#allocation9 + $0x38] sm:$0xff]  ;;  %vm12108_vm9 = vmmov %vm12090_vm1 }
 0x18e   : > { %v3124_v12 = vsel %vm2878_vm5, %v3120_v22, %v3123_v32  ;;  %v3127_v15 = vsel %vm2880_vm4, %v3085_v52, %v3086_v2  ;;  %v3130_v53 = vsel %vm12062_vm2, %v3087_v30, %v3088_v49  ;;  %2056 = vmatmul.bf16.vlgmr.msrb.gmra.mxu1 %v12091_v9  ;;  %2326 = vmatpush.bf16.msrb.mxu0 %v10488_v27  ;;  %v10491_v30 = vld [vmem:[#allocation9 + $0x78] sm:$0xff]  ;;  %v12094_v9 = vld [vmem:[#allocation27_spill] sm:$0xff]  ;;  %vm12111_vm2 = vmmov %vm12071_vm7 }
 0x18f   : > { %v3131_v35 = vsel %vm2888_vm10, %v3127_v15, %v3130_v53  ;;  %v3014_v60 = vrot.slane %v1202_v21, 1  ;;  %v3016_v39 = vrot.slane %v1202_v21, 2  ;;  %v3018_v54 = vrot.slane %v1202_v21, 3  ;;  %2350 = vmatpush.bf16.msrb.mxu1 %v10491_v30  ;;  %v1149_v15 = vpop.f32.mrf.mxu2  ;;  %v1177_v53 = vpop.f32.mrf.mxu3 }
 0x190   : > { %v3132_v34 = vsel %vm12090_vm1, %v3124_v12, %v3131_v35  ;;  %v3020_v4 = vrot.slane %v1202_v21, 4  ;;  %v3022_v26 = vrot.slane %v1202_v21, 5  ;;  %v3024_v61 = vrot.slane %v1202_v21, 6  ;;  %vm12113_vm1 = vmmov %vm12095_vm6 }
 0x191   : > { %v3165_v52 = vshll.u32 %v3132_v34, 16  ;;  %v3026_v13 = vrot.slane %v1202_v21, 7  ;;  %v3051_v17 = vpack.c.bf16 %v3014_v60, %v1202_v21  ;;  %v3052_v2 = vpack.c.bf16 %v3018_v54, %v3016_v39  ;;  %v1064_v54 = vpop.f32.mrf.mxu0  ;;  %v10504_v38 = vpop.f32.mrf.mxu1 }
 0x192   : > { %v3053_v22 = vpack.c.bf16 %v3022_v26, %v3020_v4  ;;  %v1060_v32 = vadd.f32 %v10424_v36, %v9822_v23  ;;  %v1175_v12 = vadd.f32 %v1174_v41, %v1147_v44  ;;  %v12092_v34 = vsel %vm10189_vm13, %v10236_v29, %v10238_v62  ;;  %v10506_v44 = vld [vmem:[#allocation9 + $0x30] sm:$0xff]  ;;  %2104 = vmatmul.bf16.vlgmr.msrb.gmra.mxu3 %v9848_v37 }
 0x193   : > { %v3202_v21 = vsel %vm10456_vm14, %v3165_v52, %v12092_v34  ;;  %v3054_v35 = vpack.c.bf16 %v3026_v13, %v3024_v61  ;;  %v3089_v60 = vrot.slane %v3051_v17, 3  ;;  %v3090_v39 = vrot.slane %v3052_v2, 6  ;;  %2327 = vmatpush.bf16.msrb.mxu0 %v10506_v44  ;;  %2080 = vmatmul.bf16.vlgmr.msrb.gmra.mxu2 %v12094_v9  ;;  %v10511_v52 = vld [vmem:[#allocation9 + $0x70] sm:$0xff]  ;;  %v10522_v34 = vld [vmem:[#allocation9 + $0xb8] sm:$0xff] }
 0x194   : > { %3203 = vst [vmem:[#allocation2 + $0x8] sm:$0xff] %v3202_v21  ;;  %v3091_v4 = vrot.slane %v3052_v2, 1  ;;  %v3092_v23 = vrot.slane %v3053_v22, 4  ;;  %v3093_v36 = vrot.slane %v3053_v22, 7  ;;  %v1189_v41 = vmax.f32 %v1060_v32, %v1175_v12  ;;  %2351 = vmatpush.bf16.msrb.mxu1 %v10511_v52  ;;  %2374 = vmatpush.bf16.msrb.mxu2 %v10522_v34  ;;  %v10525_v21 = vld [vmem:[#allocation9 + $0xf8] sm:$0xff] }
 0x195   : > { %v3094_v26 = vrot.slane %v3054_v35, 2  ;;  %v3095_v29 = vrot.slane %v3054_v35, 5  ;;  %v3135_v62 = vsel %vm12093_vm15, %v3051_v17, %v3089_v60  ;;  %v1150_v61 = vadd.f32 %v1149_v15, %v1121_v5  ;;  %2398 = vmatpush.bf16.msrb.mxu3 %v10525_v21  ;;  %vm12116_vm15 = vmmov %vm12108_vm9 }
 0x196   : > { %v3138_v13 = vsel %vm2874_vm3, %v3090_v39, %v3091_v4  ;;  %v3142_v2 = vsel %vm2880_vm4, %v3092_v23, %v3093_v36  ;;  %v1196_v22 = vadd.f32 %v10475_v3, %v1189_v41  ;;  %v1063_v32 = vadd.f32 %v1062_v7, %v9893_v51 }
 0x197   : > { %v3139_v17 = vsel %vm2878_vm5, %v3135_v62, %v3138_v13  ;;  %v3145_v5 = vsel %vm12095_vm6, %v3094_v26, %v3095_v29  ;;  %v1178_v15 = vadd.f32 %v1177_v53, %v1150_v61  ;;  %v10533_v37 = vsel %vm12071_vm7, %v10343_v6, %v3307_v25  ;;  %v10536_v53 = vld [vmem:[#allocation9 + $0x28] sm:$0xff]  ;;  %v1151_v29 = vpop.f32.mrf.mxu2  ;;  %v10553_v62 = vpop.f32.mrf.mxu3  ;;  %vm12121_vm6 = vmmov %vm12113_vm1 }
 0x198   : > { %v3146_v51 = vsel %vm2888_vm10, %v3142_v2, %v3145_v5  ;;  %v1203_v7 = vmax.f32 %v1196_v22, 0.0  ;;  %2328 = vmatpush.bf16.msrb.mxu0 %v10536_v53  ;;  %v10544_v60 = vsel %vm2874_vm3, %v3308_v42, %v3309_v50  ;;  %v10548_v6 = vadd.f32 %v1064_v54, %v9981_v63  ;;  %v10550_v25 = vld [vmem:[#allocation9 + $0x68] sm:$0xff]  ;;  %v10555_v2 = vld [vmem:[#allocation9 + $0xb0] sm:$0xff]  ;;  %vm12122_vm7 = vmmov %vm12108_vm9 }
 0x199   : > { %v3147_v39 = vsel %vm12096_vm11, %v3139_v17, %v3146_v51  ;;  %v1190_v4 = vmax.f32 %v1063_v32, %v1178_v15  ;;  %2352 = vmatpush.bf16.msrb.mxu1 %v10550_v25  ;;  %v1067_v61 = vpop.f32.mrf.mxu0  ;;  %v1126_v13 = vpop.f32.mrf.mxu1  ;;  %2375 = vmatpush.bf16.msrb.mxu2 %v10555_v2  ;;  %v10558_v63 = vld [vmem:[#allocation9 + $0xf0] sm:$0xff]  ;;  %v12097_v54 = vsel %vm10189_vm13, %v10251_v8, %v10253_v56  ;;  %v10569_v15 = vld [vmem:[#allocation9 + $0x20] sm:$0xff]  ;;  %vm12124_vm11 = vmmov %vm12122_vm7 }
 0x19a   : > { %v3167_v23 = vshll.u32 %v3147_v39, 16  ;;  %v3029_v36 = vrot.slane %v1203_v7, 1  ;;  %v3031_v41 = vrot.slane %v1203_v7, 2  ;;  %v3033_v26 = vrot.slane %v1203_v7, 3  ;;  %2399 = vmatpush.bf16.msrb.mxu3 %v10558_v63 }
 0x19b   : > { %v3035_v48 = vrot.slane %v1203_v7, 4  ;;  %v3037_v42 = vrot.slane %v1203_v7, 5  ;;  %v3039_v50 = vrot.slane %v1203_v7, 6  ;;  %v3041_v9 = vrot.slane %v1203_v7, 7 }
 0x19c   : > { %v3205_v22 = vsel %vm10456_vm14, %v3167_v23, %v12097_v54  ;;  %v3055_v32 = vpack.c.bf16 %v3029_v36, %v1203_v7  ;;  %v3056_v17 = vpack.c.bf16 %v3033_v26, %v3031_v41  ;;  %v1197_v5 = vadd.f32 %v10475_v3, %v1190_v4  ;;  %2329 = vmatpush.bf16.msrb.mxu0 %v10569_v15  ;;  %v10576_v7 = vld [vmem:[#allocation9 + $0x60] sm:$0xff]  ;;  %v12100_v54 = vld [vmem:[#allocation25_spill] sm:$0xff] }
 0x19d   : > { %3206 = vst [vmem:[#allocation2 + $0x10] sm:$0xff] %v3205_v22  ;;  %v3057_v51 = vpack.c.bf16 %v3037_v42, %v3035_v48  ;;  %v3058_v39 = vpack.c.bf16 %v3041_v9, %v3039_v50  ;;  %v1152_v12 = vadd.f32 %v1151_v29, %v10504_v38  ;;  %v10574_v35 = vadd.f32 %v1067_v61, %v10070_v0  ;;  %v10580_v48 = vld [vmem:[#allocation9 + $0xa8] sm:$0xff]  ;;  %v12103_v50 = vld [vmem:[#allocation26_spill] sm:$0xff] }
 0x19e   : > { %v3096_v8 = vrot.slane %v3055_v32, 3  ;;  %v3097_v56 = vrot.slane %v3056_v17, 6  ;;  %v3098_v49 = vrot.slane %v3056_v17, 1  ;;  %v1204_v23 = vmax.f32 %v1197_v5, 0.0  ;;  %12099 = vst [vmem:[#allocation52_spill] sm:$0xff] %v10576_v7  ;;  %2353 = vmatpush.bf16.msrb.mxu1 %v10576_v7  ;;  %2037 = vmatmul.bf16.gmra.mxu0 %v12100_v54  ;;  %v10586_v9 = vld [vmem:[#allocation9 + $0xe8] sm:$0xff] }
 0x19f   : > { %12098 = vst [vmem:[#allocation51_spill] sm:$0xff] %v10574_v35  ;;  %v3099_v4 = vrot.slane %v3057_v51, 4  ;;  %v3100_v36 = vrot.slane %v3057_v51, 7  ;;  %v3101_v41 = vrot.slane %v3058_v39, 2  ;;  %v3102_v26 = vrot.slane %v3058_v39, 5  ;;  %2376 = vmatpush.bf16.msrb.mxu2 %v10580_v48  ;;  %2061 = vmatmul.bf16.gmra.mxu1 %v12103_v50  ;;  %v10592_v51 = vld [vmem:[#allocation9 + $0x18] sm:$0xff]  ;;  %v1182_v54 = vpop.f32.mrf.mxu3 }
 0x1a0   : > { %12101 = vst [vmem:[#allocation55_spill] sm:$0xff] %v10580_v48  ;;  %v3150_v0 = vsel %vm12102_vm8, %v3055_v32, %v3096_v8  ;;  %v3153_v38 = vsel %vm2874_vm3, %v3097_v56, %v3098_v49  ;;  %v3406_v29 = vrot.slane %v1204_v23, 1  ;;  %v3408_v42 = vrot.slane %v1204_v23, 2  ;;  %2400 = vmatpush.bf16.msrb.mxu3 %v10586_v9  ;;  %2330 = vmatpush.bf16.msrb.mxu0 %v10592_v51  ;;  %v1154_v56 = vpop.f32.mrf.mxu2  ;;  %v10596_v50 = vld [vmem:[#allocation9 + $0x58] sm:$0xff]  ;;  %v10604_v7 = vld [vmem:[#allocation9 + $0xe0] sm:$0xff]  ;;  %vm12125_vm8 = vmmov %vm12111_vm2 }
 0x1a1   : > { %12104 = vst [vmem:[#allocation53_spill] sm:$0xff] %v10586_v9  ;;  %v3154_v61 = vsel %vm2878_vm5, %v3150_v0, %v3153_v38  ;;  %v3157_v22 = vsel %vm2880_vm4, %v3099_v4, %v3100_v36  ;;  %v3160_v17 = vsel %vm12105_vm12, %v3101_v41, %v3102_v26  ;;  %v3410_v5 = vrot.slane %v1204_v23, 3  ;;  %v1069_v0 = vpop.f32.mrf.mxu0  ;;  %v1128_v38 = vpop.f32.mrf.mxu1  ;;  %v10600_v9 = vld [vmem:[#allocation9 + $0xa0] sm:$0xff]  ;;  %vm12126_vm12 = vmmov %vm12113_vm1  ;;  %v12142_v35 = vld [vmem:[#allocation47_spill] sm:$0xff] }
 0x1a2   : > { %12106 = vst [vmem:[#allocation54_spill] sm:$0xff] %v10592_v51  ;;  %v3161_v49 = vsel %vm2888_vm10, %v3157_v22, %v3160_v17  ;;  %v3412_v32 = vrot.slane %v1204_v23, 4  ;;  %v3414_v39 = vrot.slane %v1204_v23, 5  ;;  %v3416_v8 = vrot.slane %v1204_v23, 6  ;;  %2354 = vmatpush.bf16.msrb.mxu1 %v10596_v50  ;;  %2109 = vmatmul.bf16.gmra.mxu3 %v10169_v10  ;;  %v10633_v0 = vld [vmem:[#allocation9 + $0xd8] sm:$0xff] }
 0x1a3   : > { %12107 = vst [vmem:[#allocation56_spill] sm:$0xff] %v10596_v50  ;;  %v3162_v4 = vsel %vm12108_vm9, %v3154_v61, %v3161_v49  ;;  %v3418_v36 = vrot.slane %v1204_v23, 7  ;;  %v3463_v41 = vpack.c.bf16 %v3406_v29, %v1204_v23  ;;  %v3464_v26 = vpack.c.bf16 %v3410_v5, %v3408_v42  ;;  %2377 = vmatpush.bf16.msrb.mxu2 %v10600_v9  ;;  %v12109_v29 = vld [vmem:[#allocation30_spill] sm:$0xff]  ;;  %v10608_v42 = vld [vmem:[#allocation9 + $0x10] sm:$0xff]  ;;  %vm12127_vm9 = vmmov %vm12122_vm7 }
 0x1a4   : > { %v3169_v22 = vshll.u32 %v3162_v4, 16  ;;  %v3465_v17 = vpack.c.bf16 %v3414_v39, %v3412_v32  ;;  %v1180_v51 = vadd.f32 %v10553_v62, %v1152_v12  ;;  %v1155_v48 = vadd.f32 %v1154_v56, %v1126_v13  ;;  %2401 = vmatpush.bf16.msrb.mxu3 %v10604_v7  ;;  %2085 = vmatmul.bf16.gmra.mxu2 %v12109_v29  ;;  %v3393_v5 = vld [vmem:[#allocation2 + $0x20] sm:$0xff]  ;;  %v10654_v29 = vld [vmem:[#allocation9 + $0x48] sm:$0xff] }
 0x1a5   : > { %v3466_v50 = vpack.c.bf16 %v3418_v36, %v3416_v8  ;;  %v3495_v61 = vrot.slane %v3463_v41, 3  ;;  %v3496_v49 = vrot.slane %v3464_v26, 6  ;;  %v3497_v23 = vrot.slane %v3464_v26, 1  ;;  %2331 = vmatpush.bf16.msrb.mxu0 %v10608_v42  ;;  %v10620_v8 = vld [vmem:[#allocation9 + $0x50] sm:$0xff] }
 0x1a6   : > { %v12110_v12 = vsel %vm10189_vm13, %v10257_v1, %v10259_v18  ;;  %v3498_v13 = vrot.slane %v3465_v17, 4  ;;  %v3499_v32 = vrot.slane %v3465_v17, 7  ;;  %v1191_v39 = vmax.f32 %v10548_v6, %v1180_v51  ;;  %2355 = vmatpush.bf16.msrb.mxu1 %v10620_v8  ;;  %v10625_v18 = vld [vmem:[#allocation9 + $0x98] sm:$0xff] }
 0x1a7   : > { %v3208_v62 = vsel %vm10456_vm14, %v3169_v22, %v12110_v12  ;;  %v3500_v56 = vrot.slane %v3466_v50, 2  ;;  %v3501_v4 = vrot.slane %v3466_v50, 5  ;;  %v3525_v36 = vsel %vm12111_vm2, %v3463_v41, %v3495_v61  ;;  %2378 = vmatpush.bf16.msrb.mxu2 %v10625_v18  ;;  %vm12128_vm2 = vmmov %vm12122_vm7 }
 0x1a8   : > { %3209 = vst [vmem:[#allocation2 + $0x18] sm:$0xff] %v3208_v62  ;;  %v3528_v1 = vsel %vm2874_vm3, %v3496_v49, %v3497_v23  ;;  %v3532_v6 = vsel %vm2880_vm4, %v3498_v13, %v3499_v32  ;;  %v1198_v10 = vadd.f32 %v10475_v3, %v1191_v39  ;;  %v10631_v51 = vadd.f32 %v1182_v54, %v1155_v48  ;;  %v10647_v3 = vld [vmem:[#allocation9 + $0x8] sm:$0xff]  ;;  %v1184_v49 = vpop.f32.mrf.mxu3 }
 0x1a9   : > { %v3529_v26 = vsel %vm2878_vm5, %v3525_v36, %v3528_v1  ;;  %2402 = vmatpush.bf16.msrb.mxu3 %v10633_v0  ;;  %v3394_v50 = vsel %vm10189_vm13, %v10312_v47, %v3393_v5  ;;  %v3535_v41 = vsel %vm12113_vm1, %v3500_v56, %v3501_v4  ;;  %v12114_v38 = vrot.slane %v9144_v20, 4  ;;  %2332 = vmatpush.bf16.msrb.mxu0 %v10647_v3  ;;  %v1156_v47 = vpop.f32.mrf.mxu2  ;;  %v1818_v4 = vpop.f32.mrf.mxu0  ;;  %v10671_v1 = vld [vmem:[#allocation9 + $0x90] sm:$0xff]  ;;  %vm12134_vm1 = vmmov %vm12128_vm2 }
 0x1aa   : > { %12112 = vst [vmem:[#allocation57_spill] sm:$0xff] %v10631_v51  ;;  %v12115_v22 = vrot.slane %v9139_v19, 4  ;;  %v3536_v48 = vsel %vm2888_vm10, %v3532_v6, %v3535_v41  ;;  %v1205_v54 = vmax.f32 %v1198_v10, 0.0  ;;  %v11832_v23 = vrot.slane %v9992_v40, 4  ;;  %2356 = vmatpush.bf16.msrb.mxu1 %v10654_v29  ;;  %v1842_v36 = vpop.f32.mrf.mxu1  ;;  %v10674_v10 = vld [vmem:[#allocation9 + $0xd0] sm:$0xff]  ;;  %v10677_v47 = vld [vmem:[#allocation9] sm:$0xff] }
 0x1ab   : > { %v3349_v19 = vsel %vm2878_vm5, %v10533_v37, %v10544_v60  ;;  %v12117_v5 = vrot.slane %v10441_v28, 7  ;;  %v12118_v12 = vrot.slane %v10441_v28, 4  ;;  %v12119_v13 = vrot.slane %v10448_v58, 5  ;;  %2379 = vmatpush.bf16.msrb.mxu2 %v10671_v1  ;;  %v10798_v51 = vld [vmem:[#allocation9 + $0x110] sm:$0xff] }
 0x1ac   : > { %v10645_v17 = vsel %vm12116_vm15, %v12115_v22, %v12114_v38  ;;  %v12120_v32 = vrot.slane %v10448_v58, 2  ;;  %v3537_v56 = vsel %vm12122_vm7, %v3529_v26, %v3536_v48  ;;  %v3421_v60 = vrot.slane %v1205_v54, 1  ;;  %vm12135_vm15 = vmmov %vm12134_vm1  ;;  %12141 = vst [vmem:[#allocation64_spill] sm:$0xff] %v10798_v51 }
 0x1ad   : > { %v3352_v62 = vsel %vm2880_vm4, %v12118_v12, %v12117_v5  ;;  %v3583_v37 = vshll.u32 %v3537_v56, 16  ;;  %v3423_v6 = vrot.slane %v1205_v54, 2  ;;  %v3425_v28 = vrot.slane %v1205_v54, 3  ;;  %2403 = vmatpush.bf16.msrb.mxu3 %v10674_v10  ;;  %2333 = vmatpush.bf16.msrb.mxu0 %v10677_v47  ;;  %vm12156_vm7 = vmmov %vm12134_vm1 }
 0x1ae   : > { %v3355_v39 = vsel %vm12121_vm6, %v12120_v32, %v12119_v13  ;;  %v3427_v41 = vrot.slane %v1205_v54, 4  ;;  %v3429_v58 = vrot.slane %v1205_v54, 5  ;;  %v3431_v38 = vrot.slane %v1205_v54, 6  ;;  %v10689_v13 = vld [vmem:[#allocation9 + $0x40] sm:$0xff]  ;;  %2042 = vmatmul.bf16.gmra.mxu0 %v9297_v59  ;;  %vm12155_vm6 = vmmov %vm12134_vm1 }
 0x1af   : > { %v3433_v22 = vrot.slane %v1205_v54, 7  ;;  %v3596_v26 = vsel %vm10456_vm14, %v3583_v37, %v3394_v50  ;;  %v3467_v48 = vpack.c.bf16 %v3421_v60, %v1205_v54  ;;  %v3468_v49 = vpack.c.bf16 %v3425_v28, %v3423_v6  ;;  %2357 = vmatpush.bf16.msrb.mxu1 %v10689_v13  ;;  %v10693_v50 = vld [vmem:[#allocation9 + $0x88] sm:$0xff] }
 0x1b0   : > { %v12123_v5 = vrot.slane %v9144_v20, 4  ;;  %3597 = vst [vmem:[#allocation2 + $0x20] sm:$0xff] %v3596_v26  ;;  %v3469_v32 = vpack.c.bf16 %v3429_v58, %v3427_v41  ;;  %v1843_v61 = vadd.f32 %v1842_v36, %v1818_v4  ;;  %2380 = vmatpush.bf16.msrb.mxu2 %v10693_v50  ;;  %v3356_v54 = vsel %vm2888_vm10, %v3352_v62, %v3355_v39  ;;  %v10698_v6 = vld [vmem:[#allocation9 + $0xc8] sm:$0xff] }
 0x1b1   : > { %v3470_v56 = vpack.c.bf16 %v3433_v22, %v3431_v38  ;;  %v3502_v20 = vrot.slane %v3467_v48, 3  ;;  %v3503_v37 = vrot.slane %v3468_v49, 6  ;;  %v3504_v60 = vrot.slane %v3468_v49, 1  ;;  %2066 = vmatmul.bf16.gmra.mxu1 %v9219_v43  ;;  %2404 = vmatpush.bf16.msrb.mxu3 %v10698_v6  ;;  %v1866_v38 = vpop.f32.mrf.mxu2  ;;  %v1890_v22 = vpop.f32.mrf.mxu3 }
 0x1b2   : > { %v10687_v12 = vsel %vm12124_vm11, %v12123_v5, %v11832_v23  ;;  %v3505_v28 = vrot.slane %v3469_v32, 4  ;;  %v3506_v41 = vrot.slane %v3469_v32, 7  ;;  %v1867_v49 = vadd.f32 %v1866_v38, %v1843_v61  ;;  %v1820_v5 = vpop.f32.mrf.mxu0  ;;  %v1844_v32 = vpop.f32.mrf.mxu1  ;;  %v10708_v23 = vld [vmem:[#allocation9 + $0x80] sm:$0xff]  ;;  %2114 = vmatmul.bf16.gmra.mxu3 %v10368_v31  ;;  %v10732_v31 = vld [vmem:[#allocation9 + $0x178] sm:$0xff] }
 0x1b3   : > { %v3507_v4 = vrot.slane %v3470_v56, 2  ;;  %v3508_v36 = vrot.slane %v3470_v56, 5  ;;  %v3540_v59 = vsel %vm12125_vm8, %v3467_v48, %v3502_v20  ;;  %v3543_v58 = vsel %vm2874_vm3, %v3503_v37, %v3504_v60  ;;  %v3396_v56 = vld [vmem:[#allocation2 + $0x28] sm:$0xff] }
 0x1b4   : > { %v2021_v62 = vpack.c.bf16 %v10687_v12, %v10645_v17  ;;  %v3544_v39 = vsel %vm2878_vm5, %v3540_v59, %v3543_v58  ;;  %v3547_v43 = vsel %vm2880_vm4, %v3505_v28, %v3506_v41  ;;  %2381 = vmatpush.bf16.msrb.mxu2 %v10708_v23  ;;  %v3357_v48 = vsel %vm12127_vm9, %v3349_v19, %v3356_v54  ;;  %v10713_v17 = vld [vmem:[#allocation9 + $0xc0] sm:$0xff] }
 0x1b5   : > { %v3550_v26 = vsel %vm12126_vm12, %v3507_v4, %v3508_v36  ;;  %v1845_v37 = vadd.f32 %v1844_v32, %v1820_v5  ;;  %2405 = vmatpush.bf16.msrb.mxu3 %v10713_v17  ;;  %2090 = vmatmul.bf16.gmra.mxu2 %v9385_v16  ;;  %v10718_v61 = vadd.f32 %v1890_v22, %v1867_v49  ;;  %v10729_v16 = vld [vmem:[#allocation9 + $0x138] sm:$0xff]  ;;  %v10735_v32 = vld [vmem:[#allocation9 + $0x130] sm:$0xff]  ;;  %vm12171_vm11 = vcmask 1045504  }
 0x1b6   : > { %v3551_v20 = vsel %vm2888_vm10, %v3547_v43, %v3550_v26  ;;  %v3397_v19 = vsel %vm10189_vm13, %v3357_v48, %v3396_v56  ;;  %v10744_v48 = vld [vmem:[#allocation9 + $0x1b8] sm:$0xff]  ;;  %vm12172_vm8 = vmmov %vm12171_vm11 }
 0x1b7   : > { %v3552_v12 = vsel %vm12128_vm2, %v3544_v39, %v3551_v20  ;;  %v10747_v56 = vld [vmem:[#allocation9 + $0x1f8] sm:$0xff]  ;;  %v10750_v20 = vld [vmem:[#allocation9 + $0x128] sm:$0xff]  ;;  %vm12173_vm12 = vmmov %vm12172_vm8 }
 0x1b8   : > { %v3585_v60 = vshll.u32 %v3552_v12, 16  ;;  %vm12175_vm9 = vmmov %vm12172_vm8 }
 0x1b9   : > { %v1868_v28 = vpop.f32.mrf.mxu2  ;;  %v1892_v41 = vpop.f32.mrf.mxu3  ;;  %vm12185_vm2 = vmmov %vm12172_vm8 }
 0x1ba   : > { %v3599_v54 = vsel %vm10456_vm14, %v3585_v60, %v3397_v19  ;;  %v1869_v4 = vadd.f32 %v1868_v28, %v1845_v37  ;;  %v1823_v36 = vpop.f32.mrf.mxu0  ;;  %v1847_v59 = vpop.f32.mrf.mxu1  ;;  %v10756_v60 = vld [vmem:[#allocation9 + $0x1b0] sm:$0xff] }
 0x1bb   : > { %3600 = vst [vmem:[#allocation2 + $0x28] sm:$0xff] %v3599_v54  ;;  %v1848_v58 = vadd.f32 %v1847_v59, %v1823_v36  ;;  %v12129_v28 = vld [vmem:[#allocation40_spill] sm:$0xff] }
 0x1bc   : > { %v10725_v38 = vadd.f32 %v1892_v41, %v1869_v4  ;;  %v2007_v41 = vrot.slane %v12129_v28, 4  ;;  %v12130_v4 = vld [vmem:[#allocation41_spill] sm:$0xff]  ;;  %v10761_v59 = vld [vmem:[#allocation9 + $0x1f0] sm:$0xff] }
 0x1bd   : > { %v11833_v36 = vrot.slane %v12130_v4, 4  ;;  %v10789_v28 = vld [vmem:[#allocation9 + $0x158] sm:$0xff] }
 0x1be   : > { %2128 = vmatmul.bf16.vlgmr.msra.gmra.mxu0 %v9861_v57  ;;  %12138 = vst [vmem:[#allocation61_spill] sm:$0xff] %v10789_v28 }
 0x1bf   : > { %2422 = vmatpush.bf16.msra.mxu0 %v10729_v16 }
 0x1c1   : > { %2152 = vmatmul.bf16.vlgmr.msra.gmra.mxu1 %v10056_v14  ;;  %v1871_v22 = vpop.f32.mrf.mxu2  ;;  %v1895_v39 = vpop.f32.mrf.mxu3  ;;  %v10741_v14 = vld [vmem:[#allocation9 + $0x170] sm:$0xff] }
 0x1c2   : > { %2446 = vmatpush.bf16.msra.mxu1 %v10732_v31  ;;  %v1872_v43 = vadd.f32 %v1871_v22, %v1848_v58  ;;  %v1825_v26 = vpop.f32.mrf.mxu0  ;;  %v1849_v49 = vpop.f32.mrf.mxu1  ;;  %2200 = vmatmul.bf16.vlgmr.msra.gmra.mxu3 %v2021_v62  ;;  %v10764_v22 = vld [vmem:[#allocation9 + $0x120] sm:$0xff] }
 0x1c3   : > { %v1850_v5 = vadd.f32 %v1849_v49, %v1825_v26  ;;  %2423 = vmatpush.bf16.msra.mxu0 %v10735_v32  ;;  %2494 = vmatpush.bf16.msra.mxu3 %v10747_v56  ;;  %v10772_v26 = vld [vmem:[#allocation9 + $0x1a8] sm:$0xff]  ;;  %v12132_v49 = vld [vmem:[#allocation42_spill] sm:$0xff] }
 0x1c4   : > { %v10739_v57 = vadd.f32 %v1895_v39, %v1872_v43  ;;  %v10769_v43 = vld [vmem:[#allocation9 + $0x160] sm:$0xff] }
 0x1c5   : > { %2176 = vmatmul.bf16.vlgmr.msra.gmra.mxu2 %v10068_v11  ;;  %v10753_v11 = vld [vmem:[#allocation9 + $0x168] sm:$0xff]  ;;  %12131 = vst [vmem:[#allocation58_spill] sm:$0xff] %v10769_v43 }
 0x1c6   : > { %2447 = vmatpush.bf16.msra.mxu1 %v10741_v14  ;;  %2470 = vmatpush.bf16.msra.mxu2 %v10744_v48 }
 0x1c7   : > { %2424 = vmatpush.bf16.msra.mxu0 %v10750_v20  ;;  %2495 = vmatpush.bf16.msra.mxu3 %v10761_v59 }
 0x1c9   : > { %v1873_v37 = vpop.f32.mrf.mxu2  ;;  %v1897_v12 = vpop.f32.mrf.mxu3 }
 0x1ca   : > { %2448 = vmatpush.bf16.msra.mxu1 %v10753_v11  ;;  %2471 = vmatpush.bf16.msra.mxu2 %v10756_v60  ;;  %v1874_v62 = vadd.f32 %v1873_v37, %v1850_v5  ;;  %v1828_v19 = vpop.f32.mrf.mxu0  ;;  %v1852_v54 = vpop.f32.mrf.mxu1  ;;  %v12133_v5 = vrot.slane %v9992_v40, 4 }
 0x1cb   : > { %v1853_v58 = vadd.f32 %v1852_v54, %v1828_v19  ;;  %2425 = vmatpush.bf16.msra.mxu0 %v10764_v22  ;;  %v2010_v19 = vsel %vm12135_vm15, %v2007_v41, %v11833_v36  ;;  %v10786_v54 = vld [vmem:[#allocation9 + $0x118] sm:$0xff] }
 0x1cc   : > { %v10767_v39 = vadd.f32 %v1897_v12, %v1874_v62  ;;  %v2008_v37 = vsel %vm12134_vm1, %v12133_v5, %v2007_v41  ;;  %v10782_v12 = vld [vmem:[#allocation9 + $0x1e8] sm:$0xff]  ;;  %v12136_v62 = vld [vmem:[#allocation44_spill] sm:$0xff]  ;;  %12137 = vst [vmem:[#allocation60_spill] sm:$0xff] %v10786_v54  ;;  %v10792_v5 = vld [vmem:[#allocation9 + $0x1a0] sm:$0xff] }
 0x1cd   : > { %2496 = vmatpush.bf16.msra.mxu3 %v10782_v12  ;;  %v2022_v40 = vpack.c.bf16 %v2010_v19, %v2008_v37  ;;  %12139 = vst [vmem:[#allocation62_spill] sm:$0xff] %v10792_v5  ;;  %vm12186_vm1 = vmmov %vm12185_vm2 }
 0x1ce   : > { %2449 = vmatpush.bf16.msra.mxu1 %v10769_v43  ;;  %2472 = vmatpush.bf16.msra.mxu2 %v10772_v26  ;;  %vm12188_vm15 = vmmov %vm12186_vm1 }
 0x1cf   : > { %2133 = vmatmul.bf16.gmra.mxu0 %v12132_v49 }
 0x1d0   : > { %2426 = vmatpush.bf16.msra.mxu0 %v10786_v54 }
 0x1d1   : > { %2157 = vmatmul.bf16.gmra.mxu1 %v12136_v62  ;;  %v1876_v49 = vpop.f32.mrf.mxu2  ;;  %v1900_v36 = vpop.f32.mrf.mxu3  ;;  %2497 = vmatpush.bf16.msra.mxu3 %v10795_v24  ;;  %v10813_v24 = vld [vmem:[#allocation9 + $0x108] sm:$0xff] }
 0x1d2   : > { %2450 = vmatpush.bf16.msra.mxu1 %v10789_v28  ;;  %2473 = vmatpush.bf16.msra.mxu2 %v10792_v5  ;;  %v1877_v41 = vadd.f32 %v1876_v49, %v1853_v58  ;;  %v1830_v46 = vpop.f32.mrf.mxu0  ;;  %v1854_v62 = vpop.f32.mrf.mxu1  ;;  %v10804_v28 = vld [vmem:[#allocation9 + $0x150] sm:$0xff]  ;;  %v10807_v58 = vld [vmem:[#allocation9 + $0x198] sm:$0xff]  ;;  %12146 = vst [vmem:[#allocation68_spill] sm:$0xff] %v10813_v24 }
 0x1d3   : > { %v1855_v19 = vadd.f32 %v1854_v62, %v1830_v46  ;;  %12143 = vst [vmem:[#allocation65_spill] sm:$0xff] %v10804_v28  ;;  %2205 = vmatmul.bf16.gmra.mxu3 %v2022_v40  ;;  %v10810_v49 = vld [vmem:[#allocation9 + $0x1d8] sm:$0xff]  ;;  %v12148_v62 = vld [vmem:[#allocation48_spill] sm:$0xff] }
 0x1d4   : > { %2427 = vmatpush.bf16.msra.mxu0 %v10798_v51  ;;  %v10802_v37 = vadd.f32 %v1900_v36, %v1877_v41  ;;  %12144 = vst [vmem:[#allocation66_spill] sm:$0xff] %v10807_v58  ;;  %v10819_v36 = vld [vmem:[#allocation9 + $0x190] sm:$0xff] }
 0x1d5   : > { %2181 = vmatmul.bf16.gmra.mxu2 %v12142_v35  ;;  %12145 = vst [vmem:[#allocation67_spill] sm:$0xff] %v10810_v49  ;;  %2498 = vmatpush.bf16.msra.mxu3 %v10810_v49  ;;  %v10816_v35 = vld [vmem:[#allocation9 + $0x148] sm:$0xff]  ;;  %v10824_v49 = vld [vmem:[#allocation9 + $0x1d0] sm:$0xff] }
 0x1d6   : > { %2451 = vmatpush.bf16.msra.mxu1 %v10804_v28  ;;  %2474 = vmatpush.bf16.msra.mxu2 %v10807_v58  ;;  %12147 = vst [vmem:[#allocation69_spill] sm:$0xff] %v10816_v35  ;;  %v2011_v28 = vrot.slane %v12148_v62, 4  ;;  %v12149_v58 = vld [vmem:[#allocation49_spill] sm:$0xff] }
 0x1d7   : > { %v2013_v51 = vrot.slane %v12149_v58, 4  ;;  %12150 = vst [vmem:[#allocation72_spill] sm:$0xff] %v10824_v49  ;;  %v10836_v58 = vld [vmem:[#allocation9 + $0x188] sm:$0xff] }
 0x1d8   : > { %2428 = vmatpush.bf16.msra.mxu0 %v10813_v24  ;;  %12153 = vst [vmem:[#allocation73_spill] sm:$0xff] %v10836_v58 }
 0x1d9   : > { %v1878_v46 = vpop.f32.mrf.mxu2  ;;  %2499 = vmatpush.bf16.msra.mxu3 %v10824_v49  ;;  %v1902_v24 = vpop.f32.mrf.mxu3  ;;  %v2014_v62 = vsel %vm12156_vm7, %v2011_v28, %v2013_v51  ;;  %v12161_v49 = vld [vmem:[#allocation29_spill] sm:$0xff]  ;;  %vm12203_vm7 = vmmov %vm12186_vm1 }
 0x1da   : > { %2452 = vmatpush.bf16.msra.mxu1 %v10816_v35  ;;  %2475 = vmatpush.bf16.msra.mxu2 %v10819_v36  ;;  %v1879_v40 = vadd.f32 %v1878_v46, %v1855_v19  ;;  %v1914_v41 = vpop.f32.mrf.mxu0  ;;  %v1938_v43 = vpop.f32.mrf.mxu1  ;;  %v10828_v35 = vld [vmem:[#allocation9 + $0x100] sm:$0xff] }
 0x1db   : > { %v1915_v5 = vadd.f32 %v1914_v41, %v10718_v61  ;;  %12151 = vst [vmem:[#allocation70_spill] sm:$0xff] %v10828_v35  ;;  %v10833_v19 = vld [vmem:[#allocation9 + $0x140] sm:$0xff]  ;;  %v12154_v61 = vrot.slane %v12130_v4, 4 }
 0x1dc   : > { %2429 = vmatpush.bf16.msra.mxu0 %v10828_v35  ;;  %v10831_v54 = vadd.f32 %v1902_v24, %v1879_v40  ;;  %12152 = vst [vmem:[#allocation71_spill] sm:$0xff] %v10833_v19  ;;  %v10844_v35 = vld [vmem:[#allocation9 + $0x1c8] sm:$0xff]  ;;  %v10851_v40 = vld [vmem:[#allocation9 + $0x1c0] sm:$0xff] }
 0x1dd   : > { %v1939_v46 = vadd.f32 %v1938_v43, %v1915_v5  ;;  %v2012_v41 = vsel %vm12155_vm6, %v12154_v61, %v2011_v28  ;;  %12157 = vst [vmem:[#allocation74_spill] sm:$0xff] %v10844_v35  ;;  %2500 = vmatpush.bf16.msra.mxu3 %v10844_v35  ;;  %v10848_v43 = vld [vmem:[#allocation9 + $0x180] sm:$0xff]  ;;  %vm12189_vm6 = vmmov %vm12186_vm1 }
 0x1de   : > { %2453 = vmatpush.bf16.msra.mxu1 %v10833_v19  ;;  %2476 = vmatpush.bf16.msra.mxu2 %v10836_v58  ;;  %v2023_v24 = vpack.c.bf16 %v2014_v62, %v2012_v41  ;;  %12158 = vst [vmem:[#allocation82_spill] sm:$0xff] %v10848_v43  ;;  %v12160_v58 = vld [vmem:[#allocation28_spill] sm:$0xff] }
 0x1df   : > { %2138 = vmatmul.bf16.gmra.mxu0 %v10370_v55  ;;  %12159 = vst [vmem:[#allocation75_spill] sm:$0xff] %v10851_v40 }
 0x1e1   : > { %2162 = vmatmul.bf16.gmra.mxu1 %v10395_v45  ;;  %2501 = vmatpush.bf16.msra.mxu3 %v10851_v40 }
 0x1e2   : > { %2477 = vmatpush.bf16.msra.mxu2 %v10848_v43  ;;  %v1916_v5 = vpop.f32.mrf.mxu0  ;;  %v1940_v4 = vpop.f32.mrf.mxu1 }
 0x1e3   : > { %v1917_v55 = vadd.f32 %v1916_v5, %v10725_v38  ;;  %2210 = vmatmul.bf16.gmra.mxu3 %v2023_v24  ;;  %v1962_v28 = vpop.f32.mrf.mxu2  ;;  %v12162_v5 = vld [vmem:[#allocation35_spill] sm:$0xff] }
 0x1e4   : > { %v1963_v61 = vadd.f32 %v1962_v28, %v1939_v46  ;;  %v1986_v45 = vpop.f32.mrf.mxu3 }
 0x1e5   : > { %2186 = vmatmul.bf16.gmra.mxu2 %v10400_v33  ;;  %v1941_v51 = vadd.f32 %v1940_v4, %v1917_v55  ;;  %v8549_v55 = vld [vmem:[%s11728_s1 + $0x40] sm:$0xff] }
 0x1e6   : > { %v10856_v41 = vadd.f32 %v1986_v45, %v1963_v61  ;;  %v2258_v4 = vrot.slane %v8549_v55, 2  ;;  %v12166_v45 = vld [vmem:[#allocation31_spill] sm:$0xff] }
 0x1ea   : > { %v1919_v62 = vpop.f32.mrf.mxu0  ;;  %v1943_v19 = vpop.f32.mrf.mxu1 }
 0x1eb   : > { %v1920_v43 = vadd.f32 %v1919_v62, %v10739_v57  ;;  %v1964_v40 = vpop.f32.mrf.mxu2  ;;  %v12167_v62 = vld [vmem:[#allocation53_spill] sm:$0xff] }
 0x1ec   : > { %v1965_v33 = vadd.f32 %v1964_v40, %v1941_v51  ;;  %v1988_v38 = vpop.f32.mrf.mxu3  ;;  %v10903_v51 = vld [vmem:[%s11727_s0 + $0x48] sm:$0xff] }
 0x1ed   : > { %v1944_v35 = vadd.f32 %v1943_v19, %v1920_v43  ;;  %v2243_v28 = vrot.slane %v10903_v51, 2 }
 0x1ee   : > { %v10863_v46 = vadd.f32 %v1988_v38, %v1965_v33 }
 0x1ef   : > { %2334 = vmatmul.bf16.vlgmr.msrb.gmra.mxu0 %v12160_v58  ;;  %v12163_v58 = vld [vmem:[#allocation36_spill] sm:$0xff] }
 0x1f0   : > { %2540 = vmatpush.bf16.msrb.mxu0 %v10488_v27 }
 0x1f1   : > { %2358 = vmatmul.bf16.vlgmr.msrb.gmra.mxu1 %v12161_v49 }
 0x1f2   : > { %2564 = vmatpush.bf16.msrb.mxu1 %v10491_v30  ;;  %v1921_v24 = vpop.f32.mrf.mxu0  ;;  %v1945_v19 = vpop.f32.mrf.mxu1 }
 0x1f3   : > { %v1922_v57 = vadd.f32 %v1921_v24, %v10767_v39  ;;  %2406 = vmatmul.bf16.vlgmr.msrb.gmra.mxu3 %v12163_v58 }
 0x1f4   : > { %2541 = vmatpush.bf16.msrb.mxu0 %v10506_v44  ;;  %2612 = vmatpush.bf16.msrb.mxu3 %v10525_v21  ;;  %v12164_v21 = vld [vmem:[#allocation52_spill] sm:$0xff] }
 0x1f5   : > { %2382 = vmatmul.bf16.vlgmr.msrb.gmra.mxu2 %v12162_v5  ;;  %v1946_v27 = vadd.f32 %v1945_v19, %v1922_v57  ;;  %v1967_v30 = vpop.f32.mrf.mxu2  ;;  %v1991_v40 = vpop.f32.mrf.mxu3  ;;  %v10914_v57 = vld [vmem:[%s11728_s1 + $0x48] sm:$0xff] }
 0x1f6   : > { %2565 = vmatpush.bf16.msrb.mxu1 %v10511_v52  ;;  %2588 = vmatpush.bf16.msrb.mxu2 %v10522_v34  ;;  %v1968_v43 = vadd.f32 %v1967_v30, %v1944_v35 }
 0x1f8   : > { %2542 = vmatpush.bf16.msrb.mxu0 %v10536_v53  ;;  %v10875_v44 = vadd.f32 %v1991_v40, %v1968_v43  ;;  %2613 = vmatpush.bf16.msrb.mxu3 %v10558_v63  ;;  %v10884_v53 = vld [vmem:[%s11727_s0 + $0x38] sm:$0xff]  ;;  %v12169_v40 = vld [vmem:[#allocation54_spill] sm:$0xff] }
 0x1f9   : > { %v2274_v33 = vrot.slane %v10884_v53, 3  ;;  %v12168_v43 = vld [vmem:[#allocation32_spill] sm:$0xff] }
 0x1fa   : > { %2566 = vmatpush.bf16.msrb.mxu1 %v10550_v25  ;;  %2589 = vmatpush.bf16.msrb.mxu2 %v10555_v2  ;;  %v1924_v52 = vpop.f32.mrf.mxu0  ;;  %v2240_v25 = vrot.slane %v10884_v53, 2  ;;  %v10890_v2 = vld [vmem:[%s11727_s0 + $0x40] sm:$0xff] }
 0x1fb   : > { %v1925_v34 = vadd.f32 %v1924_v52, %v10802_v37  ;;  %v1948_v39 = vpop.f32.mrf.mxu1  ;;  %v2241_v63 = vrot.slane %v10890_v2, 2  ;;  %v8548_v37 = vld [vmem:[%s11728_s1 + $0x38] sm:$0xff]  ;;  %v2275_v38 = vrot.slane %v10890_v2, 3 }
 0x1fc   : > { %2543 = vmatpush.bf16.msrb.mxu0 %v10569_v15  ;;  %v12165_v15 = vld [vmem:[#allocation55_spill] sm:$0xff]  ;;  %v2257_v35 = vrot.slane %v8548_v37, 2  ;;  %2614 = vmatpush.bf16.msrb.mxu3 %v12167_v62  ;;  %v2293_v52 = vrot.slane %v8548_v37, 3 }
 0x1fd   : > { %v1949_v61 = vadd.f32 %v1948_v39, %v1925_v34  ;;  %v1969_v30 = vpop.f32.mrf.mxu2  ;;  %v2294_v34 = vrot.slane %v8549_v55, 3  ;;  %v2242_v24 = vsel %vm12171_vm11, %v2240_v25, %v2241_v63  ;;  %v2244_v19 = vsel %vm12172_vm8, %v2241_v63, %v2243_v28  ;;  %v12177_v63 = vld [vmem:[#allocation45_spill] sm:$0xff]  ;;  %vm12205_vm11 = vmmov %vm12186_vm1 }
 0x1fe   : > { %2567 = vmatpush.bf16.msrb.mxu1 %v12164_v21  ;;  %2590 = vmatpush.bf16.msrb.mxu2 %v12165_v15  ;;  %v1970_v39 = vadd.f32 %v1969_v30, %v1946_v27  ;;  %v1993_v21 = vpop.f32.mrf.mxu3  ;;  %v12170_v15 = vld [vmem:[#allocation56_spill] sm:$0xff]  ;;  %v10930_v37 = vpack.c.bf16 %v2244_v19, %v2242_v24  ;;  %v12174_v55 = vrot.slane %v10914_v57, 2  ;;  %vm12220_vm8 = vcmask 1046534  }
 0x1ff   : > { %2339 = vmatmul.bf16.gmra.mxu0 %v12166_v45  ;;  %v2296_v45 = vrot.slane %v10914_v57, 3  ;;  %v2295_v19 = vsel %vm1244_vm0, %v2293_v52, %v2294_v34 }
 0x200   : > { %2544 = vmatpush.bf16.msrb.mxu0 %v12169_v40  ;;  %v10922_v62 = vadd.f32 %v1993_v21, %v1970_v39  ;;  %v2259_v40 = vsel %vm12173_vm12, %v2257_v35, %v2258_v4  ;;  %2615 = vmatpush.bf16.msrb.mxu3 %v10604_v7  ;;  %v2261_v30 = vsel %vm12175_vm9, %v2258_v4, %v12174_v55  ;;  %v12176_v39 = vrot.slane %v10903_v51, 3  ;;  %v12178_v4 = vld [vmem:[#allocation46_spill] sm:$0xff] }
 0x201   : > { %2363 = vmatmul.bf16.gmra.mxu1 %v12168_v43  ;;  %v10942_v21 = vpack.c.bf16 %v2261_v30, %v2259_v40  ;;  %vm12221_vm12 = vcmask 1043456  }
 0x202   : > { %2568 = vmatpush.bf16.msrb.mxu1 %v12170_v15  ;;  %2591 = vmatpush.bf16.msrb.mxu2 %v10600_v9  ;;  %v1926_v27 = vpop.f32.mrf.mxu0  ;;  %v2276_v9 = vsel %vm1244_vm0, %v2274_v33, %v2275_v38  ;;  %v2278_v25 = vsel %vm1244_vm0, %v2275_v38, %v12176_v39  ;;  %v2297_v33 = vsel %vm1244_vm0, %v2294_v34, %v2296_v45 }
 0x203   : > { %v1927_v35 = vadd.f32 %v1926_v27, %v10831_v54  ;;  %v1950_v7 = vpop.f32.mrf.mxu1  ;;  %v10944_v24 = vpack.c.bf16 %v2278_v25, %v2276_v9  ;;  %2411 = vmatmul.bf16.gmra.mxu3 %v12178_v4  ;;  %v10952_v38 = vpack.c.bf16 %v2297_v33, %v2295_v19  ;;  %v11003_v33 = vld [vmem:[%s11727_s0 + $0x58] sm:$0xff] }
 0x204   : > { %2545 = vmatpush.bf16.msrb.mxu0 %v10608_v42  ;;  %2616 = vmatpush.bf16.msrb.mxu3 %v10633_v0  ;;  %12184 = vst [vmem:[#allocation77_spill] sm:$0xff] %v11003_v33 }
 0x205   : > { %2387 = vmatmul.bf16.gmra.mxu2 %v12177_v63  ;;  %v1951_v42 = vadd.f32 %v1950_v7, %v1927_v35  ;;  %v10997_v7 = vld [vmem:[%s11727_s0 + $0x50] sm:$0xff] }
 0x206   : > { %2592 = vmatpush.bf16.msrb.mxu2 %v10625_v18  ;;  %2569 = vmatpush.bf16.msrb.mxu1 %v10620_v8  ;;  %v1972_v54 = vpop.f32.mrf.mxu2  ;;  %v1996_v52 = vpop.f32.mrf.mxu3  ;;  %v12179_v8 = vld [vmem:[#allocation33_spill] sm:$0xff]  ;;  %12183 = vst [vmem:[#allocation76_spill] sm:$0xff] %v10997_v7  ;;  %v2245_v19 = vrot.slane %v10997_v7, 2 }
 0x207   : > { %v1973_v15 = vadd.f32 %v1972_v54, %v1949_v61  ;;  %v12180_v61 = vld [vmem:[#allocation34_spill] sm:$0xff] }
 0x208   : > { %2546 = vmatpush.bf16.msrb.mxu0 %v10647_v3  ;;  %2617 = vmatpush.bf16.msrb.mxu3 %v10674_v10 }
 0x209   : > { %v10958_v40 = vadd.f32 %v1996_v52, %v1973_v15  ;;  %v11016_v15 = vld [vmem:[%s11728_s1 + $0x58] sm:$0xff] }
 0x20a   : > { %2593 = vmatpush.bf16.msrb.mxu2 %v10671_v1  ;;  %2570 = vmatpush.bf16.msrb.mxu1 %v10654_v29  ;;  %v2033_v18 = vpop.f32.mrf.mxu0  ;;  %v2264_v52 = vrot.slane %v11016_v15, 2 }
 0x20b   : > { %v2057_v34 = vpop.f32.mrf.mxu1 }
 0x20c   : > { %2547 = vmatpush.bf16.msrb.mxu0 %v10677_v47  ;;  %v2058_v0 = vadd.f32 %v2057_v34, %v2033_v18  ;;  %2618 = vmatpush.bf16.msrb.mxu3 %v10698_v6  ;;  %v12181_v47 = vld [vmem:[#allocation37_spill] sm:$0xff]  ;;  %v12182_v6 = vld [vmem:[#allocation38_spill] sm:$0xff]  ;;  %v2246_v18 = vsel %vm12185_vm2, %v2243_v28, %v2245_v19  ;;  %vm12223_vm2 = vmmov %vm12220_vm8 }
 0x20e   : > { %2594 = vmatpush.bf16.msrb.mxu2 %v10693_v50  ;;  %v1974_v3 = vpop.f32.mrf.mxu2  ;;  %v1998_v27 = vpop.f32.mrf.mxu3  ;;  %2571 = vmatpush.bf16.msrb.mxu1 %v10689_v13 }
 0x20f   : > { %2344 = vmatmul.bf16.gmra.mxu0 %v12179_v8  ;;  %v1975_v1 = vadd.f32 %v1974_v3, %v1951_v42  ;;  %v8554_v42 = vld [vmem:[%s11728_s1 + $0x50] sm:$0xff]  ;;  %v12187_v8 = vrot.slane %v10914_v57, 2  ;;  %v2281_v3 = vrot.slane %v11003_v33, 3 }
 0x210   : > { %2619 = vmatpush.bf16.msrb.mxu3 %v10713_v17  ;;  %v2262_v54 = vrot.slane %v8554_v42, 2  ;;  %v2298_v28 = vrot.slane %v8554_v42, 3  ;;  %v12192_v42 = vld [vmem:[#allocation60_spill] sm:$0xff]  ;;  %v12196_v57 = vld [vmem:[#allocation62_spill] sm:$0xff] }
 0x211   : > { %2368 = vmatmul.bf16.gmra.mxu1 %v12180_v61  ;;  %v10969_v29 = vadd.f32 %v1998_v27, %v1975_v1  ;;  %v2300_v27 = vrot.slane %v11016_v15, 3 }
 0x212   : > { %2595 = vmatpush.bf16.msrb.mxu2 %v10708_v23  ;;  %v10972_v10 = vpop.f32.mrf.mxu0 }
 0x213   : > { %v10975_v50 = vpop.f32.mrf.mxu1  ;;  %2416 = vmatmul.bf16.gmra.mxu3 %v12182_v6 }
 0x215   : > { %2392 = vmatmul.bf16.gmra.mxu2 %v12181_v47 }
 0x216   : > { %v2081_v55 = vpop.f32.mrf.mxu2  ;;  %v2105_v9 = vpop.f32.mrf.mxu3 }
 0x217   : > { %v2082_v30 = vadd.f32 %v2081_v55, %v2058_v0 }
 0x219   : > { %v10978_v39 = vadd.f32 %v2105_v9, %v2082_v30  ;;  %v12191_v9 = vrot.slane %v10903_v51, 3 }
 0x21b   : > { %v10980_v13 = vpop.f32.mrf.mxu0 }
 0x21c   : > { %v10982_v23 = vpop.f32.mrf.mxu1 }
 0x21e   : > { %v10985_v17 = vpop.f32.mrf.mxu2  ;;  %v10989_v25 = vpop.f32.mrf.mxu3 }
 0x21f   : > { %2430 = vmatmul.bf16.vlgmr.msra.gmra.mxu0 %v10930_v37 }
 0x220   : > { %2636 = vmatpush.bf16.msra.mxu0 %v10729_v16  ;;  %v2247_v16 = vrot.slane %v11003_v33, 2  ;;  %v12210_v33 = vld [vmem:[#allocation69_spill] sm:$0xff] }
 0x221   : > { %2454 = vmatmul.bf16.vlgmr.msra.gmra.mxu1 %v10942_v21 }
 0x222   : > { %2660 = vmatpush.bf16.msra.mxu1 %v10732_v31  ;;  %v2248_v34 = vsel %vm12186_vm1, %v2245_v19, %v2247_v16  ;;  %vm12224_vm1 = vmmov %vm12221_vm12 }
 0x223   : > { %v10992_v35 = vpop.f32.mrf.mxu0  ;;  %2502 = vmatmul.bf16.vlgmr.msra.gmra.mxu3 %v10952_v38  ;;  %v11039_v1 = vpack.c.bf16 %v2248_v34, %v2246_v18 }
 0x224   : > { %2637 = vmatpush.bf16.msra.mxu0 %v10735_v32  ;;  %v11008_v31 = vpop.f32.mrf.mxu1  ;;  %2708 = vmatpush.bf16.msra.mxu3 %v10747_v56  ;;  %v2265_v56 = vsel %vm12189_vm6, %v2262_v54, %v2264_v52  ;;  %vm12226_vm6 = vmmov %vm12224_vm1 }
 0x225   : > { %2478 = vmatmul.bf16.vlgmr.msra.gmra.mxu2 %v10944_v24 }
 0x226   : > { %2684 = vmatpush.bf16.msra.mxu2 %v10744_v48  ;;  %2661 = vmatpush.bf16.msra.mxu1 %v10741_v14  ;;  %v11030_v0 = vpop.f32.mrf.mxu3  ;;  %v2263_v48 = vsel %vm12188_vm15, %v12187_v8, %v2262_v54  ;;  %v2279_v14 = vrot.slane %v10997_v7, 3  ;;  %vm12225_vm15 = vmmov %vm12224_vm1 }
 0x227   : > { %v11023_v32 = vpop.f32.mrf.mxu2  ;;  %v11046_v55 = vpack.c.bf16 %v2265_v56, %v2263_v48  ;;  %v12199_v48 = vld [vmem:[#allocation64_spill] sm:$0xff] }
 0x228   : > { %2638 = vmatpush.bf16.msra.mxu0 %v10750_v20  ;;  %2709 = vmatpush.bf16.msra.mxu3 %v10761_v59  ;;  %v2282_v19 = vsel %vm1244_vm0, %v2279_v14, %v2281_v3  ;;  %v2301_v59 = vsel %vm1244_vm0, %v2298_v28, %v2300_v27 }
 0x229   : > { %12190 = vst [vmem:[#allocation78_spill] sm:$0xff] %v11046_v55 }
 0x22a   : > { %2685 = vmatpush.bf16.msra.mxu2 %v10756_v60  ;;  %2662 = vmatpush.bf16.msra.mxu1 %v10753_v11  ;;  %v2280_v60 = vsel %vm1244_vm0, %v12191_v9, %v2279_v14  ;;  %v2299_v11 = vsel %vm1244_vm0, %v2296_v45, %v2298_v28  ;;  %v12197_v45 = vld [vmem:[#allocation63_spill] sm:$0xff]  ;;  %v8557_v14 = vld [vmem:[%s11728_s1 + $0x60] sm:$0xff] }
 0x22b   : > { %v11044_v20 = vpop.f32.mrf.mxu0  ;;  %v11068_v15 = vpack.c.bf16 %v2282_v19, %v2280_v60  ;;  %v11071_v18 = vpack.c.bf16 %v2301_v59, %v2299_v11  ;;  %v2266_v28 = vrot.slane %v8557_v14, 2  ;;  %v12200_v9 = vld [vmem:[#allocation61_spill] sm:$0xff]  ;;  %v12201_v60 = vld [vmem:[#allocation66_spill] sm:$0xff]  ;;  %v12202_v19 = vld [vmem:[#allocation67_spill] sm:$0xff] }
 0x22c   : > { %2639 = vmatpush.bf16.msra.mxu0 %v10764_v22  ;;  %2710 = vmatpush.bf16.msra.mxu3 %v10782_v12  ;;  %v11080_v12 = vld [vmem:[%s11727_s0 + $0x60] sm:$0xff] }
 0x22d   : > { %12193 = vst [vmem:[#allocation79_spill] sm:$0xff] %v11068_v15  ;;  %v2249_v8 = vrot.slane %v11080_v12, 2 }
 0x22e   : > { %v11049_v30 = vpop.f32.mrf.mxu1  ;;  %2686 = vmatpush.bf16.msra.mxu2 %v10772_v26  ;;  %v11066_v54 = vpop.f32.mrf.mxu3  ;;  %v12194_v26 = vld [vmem:[#allocation58_spill] sm:$0xff]  ;;  %12195 = vst [vmem:[#allocation81_spill] sm:$0xff] %v11071_v18 }
 0x22f   : > { %2435 = vmatmul.bf16.gmra.mxu0 %v11039_v1  ;;  %v11062_v22 = vpop.f32.mrf.mxu2  ;;  %2663 = vmatpush.bf16.msra.mxu1 %v12194_v26  ;;  %12198 = vst [vmem:[#allocation80_spill] sm:$0xff] %v11080_v12  ;;  %v2250_v59 = vsel %vm12203_vm7, %v2247_v16, %v2249_v8  ;;  %v8559_v16 = vld [vmem:[%s11728_s1 + $0x68] sm:$0x3]  ;;  %vm12230_vm7 = vmmov %vm12224_vm1 }
 0x230   : > { %2640 = vmatpush.bf16.msra.mxu0 %v12192_v42  ;;  %2711 = vmatpush.bf16.msra.mxu3 %v12197_v45  ;;  %v12204_v42 = vld [vmem:[#allocation68_spill] sm:$0xff]  ;;  %v12206_v45 = vld [vmem:[#allocation65_spill] sm:$0xff] }
 0x231   : > { %2459 = vmatmul.bf16.gmra.mxu1 %v11046_v55 }
 0x232   : > { %2687 = vmatpush.bf16.msra.mxu2 %v12196_v57  ;;  %v2267_v57 = vsel %vm12205_vm11, %v2264_v52, %v2266_v28  ;;  %v2302_v52 = vrot.slane %v8557_v14, 3  ;;  %vm12231_vm11 = vmmov %vm12224_vm1 }
 0x233   : > { %v11075_v34 = vpop.f32.mrf.mxu0  ;;  %2664 = vmatpush.bf16.msra.mxu1 %v12200_v9  ;;  %2507 = vmatmul.bf16.gmra.mxu3 %v11071_v18  ;;  %v11106_v9 = vld [vmem:[%s11727_s0 + $0x68] sm:$0x3]  ;;  %v11116_v18 = vpack.c.bf16 %v2266_v28, %v2267_v57  ;;  %v12215_v57 = vld [vmem:[#allocation75_spill] sm:$0xff] }
 0x234   : > { %2641 = vmatpush.bf16.msra.mxu0 %v12199_v48  ;;  %2712 = vmatpush.bf16.msra.mxu3 %v12202_v19  ;;  %v2283_v48 = vrot.slane %v11080_v12, 3  ;;  %12207 = vst [vmem:[#allocation83_spill] sm:$0xff] %v11106_v9  ;;  %v2304_v19 = vrot.slane %v8559_v16, 3  ;;  %v12211_v16 = vld [vmem:[#allocation73_spill] sm:$0xff]  ;;  %v2303_v14 = vsel %vm1244_vm0, %v2300_v27, %v2302_v52  ;;  %v2060_v27 = vadd.f32 %v10975_v50, %v10972_v10  ;;  %v11148_v10 = vld [vmem:[#allocation10] ss:$0 sm:$0xff] }
 0x235   : > { %2483 = vmatmul.bf16.gmra.mxu2 %v11068_v15  ;;  %v12209_v15 = vld [vmem:[#allocation70_spill] sm:$0xff] }
 0x236   : > { %v11085_v56 = vpop.f32.mrf.mxu1  ;;  %2688 = vmatpush.bf16.msra.mxu2 %v12201_v60  ;;  %v11098_v26 = vpop.f32.mrf.mxu3  ;;  %v2285_v60 = vrot.slane %v11106_v9, 3  ;;  %v2305_v28 = vsel %vm1244_vm0, %v2302_v52, %v2304_v19 }
 0x237   : > { %2665 = vmatpush.bf16.msra.mxu1 %v12206_v45  ;;  %v12208_v45 = vld [vmem:[#allocation72_spill] sm:$0xff] }
 0x238   : > { %v11094_v11 = vpop.f32.mrf.mxu2  ;;  %2642 = vmatpush.bf16.msra.mxu0 %v12204_v42  ;;  %v11113_v42 = vpack.c.bf16 %v2249_v8, %v2250_v59  ;;  %2713 = vmatpush.bf16.msra.mxu3 %v12208_v45  ;;  %v2286_v7 = vsel %vm1244_vm0, %v2283_v48, %v2285_v60  ;;  %v12212_v59 = vld [vmem:[#allocation74_spill] sm:$0xff] }
 0x23a   : > { %2689 = vmatpush.bf16.msra.mxu2 %v10819_v36  ;;  %v2284_v36 = vsel %vm1244_vm0, %v2281_v3, %v2283_v48  ;;  %v12213_v3 = vld [vmem:[#allocation71_spill] sm:$0xff]  ;;  %vm12219_vm0 = vcmask 1040384  }
 0x23b   : > { %v2129_v12 = vpop.f32.mrf.mxu0  ;;  %2666 = vmatpush.bf16.msra.mxu1 %v12210_v33  ;;  %v11133_v33 = vpack.c.bf16 %v2286_v7, %v2284_v36  ;;  %v2063_v36 = vadd.f32 %v10982_v23, %v10980_v13  ;;  %v2065_v13 = vadd.f32 %v11008_v31, %v10992_v35  ;;  %vm12222_vm9 = vmmov %vm12219_vm0 }
 0x23c   : > { %2643 = vmatpush.bf16.msra.mxu0 %v12209_v15  ;;  %v2130_v55 = vadd.f32 %v2129_v12, %v10978_v39  ;;  %2714 = vmatpush.bf16.msra.mxu3 %v12212_v59  ;;  %v11136_v12 = vpack.c.bf16 %v2305_v28, %v2303_v14 }
 0x23d   : > { %v2087_v14 = vadd.f32 %v11023_v32, %v2063_v36 }
 0x23e   : > { %v2153_v9 = vpop.f32.mrf.mxu1  ;;  %2690 = vmatpush.bf16.msra.mxu2 %v12211_v16  ;;  %v11131_v39 = vpop.f32.mrf.mxu3 }
 0x23f   : > { %v2154_v8 = vadd.f32 %v2153_v9, %v2130_v55  ;;  %2440 = vmatmul.bf16.gmra.mxu0 %v11113_v42  ;;  %2667 = vmatpush.bf16.msra.mxu1 %v12213_v3  ;;  %v12214_v55 = vld [vmem:[#allocation82_spill] sm:$0xff]  ;;  %v2084_v9 = vadd.f32 %v10985_v17, %v2060_v27  ;;  %v11152_v3 = vld [vmem:[#allocation7] ss:$0 sm:$0xff]  ;;  %v12217_v27 = vld [vmem:[#allocation39_spill] sm:$0xff]  ;;  %v2111_v32 = vadd.f32 %v11030_v0, %v2087_v14 }
 0x240   : > { %v11128_v15 = vpop.f32.mrf.mxu2  ;;  %2715 = vmatpush.bf16.msra.mxu3 %v12215_v57  ;;  %v2068_v0 = vadd.f32 %v11049_v30, %v11044_v20 }
 0x241   : > { %2464 = vmatmul.bf16.gmra.mxu1 %v11116_v18  ;;  %v2108_v19 = vadd.f32 %v10989_v25, %v2084_v9 }
 0x242   : > { %2691 = vmatpush.bf16.msra.mxu2 %v12214_v55  ;;  %v12216_v55 = vld [vmem:[#allocation59_spill] sm:$0xff] }
 0x243   : > { %v2131_v48 = vpop.f32.mrf.mxu0  ;;  %2512 = vmatmul.bf16.gmra.mxu3 %v11136_v12  ;;  %v12218_v25 = vmax.f32 %v12216_v55, %v12217_v27  ;;  %v2092_v27 = vadd.f32 %v11094_v11, %v2068_v0 }
 0x244   : > { %v2132_v50 = vadd.f32 %v2131_v48, %v2108_v19 }
 0x245   : > { %2488 = vmatmul.bf16.gmra.mxu2 %v11133_v33 }
 0x246   : > { %v2155_v60 = vpop.f32.mrf.mxu1  ;;  %v2201_v45 = vpop.f32.mrf.mxu3 }
 0x247   : > { %v2156_v57 = vadd.f32 %v2155_v60, %v2132_v50 }
 0x248   : > { %v2177_v7 = vpop.f32.mrf.mxu2 }
 0x249   : > { %v2178_v52 = vadd.f32 %v2177_v7, %v2154_v8  ;;  %v924_v8 = vadd.f32 %v11152_v3, %v12218_v25 }
 0x24b   : > { %v2202_v16 = vadd.f32 %v2201_v45, %v2178_v52  ;;  %v931_v52 = vmax.f32 %v924_v8, 0.0 }
 0x24c   : > { %v2134_v17 = vpop.f32.mrf.mxu0 }
 0x24d   : > { %v2216_v28 = vmax.f32 %v10856_v41, %v2202_v16  ;;  %v2089_v41 = vadd.f32 %v11062_v22, %v2065_v13  ;;  %v2135_v45 = vadd.f32 %v2134_v17, %v2111_v32 }
 0x24e   : > { %v2158_v59 = vpop.f32.mrf.mxu1  ;;  %v2203_v19 = vpop.f32.mrf.mxu3 }
 0x24f   : > { %v2226_v23 = vadd.f32 %v11148_v10, %v2216_v28  ;;  %2548 = vmatmul.bf16.vlgmr.msrb.gmra.mxu0 %v12161_v49  ;;  %v2113_v50 = vadd.f32 %v11066_v54, %v2089_v41  ;;  %v2159_v20 = vadd.f32 %v2158_v59, %v2135_v45 }
 0x250   : > { %v2179_v48 = vpop.f32.mrf.mxu2 }
 0x251   : > { %2572 = vmatmul.bf16.vlgmr.msrb.gmra.mxu1 %v12162_v5  ;;  %v11165_v9 = vmax.f32 %v2226_v23, 0.0  ;;  %v2180_v7 = vadd.f32 %v2179_v48, %v2156_v57 }
 0x253   : > { %v3241_v35 = vrot.slane %v11165_v9, 1  ;;  %v3243_v31 = vrot.slane %v11165_v9, 2  ;;  %v3245_v60 = vrot.slane %v11165_v9, 3  ;;  %v3247_v49 = vrot.slane %v11165_v9, 4  ;;  %2620 = vmatmul.bf16.vlgmr.msrb.gmra.mxu3 %v10930_v37 }
 0x254   : > { %v3249_v5 = vrot.slane %v11165_v9, 5  ;;  %v3251_v22 = vrot.slane %v11165_v9, 6  ;;  %v3276_v36 = vpack.c.bf16 %v11165_v9, %v931_v52  ;;  %v2136_v16 = vpop.f32.mrf.mxu0  ;;  %v2204_v28 = vadd.f32 %v2203_v19, %v2180_v7 }
 0x255   : > { %v3277_v14 = vpack.c.bf16 %v3243_v31, %v3241_v35  ;;  %v3278_v17 = vpack.c.bf16 %v3247_v49, %v3245_v60  ;;  %2596 = vmatmul.bf16.vlgmr.msrb.gmra.mxu2 %v12163_v58  ;;  %v2137_v7 = vadd.f32 %v2136_v16, %v2113_v50  ;;  %v2518_v37 = vrot.slane %v10884_v53, 4 }
 0x256   : > { %v2160_v55 = vpop.f32.mrf.mxu1  ;;  %v3279_v25 = vpack.c.bf16 %v3251_v22, %v3249_v5  ;;  %v3314_v8 = vrot.slane %v3276_v36, 3  ;;  %v2217_v54 = vmax.f32 %v10863_v46, %v2204_v28  ;;  %v2206_v59 = vpop.f32.mrf.mxu3  ;;  %v2519_v46 = vrot.slane %v10890_v2, 4 }
 0x257   : > { %v3315_v30 = vrot.slane %v3277_v14, 6  ;;  %v3316_v13 = vrot.slane %v3277_v14, 1  ;;  %v3317_v23 = vrot.slane %v3278_v17, 4  ;;  %v3318_v57 = vrot.slane %v3278_v17, 7 }
 0x258   : > { %v3319_v32 = vrot.slane %v3279_v25, 2  ;;  %v3320_v48 = vrot.slane %v3279_v25, 5  ;;  %v2182_v41 = vpop.f32.mrf.mxu2  ;;  %v3360_v58 = vsel %vm12219_vm0, %v3276_v36, %v3314_v8  ;;  %v2227_v31 = vadd.f32 %v11148_v10, %v2217_v54  ;;  %vm12236_vm0 = vmmov %vm12224_vm1 }
 0x259   : > { %v3363_v19 = vsel %vm2874_vm3, %v3315_v30, %v3316_v13  ;;  %v3367_v11 = vsel %vm2880_vm4, %v3317_v23, %v3318_v57  ;;  %v2183_v52 = vadd.f32 %v2182_v41, %v2159_v20  ;;  %v2116_v60 = vadd.f32 %v11098_v26, %v2092_v27 }
 0x25a   : > { %v3364_v45 = vsel %vm2878_vm5, %v3360_v58, %v3363_v19  ;;  %v3370_v35 = vsel %vm12220_vm8, %v3319_v32, %v3320_v48  ;;  %v2521_v5 = vrot.slane %v10903_v51, 4  ;;  %v2070_v22 = vadd.f32 %v11085_v56, %v11075_v34  ;;  %vm12237_vm8 = vmmov %vm12236_vm0 }
 0x25b   : > { %v3371_v49 = vsel %vm2888_vm10, %v3367_v11, %v3370_v35  ;;  %v2207_v0 = vadd.f32 %v2206_v59, %v2183_v52  ;;  %v2233_v16 = vmax.f32 %v2227_v31, 0.0  ;;  %v3253_v14 = vrot.slane %v11165_v9, 7 }
 0x25c   : > { %v11195_v36 = vsel %vm12221_vm12, %v3364_v45, %v3371_v49  ;;  %v2139_v50 = vpop.f32.mrf.mxu0  ;;  %v2161_v28 = vadd.f32 %v2160_v55, %v2137_v7  ;;  %v2094_v56 = vadd.f32 %v11128_v15, %v2070_v22  ;;  %vm12241_vm12 = vmmov %vm12222_vm9 }
 0x25d   : > { %v2218_v17 = vmax.f32 %v10875_v44, %v2207_v0  ;;  %v2140_v25 = vadd.f32 %v2139_v50, %v2116_v60  ;;  %v3256_v27 = vrot.slane %v2233_v16, 1  ;;  %v3258_v8 = vrot.slane %v2233_v16, 2 }
 0x25e   : > { %v2163_v26 = vpop.f32.mrf.mxu1  ;;  %v3260_v20 = vrot.slane %v2233_v16, 3  ;;  %v3262_v30 = vrot.slane %v2233_v16, 4  ;;  %v3264_v13 = vrot.slane %v2233_v16, 5  ;;  %v3266_v23 = vrot.slane %v2233_v16, 6  ;;  %v2208_v58 = vpop.f32.mrf.mxu3 }
 0x25f   : > { %v3280_v57 = vpack.c.bf16 %v2233_v16, %v3253_v14  ;;  %v2228_v34 = vadd.f32 %v11148_v10, %v2218_v17  ;;  %2553 = vmatmul.bf16.gmra.mxu0 %v12168_v43  ;;  %v3281_v32 = vpack.c.bf16 %v3258_v8, %v3256_v27  ;;  %v2164_v44 = vadd.f32 %v2163_v26, %v2140_v25 }
 0x260   : > { %v3282_v9 = vpack.c.bf16 %v3262_v30, %v3260_v20  ;;  %v2184_v48 = vpop.f32.mrf.mxu2  ;;  %v3283_v55 = vpack.c.bf16 %v3266_v23, %v3264_v13 }
 0x261   : > { %2577 = vmatmul.bf16.gmra.mxu1 %v12177_v63  ;;  %v3321_v54 = vrot.slane %v3280_v57, 3  ;;  %v11203_v41 = vmax.f32 %v2228_v34, 0.0  ;;  %v2185_v7 = vadd.f32 %v2184_v48, %v2161_v28  ;;  %v3322_v19 = vrot.slane %v3281_v32, 6 }
 0x262   : > { %v3323_v11 = vrot.slane %v3281_v32, 1  ;;  %v3324_v52 = vrot.slane %v3282_v9, 4  ;;  %v3325_v59 = vrot.slane %v3282_v9, 7  ;;  %v3326_v45 = vrot.slane %v3283_v55, 2 }
 0x263   : > { %v3327_v43 = vrot.slane %v3283_v55, 5  ;;  %v3375_v15 = vsel %vm12222_vm9, %v3280_v57, %v3321_v54  ;;  %v3608_v35 = vrot.slane %v11203_v41, 1  ;;  %v3610_v60 = vrot.slane %v11203_v41, 2  ;;  %2625 = vmatmul.bf16.gmra.mxu3 %v11039_v1  ;;  %vm12242_vm9 = vmmov %vm12223_vm2 }
 0x264   : > { %v3378_v31 = vsel %vm2874_vm3, %v3322_v19, %v3323_v11  ;;  %v3382_v63 = vsel %vm2880_vm4, %v3324_v52, %v3325_v59  ;;  %v3612_v49 = vrot.slane %v11203_v41, 3  ;;  %v2141_v0 = vpop.f32.mrf.mxu0  ;;  %v3614_v14 = vrot.slane %v11203_v41, 4 }
 0x265   : > { %v3379_v22 = vsel %vm2878_vm5, %v3375_v15, %v3378_v31  ;;  %v3385_v50 = vsel %vm12223_vm2, %v3326_v45, %v3327_v43  ;;  %v3616_v17 = vrot.slane %v11203_v41, 5  ;;  %2601 = vmatmul.bf16.gmra.mxu2 %v12178_v4  ;;  %v3618_v26 = vrot.slane %v11203_v41, 6  ;;  %vm12244_vm2 = vmmov %vm12236_vm0 }
 0x266   : > { %v2165_v28 = vpop.f32.mrf.mxu1  ;;  %v3386_v25 = vsel %vm2888_vm10, %v3382_v63, %v3385_v50  ;;  %v3620_v27 = vrot.slane %v11203_v41, 7  ;;  %v3665_v8 = vpack.c.bf16 %v3608_v35, %v2233_v16  ;;  %v3666_v30 = vpack.c.bf16 %v3612_v49, %v3610_v60  ;;  %v2211_v9 = vpop.f32.mrf.mxu3 }
 0x267   : > { %v11221_v20 = vsel %vm12224_vm1, %v3379_v22, %v3386_v25  ;;  %v3667_v13 = vpack.c.bf16 %v3616_v17, %v3614_v14  ;;  %v2209_v23 = vadd.f32 %v2208_v58, %v2185_v7  ;;  %v2118_v57 = vadd.f32 %v11131_v39, %v2094_v56  ;;  %vm12246_vm1 = vmmov %vm12241_vm12 }
 0x268   : > { %v3668_v34 = vpack.c.bf16 %v3620_v27, %v3618_v26  ;;  %3682 = vst [vmem:[#allocation1] sm:$0xff] %v3665_v8  ;;  %v2187_v4 = vpop.f32.mrf.mxu2  ;;  %v11229_v32 = vsel %vm12225_vm15, %v2518_v37, %v2519_v46  ;;  %v11237_v39 = vsel %vm12226_vm6, %v2519_v46, %v2521_v5  ;;  %vm12247_vm15 = vmmov %vm12242_vm9 }
 0x269   : > { %3684 = vst [vmem:[#allocation1 + $0x8] sm:$0xff] %v3666_v30  ;;  %v2219_v1 = vmax.f32 %v10922_v62, %v2209_v23  ;;  %v2188_v16 = vadd.f32 %v2187_v4, %v2164_v44  ;;  %v2142_v56 = vadd.f32 %v2141_v0, %v2118_v57  ;;  %v2537_v53 = vpack.c.bf16 %v11237_v39, %v11229_v32  ;;  %vm12248_vm6 = vmmov %vm12236_vm0 }
 0x26a   : > { %3686 = vst [vmem:[#allocation1 + $0x10] sm:$0xff] %v3667_v13 }
 0x26b   : > { %3688 = vst [vmem:[#allocation1 + $0x18] sm:$0xff] %v3668_v34  ;;  %v2229_v37 = vadd.f32 %v11148_v10, %v2219_v1  ;;  %v2212_v48 = vadd.f32 %v2211_v9, %v2188_v16  ;;  %v2166_v7 = vadd.f32 %v2165_v28, %v2142_v56 }
 0x26c   : > { %v2335_v55 = vpop.f32.mrf.mxu0 }
 0x26d   : > { %v2235_v62 = vmax.f32 %v2229_v37, 0.0  ;;  %v2220_v44 = vmax.f32 %v10958_v40, %v2212_v48 }
 0x26e   : > { %v2359_v54 = vpop.f32.mrf.mxu1  ;;  %v2213_v40 = vpop.f32.mrf.mxu3 }
 0x26f   : > { %v2360_v58 = vadd.f32 %v2359_v54, %v2335_v55  ;;  %v2230_v2 = vadd.f32 %v11148_v10, %v2220_v44  ;;  %v3623_v46 = vrot.slane %v2235_v62, 1  ;;  %v3625_v19 = vrot.slane %v2235_v62, 2  ;;  %2558 = vmatmul.bf16.gmra.mxu0 %v12180_v61 }
 0x270   : > { %v3627_v11 = vrot.slane %v2235_v62, 3  ;;  %v2189_v52 = vpop.f32.mrf.mxu2  ;;  %v3629_v59 = vrot.slane %v2235_v62, 4  ;;  %v3631_v45 = vrot.slane %v2235_v62, 5  ;;  %v3633_v43 = vrot.slane %v2235_v62, 6 }
 0x271   : > { %v3635_v15 = vrot.slane %v2235_v62, 7  ;;  %2582 = vmatmul.bf16.gmra.mxu1 %v12181_v47  ;;  %v2236_v35 = vmax.f32 %v2230_v2, 0.0  ;;  %v2190_v31 = vadd.f32 %v2189_v52, %v2166_v7  ;;  %v3669_v63 = vpack.c.bf16 %v3623_v46, %v11203_v41 }
 0x272   : > { %v3670_v60 = vpack.c.bf16 %v3627_v11, %v3625_v19  ;;  %v3671_v49 = vpack.c.bf16 %v3631_v45, %v3629_v59  ;;  %v11248_v30 = vld [vmem:[#allocation1 + $0x3] ss:$4 sm:$0xff] }
 0x273   : > { %v3672_v0 = vpack.c.bf16 %v3635_v15, %v3633_v43  ;;  %v3638_v22 = vrot.slane %v2236_v35, 1  ;;  %v3640_v50 = vrot.slane %v2236_v35, 2  ;;  %v3642_v14 = vrot.slane %v2236_v35, 3  ;;  %3690 = vst [vmem:[#allocation1 + $0x20] sm:$0xff] %v3669_v63  ;;  %2630 = vmatmul.bf16.gmra.mxu3 %v11113_v42 }
 0x274   : > { %v3644_v17 = vrot.slane %v2236_v35, 4  ;;  %v3646_v61 = vrot.slane %v2236_v35, 5  ;;  %v3648_v28 = vrot.slane %v2236_v35, 6  ;;  %v3650_v25 = vrot.slane %v2236_v35, 7  ;;  %3692 = vst [vmem:[#allocation1 + $0x28] sm:$0xff] %v3670_v60  ;;  %v2337_v27 = vpop.f32.mrf.mxu0 }
 0x275   : > { %v2214_v26 = vadd.f32 %v2213_v40, %v2190_v31  ;;  %v3673_v47 = vpack.c.bf16 %v3638_v22, %v2235_v62  ;;  %v3674_v8 = vpack.c.bf16 %v3642_v14, %v3640_v50  ;;  %3694 = vst [vmem:[#allocation1 + $0x30] sm:$0xff] %v3671_v49  ;;  %2606 = vmatmul.bf16.gmra.mxu2 %v12182_v6 }
 0x276   : > { %v2361_v41 = vpop.f32.mrf.mxu1  ;;  %v3675_v13 = vpack.c.bf16 %v3646_v61, %v3644_v17  ;;  %v3676_v23 = vpack.c.bf16 %v3650_v25, %v3648_v28  ;;  %3696 = vst [vmem:[#allocation1 + $0x38] sm:$0xff] %v3672_v0  ;;  %v2407_v9 = vpop.f32.mrf.mxu3  ;;  %v12228_v0 = vld [vmem:[#allocation77_spill] sm:$0xff]  ;;  %v12229_v61 = vld [vmem:[#allocation78_spill] sm:$0xff] }
 0x277   : > { %v2221_v57 = vmax.f32 %v10969_v29, %v2214_v26  ;;  %3702 = vst [vmem:[#allocation1] sm:$0xff] %v3673_v47  ;;  %v2362_v34 = vadd.f32 %v2361_v41, %v2337_v27  ;;  %v2525_v22 = vrot.slane %v12228_v0, 4 }
 0x278   : > { %3704 = vst [vmem:[#allocation1 + $0x8] sm:$0xff] %v3674_v8  ;;  %v2383_v1 = vpop.f32.mrf.mxu2  ;;  %v12233_v8 = vld [vmem:[#allocation81_spill] sm:$0xff] }
 0x279   : > { %v2231_v4 = vadd.f32 %v11148_v10, %v2221_v57  ;;  %3706 = vst [vmem:[#allocation1 + $0x10] sm:$0xff] %v3675_v13  ;;  %v2384_v16 = vadd.f32 %v2383_v1, %v2360_v58  ;;  %v12235_v1 = vld [vmem:[#allocation83_spill] sm:$0xff] }
 0x27a   : > { %3708 = vst [vmem:[#allocation1 + $0x18] sm:$0xff] %v3676_v23 }
 0x27b   : > { %v2237_v6 = vmax.f32 %v2231_v4, 0.0  ;;  %v2408_v56 = vadd.f32 %v2407_v9, %v2384_v16  ;;  %v2529_v16 = vrot.slane %v12235_v1, 4 }
 0x27c   : > { %v2340_v29 = vpop.f32.mrf.mxu0 }
 0x27d   : > { %v3653_v37 = vrot.slane %v2237_v6, 1  ;;  %v3655_v48 = vrot.slane %v2237_v6, 2  ;;  %v3657_v55 = vrot.slane %v2237_v6, 3  ;;  %v3659_v62 = vrot.slane %v2237_v6, 4  ;;  %v11253_v52 = vld [vmem:[#allocation1 + $0x23] ss:$4 sm:$0xff] }
 0x27e   : > { %v3661_v44 = vrot.slane %v2237_v6, 5  ;;  %v3663_v54 = vrot.slane %v2237_v6, 6  ;;  %v2364_v42 = vpop.f32.mrf.mxu1  ;;  %v2409_v45 = vpop.f32.mrf.mxu3 }
 0x27f   : > { %v3677_v7 = vpack.c.bf16 %v3653_v37, %v2236_v35  ;;  %v3678_v2 = vpack.c.bf16 %v3657_v55, %v3655_v48  ;;  %v2365_v46 = vadd.f32 %v2364_v42, %v2340_v29  ;;  %2644 = vmatmul.bf16.vlgmr.msra.gmra.mxu0 %v10942_v21 }
 0x280   : > { %v3679_v19 = vpack.c.bf16 %v3661_v44, %v3659_v62  ;;  %v3680_v11 = vpack.c.bf16 0.0, %v3663_v54  ;;  %v2385_v58 = vpop.f32.mrf.mxu2 }
 0x281   : > { %3710 = vst [vmem:[#allocation1 + $0x20] sm:$0xff] %v3677_v7  ;;  %2668 = vmatmul.bf16.vlgmr.msra.gmra.mxu1 %v10944_v24  ;;  %v2386_v59 = vadd.f32 %v2385_v58, %v2362_v34  ;;  %v12227_v24 = vld [vmem:[#allocation76_spill] sm:$0xff] }
 0x282   : > { %3712 = vst [vmem:[#allocation1 + $0x28] sm:$0xff] %v3678_v2  ;;  %v2523_v49 = vrot.slane %v12227_v24, 4 }
 0x283   : > { %3714 = vst [vmem:[#allocation1 + $0x30] sm:$0xff] %v3679_v19  ;;  %v2410_v43 = vadd.f32 %v2409_v45, %v2386_v59  ;;  %2716 = vmatmul.bf16.vlgmr.msra.gmra.mxu3 %v2537_v53  ;;  %v12232_v53 = vld [vmem:[#allocation79_spill] sm:$0xff] }
 0x284   : > { %3716 = vst [vmem:[#allocation1 + $0x38] sm:$0xff] %v3680_v11  ;;  %v2342_v15 = vpop.f32.mrf.mxu0  ;;  %v2526_v32 = vsel %vm12231_vm11, %v2523_v49, %v2525_v22 }
 0x285   : > { %2692 = vmatmul.bf16.vlgmr.msra.gmra.mxu2 %v10952_v38  ;;  %v2524_v38 = vsel %vm12230_vm7, %v2521_v5, %v2523_v49  ;;  %v12234_v5 = vld [vmem:[#allocation80_spill] sm:$0xff] }
 0x286   : > { %v2366_v35 = vpop.f32.mrf.mxu1  ;;  %v2412_v63 = vpop.f32.mrf.mxu3  ;;  %v2538_v26 = vpack.c.bf16 %v2526_v32, %v2524_v38  ;;  %v2527_v4 = vrot.slane %v12234_v5, 4 }
 0x287   : > { %v2367_v31 = vadd.f32 %v2366_v35, %v2342_v15 }
 0x288   : > { %v2388_v21 = vpop.f32.mrf.mxu2  ;;  %v2528_v55 = vsel %vm12236_vm0, %v2525_v22, %v2527_v4  ;;  %v2530_v62 = vsel %vm12237_vm8, %v2527_v4, %v2529_v16 }
 0x289   : > { %v2389_v40 = vadd.f32 %v2388_v21, %v2365_v46  ;;  %v2539_v42 = vpack.c.bf16 %v2530_v62, %v2528_v55 }
 0x28b   : > { %v2413_v60 = vadd.f32 %v2412_v63, %v2389_v40 }
 0x28c   : > { %v2345_v50 = vpop.f32.mrf.mxu0 }
 0x28e   : > { %v2369_v14 = vpop.f32.mrf.mxu1  ;;  %v2414_v25 = vpop.f32.mrf.mxu3 }
 0x28f   : > { %v2370_v17 = vadd.f32 %v2369_v14, %v2345_v50  ;;  %2649 = vmatmul.bf16.gmra.mxu0 %v12229_v61 }
 0x290   : > { %v2390_v39 = vpop.f32.mrf.mxu2 }
 0x291   : > { %2673 = vmatmul.bf16.gmra.mxu1 %v12232_v53  ;;  %v2391_v28 = vadd.f32 %v2390_v39, %v2367_v31 }
 0x293   : > { %v2415_v27 = vadd.f32 %v2414_v25, %v2391_v28  ;;  %2721 = vmatmul.bf16.gmra.mxu3 %v2538_v26 }
 0x294   : > { %v2347_v47 = vpop.f32.mrf.mxu0 }
 0x295   : > { %2697 = vmatmul.bf16.gmra.mxu2 %v12233_v8 }
 0x296   : > { %v2371_v41 = vpop.f32.mrf.mxu1  ;;  %v2417_v51 = vpop.f32.mrf.mxu3 }
 0x297   : > { %v2372_v13 = vadd.f32 %v2371_v41, %v2347_v47 }
 0x298   : > { %v2393_v23 = vpop.f32.mrf.mxu2 }
 0x299   : > { %v2394_v57 = vadd.f32 %v2393_v23, %v2370_v17 }
 0x29b   : > { %v2418_v34 = vadd.f32 %v2417_v51, %v2394_v57 }
 0x29c   : > { %v2431_v9 = vpop.f32.mrf.mxu0 }
 0x29d   : > { %v2432_v6 = vadd.f32 %v2431_v9, %v2408_v56 }
 0x29e   : > { %v2455_v37 = vpop.f32.mrf.mxu1  ;;  %v2419_v54 = vpop.f32.mrf.mxu3 }
 0x29f   : > { %v2456_v48 = vadd.f32 %v2455_v37, %v2432_v6  ;;  %2654 = vmatmul.bf16.gmra.mxu0 %v11116_v18 }
 0x2a0   : > { %v2395_v29 = vpop.f32.mrf.mxu2 }
 0x2a1   : > { %2678 = vmatmul.bf16.gmra.mxu1 %v11133_v33  ;;  %v2396_v44 = vadd.f32 %v2395_v29, %v2372_v13 }
 0x2a3   : > { %v2420_v7 = vadd.f32 %v2419_v54, %v2396_v44  ;;  %2726 = vmatmul.bf16.gmra.mxu3 %v2539_v42 }
 0x2a4   : > { %v2433_v2 = vpop.f32.mrf.mxu0 }
 0x2a5   : > { %2702 = vmatmul.bf16.gmra.mxu2 %v11136_v12  ;;  %v2434_v46 = vadd.f32 %v2433_v2, %v2410_v43 }
 0x2a6   : > { %v2457_v56 = vpop.f32.mrf.mxu1  ;;  %v2503_v58 = vpop.f32.mrf.mxu3 }
 0x2a7   : > { %v2458_v19 = vadd.f32 %v2457_v56, %v2434_v46 }
 0x2a8   : > { %v2479_v11 = vpop.f32.mrf.mxu2 }
 0x2a9   : > { %v2480_v18 = vadd.f32 %v2479_v11, %v2456_v48 }
 0x2ab   : > { %v11277_v59 = vadd.f32 %v2503_v58, %v2480_v18 }
 0x2ac   : > { %v2436_v45 = vpop.f32.mrf.mxu0 }
 0x2ad   : > { %v2437_v15 = vadd.f32 %v2436_v45, %v2413_v60 }
 0x2ae   : > { %v2460_v35 = vpop.f32.mrf.mxu1  ;;  %v2505_v40 = vpop.f32.mrf.mxu3 }
 0x2af   : > { %v2461_v33 = vadd.f32 %v2460_v35, %v2437_v15 }
 0x2b0   : > { %v2481_v31 = vpop.f32.mrf.mxu2 }
 0x2b1   : > { %v2482_v21 = vadd.f32 %v2481_v31, %v2458_v19 }
 0x2b3   : > { %v11279_v63 = vadd.f32 %v2505_v40, %v2482_v21 }
 0x2b4   : > { %v2438_v24 = vpop.f32.mrf.mxu0 }
 0x2b5   : > { %v2439_v12 = vadd.f32 %v2438_v24, %v2415_v27 }
 0x2b6   : > { %v2462_v43 = vpop.f32.mrf.mxu1  ;;  %v2508_v50 = vpop.f32.mrf.mxu3 }
 0x2b7   : > { %v2463_v49 = vadd.f32 %v2462_v43, %v2439_v12 }
 0x2b8   : > { %v2484_v0 = vpop.f32.mrf.mxu2 }
 0x2b9   : > { %v2485_v22 = vadd.f32 %v2484_v0, %v2461_v33 }
 0x2bb   : > { %v11281_v14 = vadd.f32 %v2508_v50, %v2485_v22 }
 0x2bc   : > { %v2441_v17 = vpop.f32.mrf.mxu0 }
 0x2bd   : > { %v2442_v61 = vadd.f32 %v2441_v17, %v2418_v34 }
 0x2be   : > { %v2465_v38 = vpop.f32.mrf.mxu1  ;;  %v2510_v53 = vpop.f32.mrf.mxu3 }
 0x2bf   : > { %v2466_v60 = vadd.f32 %v2465_v38, %v2442_v61 }
 0x2c0   : > { %v2486_v32 = vpop.f32.mrf.mxu2 }
 0x2c1   : > { %v2487_v39 = vadd.f32 %v2486_v32, %v2463_v49 }
 0x2c3   : > { %v11283_v28 = vadd.f32 %v2510_v53, %v2487_v39 }
 0x2c4   : > { %v2443_v25 = vpop.f32.mrf.mxu0 }
 0x2c5   : > { %v2444_v26 = vadd.f32 %v2443_v25, %v2420_v7 }
 0x2c6   : > { %v2467_v47 = vpop.f32.mrf.mxu1  ;;  %v2513_v13 = vpop.f32.mrf.mxu3 }
 0x2c7   : > { %v2468_v27 = vadd.f32 %v2467_v47, %v2444_v26 }
 0x2c8   : > { %v2489_v8 = vpop.f32.mrf.mxu2 }
 0x2c9   : > { %v2490_v41 = vadd.f32 %v2489_v8, %v2466_v60  ;;  %v12239_v8 = vld [vmem:[#allocation57_spill] sm:$0xff] }
 0x2cb   : > { %v11285_v23 = vadd.f32 %v2513_v13, %v2490_v41 }
 0x2cc   : > { %v2549_v57 = vpop.f32.mrf.mxu0 }
 0x2ce   : > { %v2573_v51 = vpop.f32.mrf.mxu1  ;;  %v2515_v4 = vpop.f32.mrf.mxu3 }
 0x2cf   : > { %v2574_v15 = vadd.f32 %v2573_v51, %v2549_v57 }
 0x2d0   : > { %v2491_v5 = vpop.f32.mrf.mxu2 }
 0x2d1   : > { %v2492_v34 = vadd.f32 %v2491_v5, %v2468_v27  ;;  %v12238_v27 = vld [vmem:[#allocation51_spill] sm:$0xff] }
 0x2d2   : > { %v12240_v41 = vmax.f32 %v12238_v27, %v12239_v8 }
 0x2d3   : > { %v11287_v1 = vadd.f32 %v2515_v4, %v2492_v34 }
 0x2d4   : > { %v2551_v16 = vpop.f32.mrf.mxu0  ;;  %v1199_v13 = vadd.f32 %v11152_v3, %v12240_v41 }
 0x2d6   : > { %v2575_v9 = vpop.f32.mrf.mxu1  ;;  %v2621_v37 = vpop.f32.mrf.mxu3 }
 0x2d7   : > { %v2576_v12 = vadd.f32 %v2575_v9, %v2551_v16 }
 0x2d8   : > { %v2597_v6 = vpop.f32.mrf.mxu2 }
 0x2d9   : > { %v2598_v33 = vadd.f32 %v2597_v6, %v2574_v15 }
 0x2db   : > { %v2622_v40 = vadd.f32 %v2621_v37, %v2598_v33 }
 0x2dc   : > { %v2554_v48 = vpop.f32.mrf.mxu0 }
 0x2de   : > { %v2578_v55 = vpop.f32.mrf.mxu1  ;;  %v2623_v29 = vpop.f32.mrf.mxu3 }
 0x2df   : > { %v2579_v32 = vadd.f32 %v2578_v55, %v2554_v48  ;;  %v1206_v55 = vmax.f32 %v1199_v13, 0.0 }
 0x2e0   : > { %v2599_v62 = vpop.f32.mrf.mxu2 }
 0x2e1   : > { %v2600_v0 = vadd.f32 %v2599_v62, %v2576_v12 }
 0x2e3   : > { %v2624_v61 = vadd.f32 %v2623_v29, %v2600_v0 }
 0x2e4   : > { %v2556_v44 = vpop.f32.mrf.mxu0 }
 0x2e6   : > { %v2580_v54 = vpop.f32.mrf.mxu1  ;;  %v2626_v7 = vpop.f32.mrf.mxu3 }
 0x2e7   : > { %v2581_v51 = vadd.f32 %v2580_v54, %v2556_v44 }
 0x2e8   : > { %v2602_v42 = vpop.f32.mrf.mxu2 }
 0x2e9   : > { %v2603_v25 = vadd.f32 %v2602_v42, %v2579_v32 }
 0x2eb   : > { %v2627_v4 = vadd.f32 %v2626_v7, %v2603_v25 }
 0x2ec   : > { %v2559_v2 = vpop.f32.mrf.mxu0 }
 0x2ee   : > { %v2583_v46 = vpop.f32.mrf.mxu1  ;;  %v2628_v19 = vpop.f32.mrf.mxu3 }
 0x2ef   : > { %v2584_v54 = vadd.f32 %v2583_v46, %v2559_v2  ;;  %v3399_v2 = vld [vmem:[#allocation2 + $0x30] sm:$0xff] }
 0x2f0   : > { %v2604_v56 = vpop.f32.mrf.mxu2 }
 0x2f1   : > { %v2605_v9 = vadd.f32 %v2604_v56, %v2581_v51 }
 0x2f4   : > { %v11289_v11 = vpop.f32.mrf.mxu0 }
 0x2f6   : > { %v11291_v18 = vpop.f32.mrf.mxu1  ;;  %v11293_v45 = vpop.f32.mrf.mxu3 }
 0x2f7   : > { %v2586_v27 = vadd.f32 %v11291_v18, %v11289_v11 }
 0x2f8   : > { %v2607_v58 = vpop.f32.mrf.mxu2 }
 0x2f9   : > { %v2608_v12 = vadd.f32 %v2607_v58, %v2584_v54 }
 0x2fb   : > { %v2632_v51 = vadd.f32 %v11293_v45, %v2608_v12 }
 0x2fc   : > { %v2645_v35 = vpop.f32.mrf.mxu0 }
 0x2fd   : > { %v2646_v43 = vadd.f32 %v2645_v35, %v2622_v40  ;;  %v2629_v35 = vadd.f32 %v2628_v19, %v2605_v9 }
 0x2fe   : > { %v2669_v31 = vpop.f32.mrf.mxu1  ;;  %v11297_v24 = vpop.f32.mrf.mxu3 }
 0x2ff   : > { %v2670_v50 = vadd.f32 %v2669_v31, %v2646_v43 }
 0x300   : > { %v11295_v21 = vpop.f32.mrf.mxu2 }
 0x304   : > { %v2647_v49 = vpop.f32.mrf.mxu0 }
 0x305   : > { %v2648_v53 = vadd.f32 %v2647_v49, %v2624_v61 }
 0x306   : > { %v2671_v22 = vpop.f32.mrf.mxu1  ;;  %v2717_v60 = vpop.f32.mrf.mxu3 }
 0x307   : > { %v2672_v34 = vadd.f32 %v2671_v22, %v2648_v53 }
 0x308   : > { %v2693_v17 = vpop.f32.mrf.mxu2 }
 0x309   : > { %v2694_v38 = vadd.f32 %v2693_v17, %v2670_v50 }
 0x30b   : > { %v2718_v39 = vadd.f32 %v2717_v60, %v2694_v38 }
 0x30c   : > { %v2650_v26 = vpop.f32.mrf.mxu0 }
 0x30d   : > { %v2732_v47 = vmax.f32 %v11277_v59, %v2718_v39  ;;  %v2651_v62 = vadd.f32 %v2650_v26, %v2627_v4  ;;  %v2610_v4 = vadd.f32 %v11295_v21, %v2586_v27 }
 0x30e   : > { %v2674_v57 = vpop.f32.mrf.mxu1  ;;  %v2719_v48 = vpop.f32.mrf.mxu3 }
 0x30f   : > { %v2738_v5 = vadd.f32 %v11148_v10, %v2732_v47  ;;  %v2675_v0 = vadd.f32 %v2674_v57, %v2651_v62  ;;  %v3400_v57 = vsel %vm10189_vm13, %v11195_v36, %v3399_v2 }
 0x310   : > { %v2695_v16 = vpop.f32.mrf.mxu2 }
 0x311   : > { %v11305_v6 = vmax.f32 %v2738_v5, 0.0  ;;  %v2696_v37 = vadd.f32 %v2695_v16, %v2672_v34 }
 0x313   : > { %v3436_v59 = vrot.slane %v11305_v6, 1  ;;  %v3438_v29 = vrot.slane %v11305_v6, 2  ;;  %v3440_v3 = vrot.slane %v11305_v6, 3  ;;  %v3442_v44 = vrot.slane %v11305_v6, 4 }
 0x314   : > { %v3444_v42 = vrot.slane %v11305_v6, 5  ;;  %v3446_v7 = vrot.slane %v11305_v6, 6  ;;  %v3471_v56 = vpack.c.bf16 %v11305_v6, %v1206_v55  ;;  %v2652_v15 = vpop.f32.mrf.mxu0  ;;  %v2720_v40 = vadd.f32 %v2719_v48, %v2696_v37 }
 0x315   : > { %v3472_v33 = vpack.c.bf16 %v3438_v29, %v3436_v59  ;;  %v3473_v31 = vpack.c.bf16 %v3442_v44, %v3440_v3  ;;  %v2653_v39 = vadd.f32 %v2652_v15, %v2629_v35  ;;  %v3448_v16 = vrot.slane %v11305_v6, 7 }
 0x316   : > { %v3474_v43 = vpack.c.bf16 %v3446_v7, %v3444_v42  ;;  %v3509_v49 = vrot.slane %v3471_v56, 3  ;;  %v2733_v60 = vmax.f32 %v11279_v63, %v2720_v40  ;;  %v2676_v53 = vpop.f32.mrf.mxu1  ;;  %v2722_v47 = vpop.f32.mrf.mxu3 }
 0x317   : > { %v3510_v22 = vrot.slane %v3472_v33, 6  ;;  %v3511_v50 = vrot.slane %v3472_v33, 1  ;;  %v3512_v17 = vrot.slane %v3473_v31, 4  ;;  %v3513_v61 = vrot.slane %v3473_v31, 7 }
 0x318   : > { %v3514_v46 = vrot.slane %v3474_v43, 2  ;;  %v3515_v38 = vrot.slane %v3474_v43, 5  ;;  %v2698_v32 = vpop.f32.mrf.mxu2  ;;  %v3555_v19 = vsel %vm12241_vm12, %v3471_v56, %v3509_v49  ;;  %v2739_v63 = vadd.f32 %v11148_v10, %v2733_v60 }
 0x319   : > { %v3558_v25 = vsel %vm2874_vm3, %v3510_v22, %v3511_v50  ;;  %v3562_v58 = vsel %vm2880_vm4, %v3512_v17, %v3513_v61  ;;  %v2699_v26 = vadd.f32 %v2698_v32, %v2675_v0  ;;  %v2677_v55 = vadd.f32 %v2676_v53, %v2653_v39 }
 0x31a   : > { %v3559_v8 = vsel %vm2878_vm5, %v3555_v19, %v3558_v25  ;;  %v3565_v41 = vsel %vm12242_vm9, %v3514_v46, %v3515_v38  ;;  %v2745_v18 = vmax.f32 %v2739_v63, 0.0  ;;  %v3402_v25 = vld [vmem:[#allocation2 + $0x38] sm:$0xff] }
 0x31b   : > { %v3566_v5 = vsel %vm2888_vm10, %v3562_v58, %v3565_v41  ;;  %v2723_v34 = vadd.f32 %v2722_v47, %v2699_v26 }
 0x31c   : > { %v3567_v11 = vsel %vm12244_vm2, %v3559_v8, %v3566_v5  ;;  %v2655_v9 = vpop.f32.mrf.mxu0  ;;  %v3451_v59 = vrot.slane %v2745_v18, 1  ;;  %v3453_v36 = vrot.slane %v2745_v18, 2  ;;  %v3455_v29 = vrot.slane %v2745_v18, 3 }
 0x31d   : > { %v3587_v37 = vshll.u32 %v3567_v11, 16  ;;  %v2734_v48 = vmax.f32 %v11281_v14, %v2723_v34  ;;  %v2656_v62 = vadd.f32 %v2655_v9, %v2632_v51  ;;  %v3457_v45 = vrot.slane %v2745_v18, 4  ;;  %v11343_v34 = vld [vmem:[#allocation1 + $0x3] ss:$4 sm:$0xff] }
 0x31e   : > { %v3459_v54 = vrot.slane %v2745_v18, 5  ;;  %v3461_v21 = vrot.slane %v2745_v18, 6  ;;  %v3475_v42 = vpack.c.bf16 %v2745_v18, %v3448_v16  ;;  %v3476_v6 = vpack.c.bf16 %v3453_v36, %v3451_v59  ;;  %v2724_v40 = vpop.f32.mrf.mxu3  ;;  %v2679_v22 = vpop.f32.mrf.mxu1 }
 0x31f   : > { %v3602_v44 = vsel %vm10456_vm14, %v3587_v37, %v3400_v57  ;;  %v3477_v7 = vpack.c.bf16 %v3457_v45, %v3455_v29  ;;  %v2740_v56 = vadd.f32 %v11148_v10, %v2734_v48  ;;  %v2634_v14 = vadd.f32 %v11297_v24, %v2610_v4 }
 0x320   : > { %3603 = vst [vmem:[#allocation2 + $0x30] sm:$0xff] %v3602_v44  ;;  %v2700_v15 = vpop.f32.mrf.mxu2  ;;  %v3478_v35 = vpack.c.bf16 %v3461_v21, %v3459_v54  ;;  %v3516_v33 = vrot.slane %v3475_v42, 3  ;;  %v3517_v12 = vrot.slane %v3476_v6, 6  ;;  %v3518_v43 = vrot.slane %v3476_v6, 1 }
 0x321   : > { %v2701_v31 = vadd.f32 %v2700_v15, %v2677_v55  ;;  %v3519_v49 = vrot.slane %v3477_v7, 4  ;;  %v3520_v0 = vrot.slane %v3477_v7, 7  ;;  %v2746_v61 = vmax.f32 %v2740_v56, 0.0 }
 0x322   : > { %v3521_v50 = vrot.slane %v3478_v35, 2  ;;  %v3522_v17 = vrot.slane %v3478_v35, 5  ;;  %v2680_v2 = vadd.f32 %v2679_v22, %v2656_v62  ;;  %v3570_v46 = vsel %vm12246_vm1, %v3475_v42, %v3516_v33  ;;  %v3740_v33 = vld [vmem:[#allocation2 + $0x40] sm:$0xff] }
 0x323   : > { %v3573_v38 = vsel %vm2874_vm3, %v3517_v12, %v3518_v43  ;;  %v3577_v60 = vsel %vm2880_vm4, %v3519_v49, %v3520_v0  ;;  %v2725_v24 = vadd.f32 %v2724_v40, %v2701_v31  ;;  %v3753_v53 = vrot.slane %v2746_v61, 1  ;;  %v3718_v22 = vld [vmem:[#allocation1 + $0x23] ss:$4 sm:$0xff] }
 0x324   : > { %v3574_v32 = vsel %vm2878_vm5, %v3570_v46, %v3573_v38  ;;  %v3580_v39 = vsel %vm12247_vm15, %v3521_v50, %v3522_v17  ;;  %v3755_v19 = vrot.slane %v2746_v61, 2  ;;  %v3757_v26 = vrot.slane %v2746_v61, 3  ;;  %v2657_v8 = vpop.f32.mrf.mxu0 }
 0x325   : > { %v3581_v58 = vsel %vm2888_vm10, %v3577_v60, %v3580_v39  ;;  %v3759_v47 = vrot.slane %v2746_v61, 4  ;;  %v3761_v27 = vrot.slane %v2746_v61, 5  ;;  %v3763_v63 = vrot.slane %v2746_v61, 6 }
 0x326   : > { %v3582_v41 = vsel %vm12248_vm6, %v3574_v32, %v3581_v58  ;;  %v3765_v57 = vrot.slane %v2746_v61, 7  ;;  %v3810_v51 = vpack.c.bf16 %v3753_v53, %v2745_v18  ;;  %v3811_v4 = vpack.c.bf16 %v3757_v26, %v3755_v19  ;;  %v2727_v62 = vpop.f32.mrf.mxu3  ;;  %v2681_v45 = vpop.f32.mrf.mxu1 }
 0x327   : > { %v3589_v5 = vshll.u32 %v3582_v41, 16  ;;  %v3812_v16 = vpack.c.bf16 %v3761_v27, %v3759_v47  ;;  %v2735_v11 = vmax.f32 %v11283_v28, %v2725_v24  ;;  %v3403_v37 = vsel %vm10189_vm13, %v11221_v20, %v3402_v25  ;;  %v8561_v27 = vld [vmem:[#allocation10] ss:$0 sm:$0xff]  ;;  %v3743_v41 = vld [vmem:[#allocation2 + $0x48] sm:$0xff] }
 0x328   : > { %v2703_v9 = vpop.f32.mrf.mxu2  ;;  %v3813_v48 = vpack.c.bf16 %v3765_v57, %v3763_v63  ;;  %3827 = vst [vmem:[#allocation1] sm:$0xff] %v3810_v51  ;;  %v2658_v59 = vadd.f32 %v2657_v8, %v2634_v14  ;;  %v3719_v20 = vshrl.u32 %v11248_v30, 16  ;;  %v3723_v47 = vshrl.u32 %v11253_v52, 16 }
 0x329   : > { %v2704_v55 = vadd.f32 %v2703_v9, %v2680_v2  ;;  %v3605_v18 = vsel %vm10456_vm14, %v3589_v5, %v3403_v37  ;;  %3829 = vst [vmem:[#allocation1 + $0x8] sm:$0xff] %v3811_v4  ;;  %v2741_v36 = vadd.f32 %v11148_v10, %v2735_v11 }
 0x32a   : > { %3606 = vst [vmem:[#allocation2 + $0x38] sm:$0xff] %v3605_v18  ;;  %v2682_v54 = vadd.f32 %v2681_v45, %v2658_v59  ;;  %v3741_v30 = vsel %vm10189_vm13, %v3719_v20, %v3740_v33  ;;  %v3744_v57 = vsel %vm10189_vm13, %v3723_v47, %v3743_v41  ;;  %v3749_v45 = vld [vmem:[#allocation2 + $0x58] sm:$0xff] }
 0x32b   : > { %v2728_v29 = vadd.f32 %v2727_v62, %v2704_v55  ;;  %3831 = vst [vmem:[#allocation1 + $0x10] sm:$0xff] %v3812_v16  ;;  %v2747_v28 = vmax.f32 %v2741_v36, 0.0 }
 0x32c   : > { %3833 = vst [vmem:[#allocation1 + $0x18] sm:$0xff] %v3813_v48  ;;  %v3746_v48 = vld [vmem:[#allocation2 + $0x50] sm:$0xff] }
 0x32d   : > { %v2736_v44 = vmax.f32 %v11285_v23, %v2728_v29  ;;  %v3768_v21 = vrot.slane %v2747_v28, 1  ;;  %v3770_v42 = vrot.slane %v2747_v28, 2  ;;  %v3772_v6 = vrot.slane %v2747_v28, 3 }
 0x32e   : > { %v3774_v7 = vrot.slane %v2747_v28, 4  ;;  %v3776_v56 = vrot.slane %v2747_v28, 5  ;;  %v3778_v15 = vrot.slane %v2747_v28, 6  ;;  %v3780_v14 = vrot.slane %v2747_v28, 7  ;;  %v2729_v38 = vpop.f32.mrf.mxu3 }
 0x32f   : > { %v2742_v35 = vadd.f32 %v11148_v10, %v2736_v44  ;;  %v3814_v31 = vpack.c.bf16 %v3768_v21, %v2746_v61  ;;  %v3815_v40 = vpack.c.bf16 %v3772_v6, %v3770_v42 }
 0x330   : > { %v2705_v12 = vpop.f32.mrf.mxu2  ;;  %v3816_v43 = vpack.c.bf16 %v3776_v56, %v3774_v7  ;;  %v3817_v49 = vpack.c.bf16 %v3780_v14, %v3778_v15 }
 0x331   : > { %v2748_v0 = vmax.f32 %v2742_v35, 0.0  ;;  %v2706_v23 = vadd.f32 %v2705_v12, %v2682_v54  ;;  %3835 = vst [vmem:[#allocation1 + $0x20] sm:$0xff] %v3814_v31 }
 0x332   : > { %3837 = vst [vmem:[#allocation1 + $0x28] sm:$0xff] %v3815_v40 }
 0x333   : > { %v3783_v50 = vrot.slane %v2748_v0, 1  ;;  %v3785_v17 = vrot.slane %v2748_v0, 2  ;;  %v3787_v2 = vrot.slane %v2748_v0, 3  ;;  %v3789_v46 = vrot.slane %v2748_v0, 4  ;;  %v3843_v24 = vld [vmem:[#allocation1 + $0x3] ss:$4 sm:$0xff] }
 0x334   : > { %v3791_v10 = vrot.slane %v2748_v0, 5  ;;  %v3793_v60 = vrot.slane %v2748_v0, 6  ;;  %v3795_v61 = vrot.slane %v2748_v0, 7  ;;  %v2730_v32 = vadd.f32 %v2729_v38, %v2706_v23  ;;  %3839 = vst [vmem:[#allocation1 + $0x30] sm:$0xff] %v3816_v43 }
 0x335   : > { %v3818_v39 = vpack.c.bf16 %v3783_v50, %v2747_v28  ;;  %v3819_v53 = vpack.c.bf16 %v3787_v2, %v3785_v17  ;;  %v3869_v19 = vsel %vm10456_vm14, %v3843_v24, %v3741_v30  ;;  %3841 = vst [vmem:[#allocation1 + $0x38] sm:$0xff] %v3817_v49  ;;  %v3731_v28 = vshrl.u32 %v3718_v22, 16 }
 0x336   : > { %v3820_v25 = vpack.c.bf16 %v3791_v10, %v3789_v46  ;;  %v3821_v58 = vpack.c.bf16 %v3795_v61, %v3793_v60  ;;  %3870 = vst [vmem:[#allocation2 + $0x40] sm:$0xff] %v3869_v19  ;;  %v2737_v26 = vmax.f32 %v11287_v1, %v2730_v32  ;;  %v3727_v1 = vshrl.u32 %v11343_v34, 16 }
 0x337   : > { %3847 = vst [vmem:[#allocation1] sm:$0xff] %v3818_v39  ;;  %v3750_v44 = vsel %vm10189_vm13, %v3731_v28, %v3749_v45 }
 0x338   : > { %3849 = vst [vmem:[#allocation1 + $0x8] sm:$0xff] %v3819_v53  ;;  %v2743_v8 = vadd.f32 %v8561_v27, %v2737_v26  ;;  %v3747_v36 = vsel %vm10189_vm13, %v3727_v1, %v3746_v48 }
 0x339   : > { %3851 = vst [vmem:[#allocation1 + $0x10] sm:$0xff] %v3820_v25 }
 0x33a   : > { %3853 = vst [vmem:[#allocation1 + $0x18] sm:$0xff] %v3821_v58  ;;  %v2749_v63 = vmax.f32 %v2743_v8, 0.0 }
 0x33c   : > { %v3798_v51 = vrot.slane %v2749_v63, 1  ;;  %v3800_v5 = vrot.slane %v2749_v63, 2  ;;  %v3802_v4 = vrot.slane %v2749_v63, 3  ;;  %v3804_v16 = vrot.slane %v2749_v63, 4  ;;  %v3845_v11 = vld [vmem:[#allocation1 + $0x23] ss:$4 sm:$0xff] }
 0x33d   : > { %v3806_v9 = vrot.slane %v2749_v63, 5  ;;  %v3808_v37 = vrot.slane %v2749_v63, 6  ;;  %v3872_v52 = vsel %vm10456_vm14, %v3845_v11, %v3744_v57 }
 0x33e   : > { %v3822_v55 = vpack.c.bf16 %v3798_v51, %v2748_v0  ;;  %v3823_v62 = vpack.c.bf16 %v3802_v4, %v3800_v5  ;;  %3873 = vst [vmem:[#allocation2 + $0x48] sm:$0xff] %v3872_v52 }
 0x33f   : > { %v3824_v59 = vpack.c.bf16 %v3806_v9, %v3804_v16  ;;  %v3825_v18 = vpack.c.bf16 0.0, %v3808_v37 }
 0x340   : > { %3855 = vst [vmem:[#allocation1 + $0x20] sm:$0xff] %v3822_v55 }
 0x341   : > { %v3862_v29 = vld [vmem:[#allocation1 + $0x3] ss:$4 sm:$0xff]  ;;  %3857 = vst [vmem:[#allocation1 + $0x28] sm:$0xff] %v3823_v62 }
 0x342   : > { %v3875_v34 = vsel %vm10456_vm14, %v3862_v29, %v3747_v36  ;;  %3859 = vst [vmem:[#allocation1 + $0x30] sm:$0xff] %v3824_v59 }
 0x343   : > { %3876 = vst [vmem:[#allocation2 + $0x50] sm:$0xff] %v3875_v34 }
 0x344   : > { %3861 = vst [vmem:[#allocation1 + $0x38] sm:$0xff] %v3825_v18 }
 0x34b   : > { %v3863_v20 = vld [vmem:[#allocation1 + $0x23] ss:$4 sm:$0xff] }
 0x34c   : > { %v3878_v54 = vsel %vm10456_vm14, %v3863_v20, %v3750_v44 }
 0x34d   : > { %3879 = vst [vmem:[#allocation2 + $0x58] sm:$0xff] %v3878_v54 }
 0x34e PF: > { %v8111_v21 = vld [vmem:[%s9064_s12 + $0x38] sm:$0xff]  ;;  %v8110_v3 = vld [vmem:[%s9064_s12 + $0x30] sm:$0xff]  ;;  %v8109_v14 = vld [vmem:[%s9064_s12 + $0x28] sm:$0xff]  ;;  %s6985_s21 = sshll.u32 %s8951_s20, 5  ;;  %p8010_p1 = scmp.ne.s32.totalorder %s8951_s20, 2 }
 0x34f   : > { %v8119_v42 = vld [vmem:[%s9064_s12 + $0x78] sm:$0xff]  ;;  %6007 = vmatpush.bf16.msra.mxu0 %v8111_v21  ;;  %v8118_v7 = vld [vmem:[%s9064_s12 + $0x70] sm:$0xff]  ;;  %v8117_v35 = vld [vmem:[%s9064_s12 + $0x68] sm:$0xff]  ;;  %s11395_s30 = scalar_lea.vmem [#allocation2], %s6985_s21 }
 0x350   : > { %v8127_v13 = vld [vmem:[%s9064_s12 + $0xb8] sm:$0xff]  ;;  %6020 = vmatpush.bf16.msra.mxu1 %v8119_v42  ;;  %v8126_v56 = vld [vmem:[%s9064_s12 + $0xb0] sm:$0xff]  ;;  %v8125_v33 = vld [vmem:[%s9064_s12 + $0xa8] sm:$0xff] }
 0x351   : > { %v8135_v6 = vld [vmem:[%s9064_s12 + $0xf8] sm:$0xff]  ;;  %6033 = vmatpush.bf16.msra.mxu2 %v8127_v13  ;;  %v8134_v15 = vld [vmem:[%s9064_s12 + $0xf0] sm:$0xff]  ;;  %v8133_v31 = vld [vmem:[%s9064_s12 + $0xe8] sm:$0xff] }
 0x352   : > { %6046 = vmatpush.bf16.msra.mxu3 %v8135_v6  ;;  %v8108_v40 = vld [vmem:[%s9064_s12 + $0x20] sm:$0xff]  ;;  %v8107_v0 = vld [vmem:[%s9064_s12 + $0x18] sm:$0xff]  ;;  %v8106_v17 = vld [vmem:[%s9064_s12 + $0x10] sm:$0xff] }
 0x353   : > { %6008 = vmatpush.bf16.msra.mxu0 %v8110_v3  ;;  %v8116_v12 = vld [vmem:[%s9064_s12 + $0x60] sm:$0xff]  ;;  %v8115_v23 = vld [vmem:[%s9064_s12 + $0x58] sm:$0xff]  ;;  %v8114_v2 = vld [vmem:[%s9064_s12 + $0x50] sm:$0xff] }
 0x354   : > { %6021 = vmatpush.bf16.msra.mxu1 %v8118_v7  ;;  %v8124_v43 = vld [vmem:[%s9064_s12 + $0xa0] sm:$0xff]  ;;  %v8123_v22 = vld [vmem:[%s9064_s12 + $0x98] sm:$0xff]  ;;  %v8122_v46 = vld [vmem:[%s9064_s12 + $0x90] sm:$0xff] }
 0x355   : > { %6034 = vmatpush.bf16.msra.mxu2 %v8126_v56  ;;  %v8132_v49 = vld [vmem:[%s9064_s12 + $0xe0] sm:$0xff]  ;;  %v8131_v30 = vld [vmem:[%s9064_s12 + $0xd8] sm:$0xff]  ;;  %v8130_v38 = vld [vmem:[%s9064_s12 + $0xd0] sm:$0xff] }
 0x356   : > { %6047 = vmatpush.bf16.msra.mxu3 %v8134_v15  ;;  %v3883_v50 = vld [vmem:[%s11395_s30] sm:$0xff]  ;;  %v8105_v10 = vld [vmem:[%s9064_s12 + $0x8] sm:$0xff]  ;;  %v8104_v32 = vld [vmem:[%s9064_s12] sm:$0xff] }
 0x357   : > { %6009 = vmatpush.bf16.msra.mxu0 %v8109_v14  ;;  %4400 = vst [vmem:[#allocation1] ss:$9 sm:$0xff] %v3883_v50  ;;  %v8113_v60 = vld [vmem:[%s9064_s12 + $0x48] sm:$0xff]  ;;  %v8112_v39 = vld [vmem:[%s9064_s12 + $0x40] sm:$0xff]  ;;  %v8143_v25 = vld [vmem:[%s9064_s12 + $0x138] sm:$0xff] }
 0x358   : > { %6022 = vmatpush.bf16.msra.mxu1 %v8117_v35  ;;  %v8121_v61 = vld [vmem:[%s9064_s12 + $0x88] sm:$0xff]  ;;  %v8120_v53 = vld [vmem:[%s9064_s12 + $0x80] sm:$0xff]  ;;  %v8151_v58 = vld [vmem:[%s9064_s12 + $0x178] sm:$0xff] }
 0x359   : > { %6035 = vmatpush.bf16.msra.mxu2 %v8125_v33  ;;  %v8129_v24 = vld [vmem:[%s9064_s12 + $0xc8] sm:$0xff]  ;;  %v8128_v19 = vld [vmem:[%s9064_s12 + $0xc0] sm:$0xff]  ;;  %v8159_v26 = vld [vmem:[%s9064_s12 + $0x1b8] sm:$0xff] }
 0x35a   : > { %6048 = vmatpush.bf16.msra.mxu3 %v8133_v31  ;;  %v8167_v47 = vld [vmem:[%s9064_s12 + $0x1f8] sm:$0xff]  ;;  %v8142_v27 = vld [vmem:[%s9064_s12 + $0x130] sm:$0xff]  ;;  %v8141_v16 = vld [vmem:[%s9064_s12 + $0x128] sm:$0xff] }
 0x35b   : > { %6010 = vmatpush.bf16.msra.mxu0 %v8108_v40  ;;  %v8150_v63 = vld [vmem:[%s9064_s12 + $0x170] sm:$0xff]  ;;  %v8149_v11 = vld [vmem:[%s9064_s12 + $0x168] sm:$0xff]  ;;  %v3884_v37 = vld [vmem:[%s11395_s30 + $0x8] sm:$0xff] }
 0x35c   : > { %6023 = vmatpush.bf16.msra.mxu1 %v8116_v12  ;;  %v8158_v5 = vld [vmem:[%s9064_s12 + $0x1b0] sm:$0xff]  ;;  %v8157_v1 = vld [vmem:[%s9064_s12 + $0x1a8] sm:$0xff]  ;;  %v8140_v59 = vld [vmem:[%s9064_s12 + $0x120] sm:$0xff] }
 0x35d   : > { %6036 = vmatpush.bf16.msra.mxu2 %v8124_v43  ;;  %v8166_v4 = vld [vmem:[%s9064_s12 + $0x1f0] sm:$0xff]  ;;  %v8165_v9 = vld [vmem:[%s9064_s12 + $0x1e8] sm:$0xff]  ;;  %v8148_v18 = vld [vmem:[%s9064_s12 + $0x160] sm:$0xff] }
 0x35e   : > { %6049 = vmatpush.bf16.msra.mxu3 %v8132_v49  ;;  %v4403_v8 = vld [vmem:[#allocation1 + $0x12] sm:$0xff]  ;;  %v4401_v41 = vld [vmem:[#allocation1] sm:$0xff]  ;;  %v4402_v51 = vld [vmem:[#allocation1 + $0x9] sm:$0xff] }
 0x35f   : > { %6011 = vmatpush.bf16.msra.mxu0 %v8107_v0  ;;  %v4404_v57 = vld [vmem:[#allocation1 + $0x1b] sm:$0xff]  ;;  %v4405_v48 = vld [vmem:[#allocation1 + $0x24] sm:$0xff]  ;;  %v4406_v62 = vld [vmem:[#allocation1 + $0x2d] sm:$0xff] }
 0x360   : > { %6024 = vmatpush.bf16.msra.mxu1 %v8115_v23  ;;  %v4407_v52 = vld [vmem:[#allocation1 + $0x36] sm:$0xff]  ;;  %v4408_v55 = vld [vmem:[#allocation1 + $0x3f] sm:$0xff]  ;;  %v8156_v36 = vld [vmem:[%s9064_s12 + $0x1a0] sm:$0xff] }
 0x361   : > { %6037 = vmatpush.bf16.msra.mxu2 %v8123_v22  ;;  %4410 = vst [vmem:[#allocation1] ss:$9 sm:$0xff] %v3884_v37  ;;  %v8164_v29 = vld [vmem:[%s9064_s12 + $0x1e0] sm:$0xff]  ;;  %v8139_v34 = vld [vmem:[%s9064_s12 + $0x118] sm:$0xff]  ;;  %v8138_v20 = vld [vmem:[%s9064_s12 + $0x110] sm:$0xff] }
 0x362   : > { %6050 = vmatpush.bf16.msra.mxu3 %v8131_v30  ;;  %v8147_v28 = vld [vmem:[%s9064_s12 + $0x158] sm:$0xff]  ;;  %v8146_v54 = vld [vmem:[%s9064_s12 + $0x150] sm:$0xff]  ;;  %v8137_v13 = vld [vmem:[%s9064_s12 + $0x108] sm:$0xff] }
 0x363   : > { %6012 = vmatpush.bf16.msra.mxu0 %v8106_v17  ;;  %v8155_v45 = vld [vmem:[%s9064_s12 + $0x198] sm:$0xff]  ;;  %v8154_v21 = vld [vmem:[%s9064_s12 + $0x190] sm:$0xff]  ;;  %v8145_v6 = vld [vmem:[%s9064_s12 + $0x148] sm:$0xff] }
 0x364   : > { %6025 = vmatpush.bf16.msra.mxu1 %v8114_v2  ;;  %v8163_v44 = vld [vmem:[%s9064_s12 + $0x1d8] sm:$0xff]  ;;  %v8162_v42 = vld [vmem:[%s9064_s12 + $0x1d0] sm:$0xff]  ;;  %v8153_v3 = vld [vmem:[%s9064_s12 + $0x188] sm:$0xff] }
 0x365   : > { %6038 = vmatpush.bf16.msra.mxu2 %v8122_v46  ;;  %v8161_v7 = vld [vmem:[%s9064_s12 + $0x1c8] sm:$0xff]  ;;  %v8136_v56 = vld [vmem:[%s9064_s12 + $0x100] sm:$0xff]  ;;  %v8175_v33 = vld [vmem:[%s9064_s12 + $0x238] sm:$0xff] }
 0x366   : > { %6051 = vmatpush.bf16.msra.mxu3 %v8130_v38  ;;  %v8144_v15 = vld [vmem:[%s9064_s12 + $0x140] sm:$0xff]  ;;  %v8183_v31 = vld [vmem:[%s9064_s12 + $0x278] sm:$0xff]  ;;  %v8174_v43 = vld [vmem:[%s9064_s12 + $0x230] sm:$0xff] }
 0x367   : > { %6013 = vmatpush.bf16.msra.mxu0 %v8105_v10  ;;  %v8152_v14 = vld [vmem:[%s9064_s12 + $0x180] sm:$0xff]  ;;  %v8191_v40 = vld [vmem:[%s9064_s12 + $0x2b8] sm:$0xff]  ;;  %v8182_v49 = vld [vmem:[%s9064_s12 + $0x270] sm:$0xff] }
 0x368   : > { %6026 = vmatpush.bf16.msra.mxu1 %v8113_v60  ;;  %v8160_v35 = vld [vmem:[%s9064_s12 + $0x1c0] sm:$0xff]  ;;  %v8199_v12 = vld [vmem:[%s9064_s12 + $0x2f8] sm:$0xff]  ;;  %v8190_v0 = vld [vmem:[%s9064_s12 + $0x2b0] sm:$0xff] }
 0x369   : > { %6039 = vmatpush.bf16.msra.mxu2 %v8121_v61  ;;  %v8198_v23 = vld [vmem:[%s9064_s12 + $0x2f0] sm:$0xff]  ;;  %v8173_v22 = vld [vmem:[%s9064_s12 + $0x228] sm:$0xff]  ;;  %v8172_v2 = vld [vmem:[%s9064_s12 + $0x220] sm:$0xff] }
 0x36a   : > { %6052 = vmatpush.bf16.msra.mxu3 %v8129_v24  ;;  %v8181_v30 = vld [vmem:[%s9064_s12 + $0x268] sm:$0xff]  ;;  %v8180_v46 = vld [vmem:[%s9064_s12 + $0x260] sm:$0xff]  ;;  %v8171_v60 = vld [vmem:[%s9064_s12 + $0x218] sm:$0xff] }
 0x36b   : > { %6014 = vmatpush.bf16.msra.mxu0 %v8104_v32  ;;  %v8189_v50 = vld [vmem:[%s9064_s12 + $0x2a8] sm:$0xff]  ;;  %v8188_v38 = vld [vmem:[%s9064_s12 + $0x2a0] sm:$0xff]  ;;  %v8179_v61 = vld [vmem:[%s9064_s12 + $0x258] sm:$0xff] }
 0x36c   : > { %6027 = vmatpush.bf16.msra.mxu1 %v8112_v39  ;;  %v8197_v17 = vld [vmem:[%s9064_s12 + $0x2e8] sm:$0xff]  ;;  %v8196_v10 = vld [vmem:[%s9064_s12 + $0x2e0] sm:$0xff]  ;;  %v8187_v24 = vld [vmem:[%s9064_s12 + $0x298] sm:$0xff] }
 0x36d   : > { %6040 = vmatpush.bf16.msra.mxu2 %v8120_v53  ;;  %v8195_v32 = vld [vmem:[%s9064_s12 + $0x2d8] sm:$0xff]  ;;  %v8170_v39 = vld [vmem:[%s9064_s12 + $0x210] sm:$0xff] }
 0x36e   : > { %6053 = vmatpush.bf16.msra.mxu3 %v8128_v19  ;;  %6015 = vmatmul.bf16.vlgmr.msra.gmra.mxu0 %v4401_v41  ;;  %v8178_v53 = vld [vmem:[%s9064_s12 + $0x250] sm:$0xff]  ;;  %v8176_v41 = vld [vmem:[%s9064_s12 + $0x240] sm:$0xff] }
 0x36f   : > { %6059 = vmatpush.bf16.msrb.mxu0 %v8143_v25  ;;  %6028 = vmatmul.bf16.vlgmr.msra.gmra.mxu1 %v4402_v51  ;;  %v8186_v19 = vld [vmem:[%s9064_s12 + $0x290] sm:$0xff]  ;;  %v8207_v51 = vld [vmem:[%s9064_s12 + $0x338] sm:$0xff] }
 0x370   : > { %6072 = vmatpush.bf16.msrb.mxu1 %v8151_v58  ;;  %6041 = vmatmul.bf16.vlgmr.msra.gmra.mxu2 %v4403_v8  ;;  %v8194_v25 = vld [vmem:[%s9064_s12 + $0x2d0] sm:$0xff]  ;;  %v8169_v58 = vld [vmem:[%s9064_s12 + $0x208] sm:$0xff]  ;;  %v8168_v8 = vld [vmem:[%s9064_s12 + $0x200] sm:$0xff] }
 0x371   : > { %6085 = vmatpush.bf16.msrb.mxu2 %v8159_v26  ;;  %6054 = vmatmul.bf16.vlgmr.msra.gmra.mxu3 %v4404_v57  ;;  %v8177_v26 = vld [vmem:[%s9064_s12 + $0x248] sm:$0xff]  ;;  %v8192_v57 = vld [vmem:[%s9064_s12 + $0x2c0] sm:$0xff] }
 0x372   : > { %6098 = vmatpush.bf16.msrb.mxu3 %v8167_v47  ;;  %v8185_v47 = vld [vmem:[%s9064_s12 + $0x288] sm:$0xff]  ;;  %v4412_v37 = vld [vmem:[#allocation1 + $0x9] sm:$0xff] }
 0x373   : > { %6060 = vmatpush.bf16.msrb.mxu0 %v8142_v27  ;;  %v8193_v27 = vld [vmem:[%s9064_s12 + $0x2c8] sm:$0xff] }
 0x374   : > { %6073 = vmatpush.bf16.msrb.mxu1 %v8150_v63  ;;  %v8184_v63 = vld [vmem:[%s9064_s12 + $0x280] sm:$0xff] }
 0x375   : > { %6086 = vmatpush.bf16.msrb.mxu2 %v8158_v5  ;;  %v8215_v5 = vld [vmem:[%s9064_s12 + $0x378] sm:$0xff] }
 0x376   : > { %6099 = vmatpush.bf16.msrb.mxu3 %v8166_v4  ;;  %v3885_v4 = vld [vmem:[%s11395_s30 + $0x10] sm:$0xff] }
 0x377   : > { %6061 = vmatpush.bf16.msrb.mxu0 %v8141_v16  ;;  %v8223_v16 = vld [vmem:[%s9064_s12 + $0x3b8] sm:$0xff] }
 0x378   : > { %6074 = vmatpush.bf16.msrb.mxu1 %v8149_v11  ;;  %v8231_v11 = vld [vmem:[%s9064_s12 + $0x3f8] sm:$0xff] }
 0x379   : > { %6087 = vmatpush.bf16.msrb.mxu2 %v8157_v1  ;;  %v4411_v1 = vld [vmem:[#allocation1] sm:$0xff] }
 0x37a   : > { %6100 = vmatpush.bf16.msrb.mxu3 %v8165_v9  ;;  %v4413_v9 = vld [vmem:[#allocation1 + $0x12] sm:$0xff] }
 0x37b   : > { %6062 = vmatpush.bf16.msrb.mxu0 %v8140_v59  ;;  %v8230_v59 = vld [vmem:[%s9064_s12 + $0x3f0] sm:$0xff] }
 0x37c   : > { %6075 = vmatpush.bf16.msrb.mxu1 %v8148_v18  ;;  %v11484_v18 = vld [vmem:[#allocation1 + $0x24] sm:$0xff] }
 0x37d   : > { %6088 = vmatpush.bf16.msrb.mxu2 %v8156_v36  ;;  %v11486_v36 = vld [vmem:[#allocation1 + $0x36] sm:$0xff] }
 0x37e   : > { %6101 = vmatpush.bf16.msrb.mxu3 %v8164_v29  ;;  %v11488_v29 = vld [vmem:[#allocation1 + $0x2d] sm:$0xff] }
 0x37f   : > { %6063 = vmatpush.bf16.msrb.mxu0 %v8139_v34  ;;  %v11490_v34 = vld [vmem:[#allocation1 + $0x3f] sm:$0xff] }
 0x380   : > { %6076 = vmatpush.bf16.msrb.mxu1 %v8147_v28  ;;  %v8205_v28 = vld [vmem:[%s9064_s12 + $0x328] sm:$0xff] }
 0x381   : > { %6089 = vmatpush.bf16.msrb.mxu2 %v8155_v45  ;;  %v8213_v45 = vld [vmem:[%s9064_s12 + $0x368] sm:$0xff] }
 0x382   : > { %6102 = vmatpush.bf16.msrb.mxu3 %v8163_v44  ;;  %v8221_v44 = vld [vmem:[%s9064_s12 + $0x3a8] sm:$0xff] }
 0x383   : > { %6064 = vmatpush.bf16.msrb.mxu0 %v8138_v20  ;;  %v8229_v20 = vld [vmem:[%s9064_s12 + $0x3e8] sm:$0xff] }
 0x384   : > { %6077 = vmatpush.bf16.msrb.mxu1 %v8146_v54  ;;  %v8204_v54 = vld [vmem:[%s9064_s12 + $0x320] sm:$0xff] }
 0x385   : > { %6090 = vmatpush.bf16.msrb.mxu2 %v8154_v21  ;;  %v8212_v21 = vld [vmem:[%s9064_s12 + $0x360] sm:$0xff] }
 0x386   : > { %6103 = vmatpush.bf16.msrb.mxu3 %v8162_v42  ;;  %v8220_v42 = vld [vmem:[%s9064_s12 + $0x3a0] sm:$0xff] }
 0x387   : > { %6065 = vmatpush.bf16.msrb.mxu0 %v8137_v13  ;;  %v8228_v13 = vld [vmem:[%s9064_s12 + $0x3e0] sm:$0xff] }
 0x388   : > { %6078 = vmatpush.bf16.msrb.mxu1 %v8145_v6  ;;  %v8203_v6 = vld [vmem:[%s9064_s12 + $0x318] sm:$0xff] }
 0x389   : > { %6091 = vmatpush.bf16.msrb.mxu2 %v8153_v3  ;;  %v8211_v3 = vld [vmem:[%s9064_s12 + $0x358] sm:$0xff] }
 0x38a   : > { %6104 = vmatpush.bf16.msrb.mxu3 %v8161_v7  ;;  %v8219_v7 = vld [vmem:[%s9064_s12 + $0x398] sm:$0xff] }
 0x38b   : > { %6066 = vmatpush.bf16.msrb.mxu0 %v8136_v56  ;;  %v8227_v56 = vld [vmem:[%s9064_s12 + $0x3d8] sm:$0xff] }
 0x38c   : > { %6079 = vmatpush.bf16.msrb.mxu1 %v8144_v15  ;;  %v8202_v15 = vld [vmem:[%s9064_s12 + $0x310] sm:$0xff] }
 0x38d   : > { %6092 = vmatpush.bf16.msrb.mxu2 %v8152_v14  ;;  %v8210_v14 = vld [vmem:[%s9064_s12 + $0x350] sm:$0xff] }
 0x38e   : > { %6105 = vmatpush.bf16.msrb.mxu3 %v8160_v35  ;;  %6067 = vmatmul.bf16.vlgmr.msrb.gmra.mxu0 %v4405_v48  ;;  %v8206_v48 = vld [vmem:[%s9064_s12 + $0x330] sm:$0xff] }
 0x38f   : > { %6111 = vmatpush.bf16.msra.mxu0 %v8175_v33  ;;  %6080 = vmatmul.bf16.vlgmr.msrb.gmra.mxu1 %v4406_v62  ;;  %v8222_v62 = vld [vmem:[%s9064_s12 + $0x3b0] sm:$0xff] }
 0x390   : > { %6124 = vmatpush.bf16.msra.mxu1 %v8183_v31  ;;  %6093 = vmatmul.bf16.vlgmr.msrb.gmra.mxu2 %v4407_v52  ;;  %v4414_v52 = vld [vmem:[#allocation1 + $0x1b] sm:$0xff] }
 0x391   : > { %6137 = vmatpush.bf16.msra.mxu2 %v8191_v40  ;;  %6106 = vmatmul.bf16.vlgmr.msrb.gmra.mxu3 %v4408_v55  ;;  %v8214_v55 = vld [vmem:[%s9064_s12 + $0x370] sm:$0xff]  ;;  %4420 = vst [vmem:[#allocation1] ss:$9 sm:$0xff] %v3885_v4  ;;  %v8201_v31 = vld [vmem:[%s9064_s12 + $0x308] sm:$0xff] }
 0x392   : > { %6150 = vmatpush.bf16.msra.mxu3 %v8199_v12  ;;  %v8218_v35 = vld [vmem:[%s9064_s12 + $0x390] sm:$0xff]  ;;  %v8209_v40 = vld [vmem:[%s9064_s12 + $0x348] sm:$0xff] }
 0x393   : > { %6112 = vmatpush.bf16.msra.mxu0 %v8174_v43  ;;  %v8226_v33 = vld [vmem:[%s9064_s12 + $0x3d0] sm:$0xff]  ;;  %v8217_v12 = vld [vmem:[%s9064_s12 + $0x388] sm:$0xff] }
 0x394   : > { %6125 = vmatpush.bf16.msra.mxu1 %v8182_v49  ;;  %v8225_v43 = vld [vmem:[%s9064_s12 + $0x3c8] sm:$0xff]  ;;  %v8200_v49 = vld [vmem:[%s9064_s12 + $0x300] sm:$0xff] }
 0x395   : > { %6138 = vmatpush.bf16.msra.mxu2 %v8190_v0  ;;  %v8208_v0 = vld [vmem:[%s9064_s12 + $0x340] sm:$0xff]  ;;  %v8241_v4 = vld [vmem:[%s9064_s12 + $0x448] sm:$0xff] }
 0x396   : > { %6151 = vmatpush.bf16.msra.mxu3 %v8198_v23  ;;  %v8216_v23 = vld [vmem:[%s9064_s12 + $0x380] sm:$0xff] }
 0x397   : > { %6113 = vmatpush.bf16.msra.mxu0 %v8173_v22  ;;  %v8224_v22 = vld [vmem:[%s9064_s12 + $0x3c0] sm:$0xff] }
 0x398   : > { %6126 = vmatpush.bf16.msra.mxu1 %v8181_v30  ;;  %v8239_v30 = vld [vmem:[%s9064_s12 + $0x438] sm:$0xff] }
 0x399   : > { %6139 = vmatpush.bf16.msra.mxu2 %v8189_v50  ;;  %v8247_v50 = vld [vmem:[%s9064_s12 + $0x478] sm:$0xff] }
 0x39a   : > { %6152 = vmatpush.bf16.msra.mxu3 %v8197_v17  ;;  %v8255_v17 = vld [vmem:[%s9064_s12 + $0x4b8] sm:$0xff] }
 0x39b   : > { %6114 = vmatpush.bf16.msra.mxu0 %v8172_v2  ;;  %v8263_v2 = vld [vmem:[%s9064_s12 + $0x4f8] sm:$0xff] }
 0x39c   : > { %6127 = vmatpush.bf16.msra.mxu1 %v8180_v46  ;;  %v8238_v46 = vld [vmem:[%s9064_s12 + $0x430] sm:$0xff] }
 0x39d   : > { %6140 = vmatpush.bf16.msra.mxu2 %v8188_v38  ;;  %v8246_v38 = vld [vmem:[%s9064_s12 + $0x470] sm:$0xff] }
 0x39e   : > { %6153 = vmatpush.bf16.msra.mxu3 %v8196_v10  ;;  %v8254_v10 = vld [vmem:[%s9064_s12 + $0x4b0] sm:$0xff] }
 0x39f   : > { %6115 = vmatpush.bf16.msra.mxu0 %v8171_v60  ;;  %v8262_v60 = vld [vmem:[%s9064_s12 + $0x4f0] sm:$0xff] }
 0x3a0   : > { %6128 = vmatpush.bf16.msra.mxu1 %v8179_v61  ;;  %v8237_v61 = vld [vmem:[%s9064_s12 + $0x428] sm:$0xff] }
 0x3a1   : > { %6141 = vmatpush.bf16.msra.mxu2 %v8187_v24  ;;  %v8245_v24 = vld [vmem:[%s9064_s12 + $0x468] sm:$0xff] }
 0x3a2   : > { %6154 = vmatpush.bf16.msra.mxu3 %v8195_v32  ;;  %v8253_v32 = vld [vmem:[%s9064_s12 + $0x4a8] sm:$0xff] }
 0x3a3   : > { %6116 = vmatpush.bf16.msra.mxu0 %v8170_v39  ;;  %v8261_v39 = vld [vmem:[%s9064_s12 + $0x4e8] sm:$0xff] }
 0x3a4   : > { %6129 = vmatpush.bf16.msra.mxu1 %v8178_v53  ;;  %v8236_v53 = vld [vmem:[%s9064_s12 + $0x420] sm:$0xff] }
 0x3a5   : > { %6142 = vmatpush.bf16.msra.mxu2 %v8186_v19  ;;  %v8244_v19 = vld [vmem:[%s9064_s12 + $0x460] sm:$0xff] }
 0x3a6   : > { %6155 = vmatpush.bf16.msra.mxu3 %v8194_v25  ;;  %v8252_v25 = vld [vmem:[%s9064_s12 + $0x4a0] sm:$0xff] }
 0x3a7   : > { %6117 = vmatpush.bf16.msra.mxu0 %v8169_v58  ;;  %v8260_v58 = vld [vmem:[%s9064_s12 + $0x4e0] sm:$0xff] }
 0x3a8   : > { %6130 = vmatpush.bf16.msra.mxu1 %v8177_v26  ;;  %v8235_v26 = vld [vmem:[%s9064_s12 + $0x418] sm:$0xff] }
 0x3a9   : > { %6143 = vmatpush.bf16.msra.mxu2 %v8185_v47  ;;  %v8243_v47 = vld [vmem:[%s9064_s12 + $0x458] sm:$0xff] }
 0x3aa   : > { %6156 = vmatpush.bf16.msra.mxu3 %v8193_v27  ;;  %v8251_v27 = vld [vmem:[%s9064_s12 + $0x498] sm:$0xff] }
 0x3ab   : > { %6118 = vmatpush.bf16.msra.mxu0 %v8168_v8  ;;  %v8259_v8 = vld [vmem:[%s9064_s12 + $0x4d8] sm:$0xff] }
 0x3ac   : > { %6131 = vmatpush.bf16.msra.mxu1 %v8176_v41  ;;  %v8234_v41 = vld [vmem:[%s9064_s12 + $0x410] sm:$0xff] }
 0x3ad   : > { %6144 = vmatpush.bf16.msra.mxu2 %v8184_v63  ;;  %v8242_v63 = vld [vmem:[%s9064_s12 + $0x450] sm:$0xff] }
 0x3ae   : > { %6157 = vmatpush.bf16.msra.mxu3 %v8192_v57  ;;  %6119 = vmatmul.bf16.vlgmr.msra.gmra.mxu0 %v4411_v1  ;;  %v8250_v57 = vld [vmem:[%s9064_s12 + $0x490] sm:$0xff]  ;;  %v8232_v1 = vld [vmem:[%s9064_s12 + $0x400] sm:$0xff] }
 0x3af   : > { %6163 = vmatpush.bf16.msrb.mxu0 %v8207_v51  ;;  %6132 = vmatmul.bf16.vlgmr.msra.gmra.mxu1 %v4412_v37  ;;  %v8258_v51 = vld [vmem:[%s9064_s12 + $0x4d0] sm:$0xff]  ;;  %v8248_v37 = vld [vmem:[%s9064_s12 + $0x480] sm:$0xff] }
 0x3b0   : > { %6176 = vmatpush.bf16.msrb.mxu1 %v8215_v5  ;;  %6145 = vmatmul.bf16.vlgmr.msra.gmra.mxu2 %v4413_v9  ;;  %v8233_v5 = vld [vmem:[%s9064_s12 + $0x408] sm:$0xff]  ;;  %v8240_v9 = vld [vmem:[%s9064_s12 + $0x440] sm:$0xff] }
 0x3b1   : > { %6189 = vmatpush.bf16.msrb.mxu2 %v8223_v16  ;;  %6158 = vmatmul.bf16.vlgmr.msra.gmra.mxu3 %v4414_v52  ;;  %v8249_v16 = vld [vmem:[%s9064_s12 + $0x488] sm:$0xff]  ;;  %v8256_v52 = vld [vmem:[%s9064_s12 + $0x4c0] sm:$0xff] }
 0x3b2   : > { %6202 = vmatpush.bf16.msrb.mxu3 %v8231_v11  ;;  %v8257_v11 = vld [vmem:[%s9064_s12 + $0x4c8] sm:$0xff] }
 0x3b3   : > { %6164 = vmatpush.bf16.msrb.mxu0 %v8206_v48  ;;  %v8271_v48 = vld [vmem:[%s9064_s12 + $0x538] sm:$0xff] }
 0x3b4   : > { %6177 = vmatpush.bf16.msrb.mxu1 %v8214_v55  ;;  %v8279_v55 = vld [vmem:[%s9064_s12 + $0x578] sm:$0xff] }
 0x3b5   : > { %6190 = vmatpush.bf16.msrb.mxu2 %v8222_v62  ;;  %v3886_v62 = vld [vmem:[%s11395_s30 + $0x18] sm:$0xff] }
 0x3b6   : > { %6203 = vmatpush.bf16.msrb.mxu3 %v8230_v59  ;;  %v8287_v59 = vld [vmem:[%s9064_s12 + $0x5b8] sm:$0xff] }
 0x3b7   : > { %6165 = vmatpush.bf16.msrb.mxu0 %v8205_v28  ;;  %v4424_v28 = vld [vmem:[#allocation1 + $0x1b] sm:$0xff] }
 0x3b8   : > { %6178 = vmatpush.bf16.msrb.mxu1 %v8213_v45  ;;  %v8270_v45 = vld [vmem:[%s9064_s12 + $0x530] sm:$0xff] }
 0x3b9   : > { %6191 = vmatpush.bf16.msrb.mxu2 %v8221_v44  ;;  %v8278_v44 = vld [vmem:[%s9064_s12 + $0x570] sm:$0xff] }
 0x3ba   : > { %6204 = vmatpush.bf16.msrb.mxu3 %v8229_v20  ;;  %v8286_v20 = vld [vmem:[%s9064_s12 + $0x5b0] sm:$0xff] }
 0x3bb   : > { %6166 = vmatpush.bf16.msrb.mxu0 %v8204_v54  ;;  %v8294_v54 = vld [vmem:[%s9064_s12 + $0x5f0] sm:$0xff] }
 0x3bc   : > { %6179 = vmatpush.bf16.msrb.mxu1 %v8212_v21  ;;  %v11561_v21 = vld [vmem:[#allocation1 + $0x24] sm:$0xff] }
 0x3bd   : > { %6192 = vmatpush.bf16.msrb.mxu2 %v8220_v42  ;;  %v11563_v42 = vld [vmem:[#allocation1 + $0x36] sm:$0xff] }
 0x3be   : > { %6205 = vmatpush.bf16.msrb.mxu3 %v8228_v13  ;;  %v11565_v13 = vld [vmem:[#allocation1 + $0x2d] sm:$0xff] }
 0x3bf   : > { %6167 = vmatpush.bf16.msrb.mxu0 %v8203_v6  ;;  %v11567_v6 = vld [vmem:[#allocation1 + $0x3f] sm:$0xff] }
 0x3c0   : > { %6180 = vmatpush.bf16.msrb.mxu1 %v8211_v3  ;;  %v8269_v3 = vld [vmem:[%s9064_s12 + $0x528] sm:$0xff] }
 0x3c1   : > { %6193 = vmatpush.bf16.msrb.mxu2 %v8219_v7  ;;  %v8277_v7 = vld [vmem:[%s9064_s12 + $0x568] sm:$0xff] }
 0x3c2   : > { %6206 = vmatpush.bf16.msrb.mxu3 %v8227_v56  ;;  %v8285_v56 = vld [vmem:[%s9064_s12 + $0x5a8] sm:$0xff] }
 0x3c3   : > { %6168 = vmatpush.bf16.msrb.mxu0 %v8202_v15  ;;  %v8293_v15 = vld [vmem:[%s9064_s12 + $0x5e8] sm:$0xff] }
 0x3c4   : > { %6181 = vmatpush.bf16.msrb.mxu1 %v8210_v14 }
 0x3c5   : > { %6194 = vmatpush.bf16.msrb.mxu2 %v8218_v35  ;;  %v8268_v35 = vld [vmem:[%s9064_s12 + $0x520] sm:$0xff] }
 0x3c6   : > { %6207 = vmatpush.bf16.msrb.mxu3 %v8226_v33  ;;  %v8276_v33 = vld [vmem:[%s9064_s12 + $0x560] sm:$0xff] }
 0x3c7   : > { %6169 = vmatpush.bf16.msrb.mxu0 %v8201_v31 }
 0x3c8   : > { %6182 = vmatpush.bf16.msrb.mxu1 %v8209_v40  ;;  %v8284_v40 = vld [vmem:[%s9064_s12 + $0x5a0] sm:$0xff] }
 0x3c9   : > { %6195 = vmatpush.bf16.msrb.mxu2 %v8217_v12  ;;  %v8292_v12 = vld [vmem:[%s9064_s12 + $0x5e0] sm:$0xff] }
 0x3ca   : > { %6208 = vmatpush.bf16.msrb.mxu3 %v8225_v43 }
 0x3cb   : > { %6170 = vmatpush.bf16.msrb.mxu0 %v8200_v49  ;;  %v8267_v49 = vld [vmem:[%s9064_s12 + $0x518] sm:$0xff] }
 0x3cc   : > { %6183 = vmatpush.bf16.msrb.mxu1 %v8208_v0  ;;  %v8275_v0 = vld [vmem:[%s9064_s12 + $0x558] sm:$0xff] }
 0x3cd   : > { %6196 = vmatpush.bf16.msrb.mxu2 %v8216_v23  ;;  %v8283_v23 = vld [vmem:[%s9064_s12 + $0x598] sm:$0xff] }
 0x3ce   : > { %6209 = vmatpush.bf16.msrb.mxu3 %v8224_v22  ;;  %6171 = vmatmul.bf16.vlgmr.msrb.gmra.mxu0 %v11484_v18  ;;  %v8295_v18 = vld [vmem:[%s9064_s12 + $0x5f8] sm:$0xff] }
 0x3cf   : > { %6215 = vmatpush.bf16.msra.mxu0 %v8239_v30  ;;  %6184 = vmatmul.bf16.vlgmr.msrb.gmra.mxu1 %v11488_v29  ;;  %v4423_v29 = vld [vmem:[#allocation1 + $0x12] sm:$0xff]  ;;  %v8291_v22 = vld [vmem:[%s9064_s12 + $0x5d8] sm:$0xff] }
 0x3d0   : > { %6228 = vmatpush.bf16.msra.mxu1 %v8247_v50  ;;  %6197 = vmatmul.bf16.vlgmr.msrb.gmra.mxu2 %v11486_v36  ;;  %v4421_v36 = vld [vmem:[#allocation1] sm:$0xff] }
 0x3d1   : > { %6241 = vmatpush.bf16.msra.mxu2 %v8255_v17  ;;  %6210 = vmatmul.bf16.vlgmr.msrb.gmra.mxu3 %v11490_v34  ;;  %v4422_v34 = vld [vmem:[#allocation1 + $0x9] sm:$0xff] }
 0x3d2   : > { %6254 = vmatpush.bf16.msra.mxu3 %v8263_v2  ;;  %4430 = vst [vmem:[#allocation1] ss:$9 sm:$0xff] %v3886_v62  ;;  %v8308_v62 = vld [vmem:[%s9064_s12 + $0x660] sm:$0xff] }
 0x3d3   : > { %6216 = vmatpush.bf16.msra.mxu0 %v8238_v46  ;;  %v8266_v46 = vld [vmem:[%s9064_s12 + $0x510] sm:$0xff] }
 0x3d4   : > { %6229 = vmatpush.bf16.msra.mxu1 %v8246_v38  ;;  %v8274_v38 = vld [vmem:[%s9064_s12 + $0x550] sm:$0xff] }
 0x3d5   : > { %6242 = vmatpush.bf16.msra.mxu2 %v8254_v10 }
 0x3d6   : > { %6255 = vmatpush.bf16.msra.mxu3 %v8262_v60 }
 0x3d7   : > { %6217 = vmatpush.bf16.msra.mxu0 %v8237_v61  ;;  %v8282_v61 = vld [vmem:[%s9064_s12 + $0x590] sm:$0xff] }
 0x3d8   : > { %6230 = vmatpush.bf16.msra.mxu1 %v8245_v24  ;;  %v8290_v24 = vld [vmem:[%s9064_s12 + $0x5d0] sm:$0xff] }
 0x3d9   : > { %6243 = vmatpush.bf16.msra.mxu2 %v8253_v32  ;;  %v8265_v32 = vld [vmem:[%s9064_s12 + $0x508] sm:$0xff] }
 0x3da   : > { %6256 = vmatpush.bf16.msra.mxu3 %v8261_v39  ;;  %v8273_v39 = vld [vmem:[%s9064_s12 + $0x548] sm:$0xff] }
 0x3db   : > { %6218 = vmatpush.bf16.msra.mxu0 %v8236_v53  ;;  %v8281_v53 = vld [vmem:[%s9064_s12 + $0x588] sm:$0xff] }
 0x3dc   : > { %6231 = vmatpush.bf16.msra.mxu1 %v8244_v19  ;;  %v8289_v19 = vld [vmem:[%s9064_s12 + $0x5c8] sm:$0xff] }
 0x3dd   : > { %6244 = vmatpush.bf16.msra.mxu2 %v8252_v25 }
 0x3de   : > { %6257 = vmatpush.bf16.msra.mxu3 %v8260_v58 }
 0x3df   : > { %6219 = vmatpush.bf16.msra.mxu0 %v8235_v26  ;;  %v8264_v26 = vld [vmem:[%s9064_s12 + $0x500] sm:$0xff] }
 0x3e0   : > { %6232 = vmatpush.bf16.msra.mxu1 %v8243_v47  ;;  %v8272_v47 = vld [vmem:[%s9064_s12 + $0x540] sm:$0xff] }
 0x3e1   : > { %6245 = vmatpush.bf16.msra.mxu2 %v8251_v27  ;;  %v8280_v27 = vld [vmem:[%s9064_s12 + $0x580] sm:$0xff] }
 0x3e2   : > { %6258 = vmatpush.bf16.msra.mxu3 %v8259_v8  ;;  %v8288_v8 = vld [vmem:[%s9064_s12 + $0x5c0] sm:$0xff] }
 0x3e3   : > { %6220 = vmatpush.bf16.msra.mxu0 %v8234_v41  ;;  %v8303_v41 = vld [vmem:[%s9064_s12 + $0x638] sm:$0xff] }
 0x3e4   : > { %6233 = vmatpush.bf16.msra.mxu1 %v8242_v63  ;;  %v8311_v63 = vld [vmem:[%s9064_s12 + $0x678] sm:$0xff] }
 0x3e5   : > { %6246 = vmatpush.bf16.msra.mxu2 %v8250_v57  ;;  %v8319_v57 = vld [vmem:[%s9064_s12 + $0x6b8] sm:$0xff] }
 0x3e6   : > { %6259 = vmatpush.bf16.msra.mxu3 %v8258_v51  ;;  %v8327_v51 = vld [vmem:[%s9064_s12 + $0x6f8] sm:$0xff] }
 0x3e7   : > { %6221 = vmatpush.bf16.msra.mxu0 %v8233_v5  ;;  %v8302_v5 = vld [vmem:[%s9064_s12 + $0x630] sm:$0xff] }
 0x3e8   : > { %6234 = vmatpush.bf16.msra.mxu1 %v8241_v4  ;;  %v8310_v4 = vld [vmem:[%s9064_s12 + $0x670] sm:$0xff] }
 0x3e9   : > { %6247 = vmatpush.bf16.msra.mxu2 %v8249_v16  ;;  %v8318_v16 = vld [vmem:[%s9064_s12 + $0x6b0] sm:$0xff] }
 0x3ea   : > { %6260 = vmatpush.bf16.msra.mxu3 %v8257_v11  ;;  %v8326_v11 = vld [vmem:[%s9064_s12 + $0x6f0] sm:$0xff] }
 0x3eb   : > { %6222 = vmatpush.bf16.msra.mxu0 %v8232_v1  ;;  %v6016_v14 = vpop.f32.mrf.mxu0  ;;  %v8301_v1 = vld [vmem:[%s9064_s12 + $0x628] sm:$0xff] }
 0x3ec   : > { %6235 = vmatpush.bf16.msra.mxu1 %v8240_v9  ;;  %v6029_v31 = vpop.f32.mrf.mxu1  ;;  %v8309_v9 = vld [vmem:[%s9064_s12 + $0x668] sm:$0xff] }
 0x3ed   : > { %6248 = vmatpush.bf16.msra.mxu2 %v8248_v37  ;;  %v6030_v43 = vadd.f32 %v6029_v31, %v6016_v14  ;;  %v8317_v37 = vld [vmem:[%s9064_s12 + $0x6a8] sm:$0xff]  ;;  %v8322_v14 = vld [vmem:[%s9064_s12 + $0x6d0] sm:$0xff] }
 0x3ee   : > { %6261 = vmatpush.bf16.msra.mxu3 %v8256_v52  ;;  %6223 = vmatmul.bf16.vlgmr.msra.gmra.mxu0 %v4421_v36  ;;  %v8325_v52 = vld [vmem:[%s9064_s12 + $0x6e8] sm:$0xff]  ;;  %v8316_v36 = vld [vmem:[%s9064_s12 + $0x6a0] sm:$0xff] }
 0x3ef   : > { %6267 = vmatpush.bf16.msrb.mxu0 %v8271_v48  ;;  %6236 = vmatmul.bf16.vlgmr.msra.gmra.mxu1 %v4422_v34  ;;  %v8313_v31 = vld [vmem:[%s9064_s12 + $0x688] sm:$0xff] }
 0x3f0   : > { %6280 = vmatpush.bf16.msrb.mxu1 %v8279_v55  ;;  %6249 = vmatmul.bf16.vlgmr.msra.gmra.mxu2 %v4423_v29  ;;  %v8300_v55 = vld [vmem:[%s9064_s12 + $0x620] sm:$0xff] }
 0x3f1   : > { %6293 = vmatpush.bf16.msrb.mxu2 %v8287_v59  ;;  %6262 = vmatmul.bf16.vlgmr.msra.gmra.mxu3 %v4424_v28  ;;  %v8324_v29 = vld [vmem:[%s9064_s12 + $0x6e0] sm:$0xff]  ;;  %v8299_v28 = vld [vmem:[%s9064_s12 + $0x618] sm:$0xff] }
 0x3f2   : > { %6306 = vmatpush.bf16.msrb.mxu3 %v8295_v18 }
 0x3f3   : > { %6268 = vmatpush.bf16.msrb.mxu0 %v8270_v45  ;;  %v6042_v30 = vpop.f32.mrf.mxu2  ;;  %v6018_v2 = vpop.f32.mrf.mxu0  ;;  %v8307_v45 = vld [vmem:[%s9064_s12 + $0x658] sm:$0xff] }
 0x3f4   : > { %6281 = vmatpush.bf16.msrb.mxu1 %v8278_v44  ;;  %v6043_v50 = vadd.f32 %v6042_v30, %v6030_v43  ;;  %v6055_v17 = vpop.f32.mrf.mxu3  ;;  %v6031_v60 = vpop.f32.mrf.mxu1  ;;  %v8315_v44 = vld [vmem:[%s9064_s12 + $0x698] sm:$0xff] }
 0x3f5   : > { %6294 = vmatpush.bf16.msrb.mxu2 %v8286_v20  ;;  %v8323_v20 = vld [vmem:[%s9064_s12 + $0x6d8] sm:$0xff]  ;;  %v4434_v60 = vld [vmem:[#allocation1 + $0x1b] sm:$0xff] }
 0x3f6   : > { %6307 = vmatpush.bf16.msrb.mxu3 %v8294_v54  ;;  %v6056_v10 = vadd.f32 %v6055_v17, %v6043_v50  ;;  %v8335_v30 = vld [vmem:[%s9064_s12 + $0x738] sm:$0xff] }
 0x3f7   : > { %6269 = vmatpush.bf16.msrb.mxu0 %v8269_v3  ;;  %v8306_v3 = vld [vmem:[%s9064_s12 + $0x650] sm:$0xff]  ;;  %v8343_v50 = vld [vmem:[%s9064_s12 + $0x778] sm:$0xff] }
 0x3f8   : > { %6282 = vmatpush.bf16.msrb.mxu1 %v8277_v7  ;;  %v8351_v17 = vld [vmem:[%s9064_s12 + $0x7b8] sm:$0xff] }
 0x3f9   : > { %6295 = vmatpush.bf16.msrb.mxu2 %v8285_v56  ;;  %v8359_v2 = vld [vmem:[%s9064_s12 + $0x7f8] sm:$0xff] }
 0x3fa   : > { %6308 = vmatpush.bf16.msrb.mxu3 %v8293_v15  ;;  %v8314_v15 = vld [vmem:[%s9064_s12 + $0x690] sm:$0xff] }
 0x3fb   : > { %6270 = vmatpush.bf16.msrb.mxu0 %v8268_v35  ;;  %v6044_v25 = vpop.f32.mrf.mxu2  ;;  %v8297_v35 = vld [vmem:[%s9064_s12 + $0x608] sm:$0xff] }
 0x3fc   : > { %6283 = vmatpush.bf16.msrb.mxu1 %v8276_v33  ;;  %v6057_v58 = vpop.f32.mrf.mxu3  ;;  %v8305_v33 = vld [vmem:[%s9064_s12 + $0x648] sm:$0xff] }
 0x3fd   : > { %6296 = vmatpush.bf16.msrb.mxu2 %v8284_v40  ;;  %v8321_v40 = vld [vmem:[%s9064_s12 + $0x6c8] sm:$0xff] }
 0x3fe   : > { %6309 = vmatpush.bf16.msrb.mxu3 %v8292_v12  ;;  %v8349_v25 = vld [vmem:[%s9064_s12 + $0x7a8] sm:$0xff] }
 0x3ff   : > { %6271 = vmatpush.bf16.msrb.mxu0 %v8267_v49  ;;  %v8296_v49 = vld [vmem:[%s9064_s12 + $0x600] sm:$0xff]  ;;  %v8357_v58 = vld [vmem:[%s9064_s12 + $0x7e8] sm:$0xff] }
 0x400   : > { %6284 = vmatpush.bf16.msrb.mxu1 %v8275_v0  ;;  %v8304_v0 = vld [vmem:[%s9064_s12 + $0x640] sm:$0xff] }
 0x401   : > { %6297 = vmatpush.bf16.msrb.mxu2 %v8283_v23  ;;  %v8312_v23 = vld [vmem:[%s9064_s12 + $0x680] sm:$0xff] }
 0x402   : > { %6310 = vmatpush.bf16.msrb.mxu3 %v8291_v22  ;;  %v8320_v22 = vld [vmem:[%s9064_s12 + $0x6c0] sm:$0xff] }
 0x403   : > { %6272 = vmatpush.bf16.msrb.mxu0 %v8266_v46  ;;  %v4431_v46 = vld [vmem:[#allocation1] sm:$0xff] }
 0x404   : > { %6285 = vmatpush.bf16.msrb.mxu1 %v8274_v38  ;;  %v4433_v38 = vld [vmem:[#allocation1 + $0x12] sm:$0xff] }
 0x405   : > { %6298 = vmatpush.bf16.msrb.mxu2 %v8282_v61  ;;  %v8334_v61 = vld [vmem:[%s9064_s12 + $0x730] sm:$0xff] }
 0x406   : > { %6311 = vmatpush.bf16.msrb.mxu3 %v8290_v24  ;;  %v8342_v24 = vld [vmem:[%s9064_s12 + $0x770] sm:$0xff] }
 0x407   : > { %6273 = vmatpush.bf16.msrb.mxu0 %v8265_v32  ;;  %v8350_v32 = vld [vmem:[%s9064_s12 + $0x7b0] sm:$0xff] }
 0x408   : > { %6286 = vmatpush.bf16.msrb.mxu1 %v8273_v39  ;;  %v8358_v39 = vld [vmem:[%s9064_s12 + $0x7f0] sm:$0xff] }
 0x409   : > { %6299 = vmatpush.bf16.msrb.mxu2 %v8281_v53  ;;  %v8333_v53 = vld [vmem:[%s9064_s12 + $0x728] sm:$0xff] }
 0x40a   : > { %6312 = vmatpush.bf16.msrb.mxu3 %v8289_v19  ;;  %v8341_v19 = vld [vmem:[%s9064_s12 + $0x768] sm:$0xff] }
 0x40b   : > { %6274 = vmatpush.bf16.msrb.mxu0 %v8264_v26  ;;  %v6068_v48 = vpop.f32.mrf.mxu0 }
 0x40c   : > { %6287 = vmatpush.bf16.msrb.mxu1 %v8272_v47  ;;  %v6069_v59 = vadd.f32 %v6068_v48, %v6056_v10  ;;  %v6081_v18 = vpop.f32.mrf.mxu1  ;;  %v4432_v10 = vld [vmem:[#allocation1 + $0x9] sm:$0xff] }
 0x40d   : > { %6300 = vmatpush.bf16.msrb.mxu2 %v8280_v27  ;;  %v8332_v27 = vld [vmem:[%s9064_s12 + $0x720] sm:$0xff] }
 0x40e   : > { %6313 = vmatpush.bf16.msrb.mxu3 %v8288_v8  ;;  %6275 = vmatmul.bf16.vlgmr.msrb.gmra.mxu0 %v11561_v21  ;;  %v6082_v34 = vadd.f32 %v6081_v18, %v6069_v59  ;;  %v8340_v8 = vld [vmem:[%s9064_s12 + $0x760] sm:$0xff]  ;;  %v8346_v18 = vld [vmem:[%s9064_s12 + $0x790] sm:$0xff] }
 0x40f   : > { %6319 = vmatpush.bf16.msra.mxu0 %v8303_v41  ;;  %6288 = vmatmul.bf16.vlgmr.msrb.gmra.mxu1 %v11565_v13 }
 0x410   : > { %6332 = vmatpush.bf16.msra.mxu1 %v8311_v63  ;;  %6301 = vmatmul.bf16.vlgmr.msrb.gmra.mxu2 %v11563_v42  ;;  %v8348_v63 = vld [vmem:[%s9064_s12 + $0x7a0] sm:$0xff] }
 0x411   : > { %6345 = vmatpush.bf16.msra.mxu2 %v8319_v57  ;;  %6314 = vmatmul.bf16.vlgmr.msrb.gmra.mxu3 %v11567_v6  ;;  %v8298_v6 = vld [vmem:[%s9064_s12 + $0x610] sm:$0xff]  ;;  %v8356_v57 = vld [vmem:[%s9064_s12 + $0x7e0] sm:$0xff] }
 0x412   : > { %6358 = vmatpush.bf16.msra.mxu3 %v8327_v51 }
 0x413   : > { %6320 = vmatpush.bf16.msra.mxu0 %v8302_v5  ;;  %v6094_v54 = vpop.f32.mrf.mxu2  ;;  %v6070_v13 = vpop.f32.mrf.mxu0  ;;  %v8331_v5 = vld [vmem:[%s9064_s12 + $0x718] sm:$0xff] }
 0x414   : > { %6333 = vmatpush.bf16.msra.mxu1 %v8310_v4  ;;  %v6095_v21 = vadd.f32 %v6094_v54, %v6082_v34  ;;  %v6107_v42 = vpop.f32.mrf.mxu3  ;;  %v6083_v56 = vpop.f32.mrf.mxu1  ;;  %v8339_v4 = vld [vmem:[%s9064_s12 + $0x758] sm:$0xff]  ;;  %v8337_v34 = vld [vmem:[%s9064_s12 + $0x748] sm:$0xff]  ;;  %v8328_v54 = vld [vmem:[%s9064_s12 + $0x700] sm:$0xff] }
 0x415   : > { %6346 = vmatpush.bf16.msra.mxu2 %v8318_v16  ;;  %v8347_v16 = vld [vmem:[%s9064_s12 + $0x798] sm:$0xff]  ;;  %v8352_v13 = vld [vmem:[%s9064_s12 + $0x7c0] sm:$0xff] }
 0x416   : > { %6359 = vmatpush.bf16.msra.mxu3 %v8326_v11  ;;  %v6108_v7 = vadd.f32 %v6107_v42, %v6095_v21  ;;  %v8355_v11 = vld [vmem:[%s9064_s12 + $0x7d8] sm:$0xff]  ;;  %v8336_v21 = vld [vmem:[%s9064_s12 + $0x740] sm:$0xff] }
 0x417   : > { %6321 = vmatpush.bf16.msra.mxu0 %v8301_v1  ;;  %v8344_v42 = vld [vmem:[%s9064_s12 + $0x780] sm:$0xff]  ;;  %v4438_v56 = vld [vmem:[#allocation1 + $0x3f] sm:$0xff] }
 0x418   : > { %6334 = vmatpush.bf16.msra.mxu1 %v8309_v9 }
 0x419   : > { %6347 = vmatpush.bf16.msra.mxu2 %v8317_v37 }
 0x41a   : > { %6360 = vmatpush.bf16.msra.mxu3 %v8325_v52 }
 0x41b   : > { %6322 = vmatpush.bf16.msra.mxu0 %v8300_v55  ;;  %v6096_v12 = vpop.f32.mrf.mxu2  ;;  %v8330_v55 = vld [vmem:[%s9064_s12 + $0x710] sm:$0xff] }
 0x41c   : > { %6335 = vmatpush.bf16.msra.mxu1 %v8308_v62  ;;  %v6109_v43 = vpop.f32.mrf.mxu3  ;;  %v8338_v62 = vld [vmem:[%s9064_s12 + $0x750] sm:$0xff] }
 0x41d   : > { %6348 = vmatpush.bf16.msra.mxu2 %v8316_v36  ;;  %v8354_v36 = vld [vmem:[%s9064_s12 + $0x7d0] sm:$0xff] }
 0x41e   : > { %6361 = vmatpush.bf16.msra.mxu3 %v8324_v29  ;;  %v8329_v29 = vld [vmem:[%s9064_s12 + $0x708] sm:$0xff] }
 0x41f   : > { %6323 = vmatpush.bf16.msra.mxu0 %v8299_v28  ;;  %v8345_v28 = vld [vmem:[%s9064_s12 + $0x788] sm:$0xff] }
 0x420   : > { %6336 = vmatpush.bf16.msra.mxu1 %v8307_v45  ;;  %v8353_v45 = vld [vmem:[%s9064_s12 + $0x7c8] sm:$0xff] }
 0x421   : > { %6349 = vmatpush.bf16.msra.mxu2 %v8315_v44 }
 0x422   : > { %6362 = vmatpush.bf16.msra.mxu3 %v8323_v20 }
 0x423   : > { %6324 = vmatpush.bf16.msra.mxu0 %v8298_v6  ;;  %v4435_v6 = vld [vmem:[#allocation1 + $0x24] sm:$0xff] }
 0x424   : > { %6337 = vmatpush.bf16.msra.mxu1 %v8306_v3  ;;  %v4436_v3 = vld [vmem:[#allocation1 + $0x2d] sm:$0xff] }
 0x425   : > { %6350 = vmatpush.bf16.msra.mxu2 %v8314_v15 }
 0x426   : > { %6363 = vmatpush.bf16.msra.mxu3 %v8322_v14 }
 0x427   : > { %6325 = vmatpush.bf16.msra.mxu0 %v8297_v35 }
 0x428   : > { %6338 = vmatpush.bf16.msra.mxu1 %v8305_v33 }
 0x429   : > { %6351 = vmatpush.bf16.msra.mxu2 %v8313_v31 }
 0x42a   : > { %6364 = vmatpush.bf16.msra.mxu3 %v8321_v40 }
 0x42b   : > { %6326 = vmatpush.bf16.msra.mxu0 %v8296_v49  ;;  %v6120_v26 = vpop.f32.mrf.mxu0 }
 0x42c   : > { %6339 = vmatpush.bf16.msra.mxu1 %v8304_v0  ;;  %v6121_v47 = vadd.f32 %v6120_v26, %v6108_v7  ;;  %v6133_v41 = vpop.f32.mrf.mxu1  ;;  %v4437_v7 = vld [vmem:[#allocation1 + $0x36] sm:$0xff] }
 0x42d   : > { %6352 = vmatpush.bf16.msra.mxu2 %v8312_v23 }
 0x42e   : > { %6365 = vmatpush.bf16.msra.mxu3 %v8320_v22  ;;  %6327 = vmatmul.bf16.vlgmr.msra.gmra.mxu0 %v4431_v46  ;;  %v6134_v51 = vadd.f32 %v6133_v41, %v6121_v47 }
 0x42f   : > { %6371 = vmatpush.bf16.msrb.mxu0 %v8335_v30  ;;  %6340 = vmatmul.bf16.vlgmr.msra.gmra.mxu1 %v4432_v10 }
 0x430   : > { %6384 = vmatpush.bf16.msrb.mxu1 %v8343_v50  ;;  %6353 = vmatmul.bf16.vlgmr.msra.gmra.mxu2 %v4433_v38 }
 0x431   : > { %6397 = vmatpush.bf16.msrb.mxu2 %v8351_v17  ;;  %6366 = vmatmul.bf16.vlgmr.msra.gmra.mxu3 %v4434_v60 }
 0x432   : > { %6410 = vmatpush.bf16.msrb.mxu3 %v8359_v2 }
 0x433   : > { %6372 = vmatpush.bf16.msrb.mxu0 %v8334_v61  ;;  %v6146_v1 = vpop.f32.mrf.mxu2  ;;  %v6122_v52 = vpop.f32.mrf.mxu0 }
 0x434   : > { %6385 = vmatpush.bf16.msrb.mxu1 %v8342_v24  ;;  %v6147_v9 = vadd.f32 %v6146_v1, %v6134_v51  ;;  %v6159_v37 = vpop.f32.mrf.mxu3  ;;  %v6135_v59 = vpop.f32.mrf.mxu1 }
 0x435   : > { %6398 = vmatpush.bf16.msrb.mxu2 %v8350_v32 }
 0x436   : > { %6411 = vmatpush.bf16.msrb.mxu3 %v8358_v39  ;;  %v6160_v48 = vadd.f32 %v6159_v37, %v6147_v9 }
 0x437   : > { %6373 = vmatpush.bf16.msrb.mxu0 %v8333_v53 }
 0x438   : > { %6386 = vmatpush.bf16.msrb.mxu1 %v8341_v19 }
 0x439   : > { %6399 = vmatpush.bf16.msrb.mxu2 %v8349_v25 }
 0x43a   : > { %6412 = vmatpush.bf16.msrb.mxu3 %v8357_v58 }
 0x43b   : > { %6374 = vmatpush.bf16.msrb.mxu0 %v8332_v27  ;;  %v6148_v44 = vpop.f32.mrf.mxu2 }
 0x43c   : > { %6387 = vmatpush.bf16.msrb.mxu1 %v8340_v8  ;;  %v6161_v20 = vpop.f32.mrf.mxu3 }
 0x43d   : > { %6400 = vmatpush.bf16.msrb.mxu2 %v8348_v63 }
 0x43e   : > { %6413 = vmatpush.bf16.msrb.mxu3 %v8356_v57 }
 0x43f   : > { %6375 = vmatpush.bf16.msrb.mxu0 %v8331_v5 }
 0x440   : > { %6388 = vmatpush.bf16.msrb.mxu1 %v8339_v4 }
 0x441   : > { %6401 = vmatpush.bf16.msrb.mxu2 %v8347_v16 }
 0x442   : > { %6414 = vmatpush.bf16.msrb.mxu3 %v8355_v11 }
 0x443   : > { %6376 = vmatpush.bf16.msrb.mxu0 %v8330_v55 }
 0x444   : > { %6389 = vmatpush.bf16.msrb.mxu1 %v8338_v62 }
 0x445   : > { %6402 = vmatpush.bf16.msrb.mxu2 %v8346_v18 }
 0x446   : > { %6415 = vmatpush.bf16.msrb.mxu3 %v8354_v36 }
 0x447   : > { %6377 = vmatpush.bf16.msrb.mxu0 %v8329_v29 }
 0x448   : > { %6390 = vmatpush.bf16.msrb.mxu1 %v8337_v34 }
 0x449   : > { %6403 = vmatpush.bf16.msrb.mxu2 %v8345_v28 }
 0x44a   : > { %6416 = vmatpush.bf16.msrb.mxu3 %v8353_v45 }
 0x44b   : > { %6378 = vmatpush.bf16.msrb.mxu0 %v8328_v54  ;;  %v6172_v15 = vpop.f32.mrf.mxu0 }
 0x44c   : > { %6391 = vmatpush.bf16.msrb.mxu1 %v8336_v21  ;;  %v6173_v14 = vadd.f32 %v6172_v15, %v6160_v48  ;;  %v6185_v35 = vpop.f32.mrf.mxu1  ;;  %v3880_v21 = vld [vmem:[#allocation3] sm:$0x3] }
 0x44d   : > { %6404 = vmatpush.bf16.msrb.mxu2 %v8344_v42 }
 0x44e   : > { %6417 = vmatpush.bf16.msrb.mxu3 %v8352_v13  ;;  %6379 = vmatmul.bf16.vlgmr.msrb.gmra.mxu0 %v4435_v6  ;;  %v6186_v33 = vadd.f32 %v6185_v35, %v6173_v14 }
 0x44f   : > { %6392 = vmatmul.bf16.vlgmr.msrb.gmra.mxu1 %v4436_v3 }
 0x450   : > { %6405 = vmatmul.bf16.vlgmr.msrb.gmra.mxu2 %v4437_v7 }
 0x451   : > { %6418 = vmatmul.bf16.vlgmr.msrb.gmra.mxu3 %v4438_v56 }
 0x453   : > { %v6198_v31 = vpop.f32.mrf.mxu2  ;;  %v6174_v43 = vpop.f32.mrf.mxu0 }
 0x454   : > { %v6199_v40 = vadd.f32 %v6198_v31, %v6186_v33  ;;  %v6211_v12 = vpop.f32.mrf.mxu3  ;;  %v6187_v0 = vpop.f32.mrf.mxu1 }
 0x456   : > { %v6212_v49 = vadd.f32 %v6211_v12, %v6199_v40 }
 0x45b   : > { %v6200_v23 = vpop.f32.mrf.mxu2 }
 0x45c   : > { %v6213_v22 = vpop.f32.mrf.mxu3 }
 0x46b   : > { %v6224_v30 = vpop.f32.mrf.mxu0 }
 0x46c   : > { %v6225_v50 = vadd.f32 %v6224_v30, %v6212_v49  ;;  %v6237_v17 = vpop.f32.mrf.mxu1 }
 0x46e   : > { %v6238_v2 = vadd.f32 %v6237_v17, %v6225_v50 }
 0x473   : > { %v6250_v46 = vpop.f32.mrf.mxu2  ;;  %v6226_v60 = vpop.f32.mrf.mxu0 }
 0x474   : > { %v6251_v38 = vadd.f32 %v6250_v46, %v6238_v2  ;;  %v6263_v10 = vpop.f32.mrf.mxu3  ;;  %v6239_v24 = vpop.f32.mrf.mxu1 }
 0x476   : > { %v6264_v61 = vadd.f32 %v6263_v10, %v6251_v38 }
 0x47b   : > { %v6252_v32 = vpop.f32.mrf.mxu2 }
 0x47c   : > { %v6265_v39 = vpop.f32.mrf.mxu3 }
 0x48b   : > { %v6276_v53 = vpop.f32.mrf.mxu0 }
 0x48c   : > { %v6289_v19 = vpop.f32.mrf.mxu1  ;;  %v6277_v51 = vadd.f32 %v6276_v53, %v6264_v61 }
 0x48e   : > { %v6290_v11 = vadd.f32 %v6289_v19, %v6277_v51 }
 0x493   : > { %v6302_v25 = vpop.f32.mrf.mxu2  ;;  %v6278_v26 = vpop.f32.mrf.mxu0 }
 0x494   : > { %v6315_v58 = vpop.f32.mrf.mxu3  ;;  %v6291_v47 = vpop.f32.mrf.mxu1  ;;  %v6303_v1 = vadd.f32 %v6302_v25, %v6290_v11 }
 0x496   : > { %v6316_v52 = vadd.f32 %v6315_v58, %v6303_v1 }
 0x49b   : > { %v6304_v27 = vpop.f32.mrf.mxu2 }
 0x49c   : > { %v6317_v8 = vpop.f32.mrf.mxu3 }
 0x4ab   : > { %v6328_v41 = vpop.f32.mrf.mxu0 }
 0x4ac   : > { %v6341_v63 = vpop.f32.mrf.mxu1  ;;  %v6329_v48 = vadd.f32 %v6328_v41, %v6316_v52 }
 0x4ae   : > { %v6342_v55 = vadd.f32 %v6341_v63, %v6329_v48 }
 0x4b3   : > { %v6354_v57 = vpop.f32.mrf.mxu2  ;;  %v6330_v4 = vpop.f32.mrf.mxu0 }
 0x4b4   : > { %v6367_v5 = vpop.f32.mrf.mxu3  ;;  %v6343_v16 = vpop.f32.mrf.mxu1  ;;  %v6355_v62 = vadd.f32 %v6354_v57, %v6342_v55 }
 0x4b6   : > { %v6368_v59 = vadd.f32 %v6367_v5, %v6355_v62 }
 0x4bb   : > { %v6356_v9 = vpop.f32.mrf.mxu2 }
 0x4bc   : > { %v6369_v37 = vpop.f32.mrf.mxu3 }
 0x4cb   : > { %v6380_v18 = vpop.f32.mrf.mxu0 }
 0x4cc   : > { %v6393_v36 = vpop.f32.mrf.mxu1  ;;  %v6381_v29 = vadd.f32 %v6380_v18, %v6368_v59 }
 0x4ce   : > { %v6394_v34 = vadd.f32 %v6393_v36, %v6381_v29 }
 0x4d3   : > { %v6406_v28 = vpop.f32.mrf.mxu2  ;;  %v6382_v20 = vpop.f32.mrf.mxu0 }
 0x4d4   : > { %v6419_v45 = vpop.f32.mrf.mxu3  ;;  %v6407_v44 = vadd.f32 %v6406_v28, %v6394_v34  ;;  %v6395_v54 = vpop.f32.mrf.mxu1 }
 0x4d6   : > { %v6420_v42 = vadd.f32 %v6419_v45, %v6407_v44 }
 0x4d8   : > { %v6423_v13 = vadd.f32 %v6420_v42, %v3880_v21  ;;  %6428 = sbr.rel (%p8010_p1) target bundleno = 1406 (0x57e), region = 96 }
 0x4da   : > { %6424 = vst [vmem:[#allocation3] sm:$0x3] %v6423_v13 }
 0x4db   : > { %v6408_v6 = vpop.f32.mrf.mxu2 }
 0x4dc   : > { %v6421_v3 = vpop.f32.mrf.mxu3 }
 0x4dd   : > { %v6450_v7 = vld [vmem:[%s11735_s8 + $0x78] sm:$0xff]  ;;  %v6449_v56 = vld [vmem:[%s11735_s8 + $0x70] sm:$0xff]  ;;  %v6448_v15 = vld [vmem:[%s11735_s8 + $0x68] sm:$0xff]  ;;  %vm6475_vm3 = vcmask 33792  }
 0x4de   : > { %6455 = vmatpush.msra.mxu0 %v6450_v7  ;;  %v6447_v14 = vld [vmem:[%s11735_s8 + $0x60] sm:$0xff]  ;;  %v6446_v35 = vld [vmem:[%s11735_s8 + $0x58] sm:$0xff]  ;;  %v6445_v33 = vld [vmem:[%s11735_s8 + $0x50] sm:$0xff] }
 0x4df   : > { %v6444_v31 = vld [vmem:[%s11735_s8 + $0x48] sm:$0xff]  ;;  %v6443_v40 = vld [vmem:[%s11735_s8 + $0x40] sm:$0xff]  ;;  %v6442_v12 = vld [vmem:[%s11735_s8 + $0x38] sm:$0xff] }
 0x4e0   : > { %6456 = vmatpush.msra.mxu0 %v6449_v56  ;;  %v6441_v43 = vld [vmem:[%s11735_s8 + $0x30] sm:$0xff]  ;;  %v6440_v49 = vld [vmem:[%s11735_s8 + $0x28] sm:$0xff]  ;;  %v6439_v0 = vld [vmem:[%s11735_s8 + $0x20] sm:$0xff] }
 0x4e1   : > { %v6438_v23 = vld [vmem:[%s11735_s8 + $0x18] sm:$0xff]  ;;  %v6437_v22 = vld [vmem:[%s11735_s8 + $0x10] sm:$0xff]  ;;  %v8562_v30 = vld [vmem:[#allocation13] ss:$0 sm:$0xff] }
 0x4e2   : > { %6457 = vmatpush.msra.mxu0 %v6448_v15  ;;  %v6429_v50 = vld [vmem:[#allocation3] sm:$0x3]  ;;  %v6435_v2 = vld [vmem:[%s11735_s8] sm:$0xff]  ;;  %v8563_v38 = vld [vmem:[#allocation14] ss:$0 sm:$0xff] }
 0x4e3   : > { %v6436_v17 = vld [vmem:[%s11735_s8 + $0x8] sm:$0xff]  ;;  %v6434_v46 = vadd.f32 %v8562_v30, %v6429_v50 }
 0x4e4   : > { %6458 = vmatpush.msra.mxu0 %v6447_v14 }
 0x4e6   : > { %6459 = vmatpush.msra.mxu0 %v6446_v35 }
 0x4e8   : > { %6460 = vmatpush.msra.mxu0 %v6445_v33 }
 0x4ea   : > { %6461 = vmatpush.msra.mxu0 %v6444_v31 }
 0x4ec   : > { %6462 = vmatpush.msra.mxu0 %v6443_v40 }
 0x4ee   : > { %6463 = vmatpush.msra.mxu0 %v6442_v12 }
 0x4f0   : > { %6464 = vmatpush.msra.mxu0 %v6441_v43 }
 0x4f2   : > { %6465 = vmatpush.msra.mxu0 %v6440_v49 }
 0x4f4   : > { %6466 = vmatpush.msra.mxu0 %v6439_v0 }
 0x4f6   : > { %6467 = vmatpush.msra.mxu0 %v6438_v23 }
 0x4f8   : > { %6468 = vmatpush.msra.mxu0 %v6437_v22 }
 0x4fa   : > { %6469 = vmatpush.msra.mxu0 %v6436_v17 }
 0x4fc   : > { %6470 = vmatpush.msra.mxu0 %v6435_v2 }
 0x4fd   : > { %6471 = vmatmul.f32.vlgmr.msra.gmra.mxu0 %v6434_v46 }
 0x57a   : > { %v6472_v10 = vpop.f32.mrf.mxu0 }
 0x57b   : > { %v6473_v60 = vadd.f32 %v8563_v38, %v6472_v10 }
 0x57d   : > { %6476 = vst.msk [vmem:[#allocation15] sm:$0x3] %vm6475_vm3, %v6473_v60 }
 0x57e PF: > { %p8426_p3 = scmp.eq.s32.totalorder %s8951_s20, 2  ;;  %s8871_s12 = smov [#allocation15]  }
 0x57f   : > { %s6483_s11 = sshll.u32 %s8871_s12, 4  ;;  %s6485_s29 = sshll.u32 %s11737_s10, 4  ;;  %s6484_s11 = int_to_ptr.vmem [resolvable:$true] %s6483_s11  ;;  %s6486_s29 = int_to_ptr.hbm [resolvable:$true] %s6485_s29 }
 0x580   : > { %8387 = dma.vmem_to_hbm [thread:$0]  (%p8426_p3), %s6484_s11, 32, %s6486_s29, [#allocation6]  }
 0x581   : > { %8843 = dma.done.wait (%p8426_p3), [#allocation6], 32  }
 0x582   : > { %8845 = vsyncadd (%p8426_p3), [#allocation6], 4294967264 }
 0x583 PF: > { %p21_p4 = scmp.ge.s32.totalorder %s9003_s26, 5   ;;  %s12249_s13 = smov %s8852_s14 }
 0x584   : > { %s12250_s14 = smov %s8856_s15  ;;  %s12251_s15 = smov %s9015_s17 }
 0x585   : > { %s12252_s16 = smov %s9003_s26  ;;  %23 = sbr.rel (!%p21_p4) target bundleno = 7 (0x7), region = 137 }
 0x58a   :  { %6499 = vsyncpa [#allocation5], 1 }
 0x58b   :  { %6501 = vsyncpa [#allocation5 + $0x1], 1 }
 0x58c   :  { %6502 = vsyncpa [#allocation8], 1 }
 0x58d   :  { %6503 = vsyncpa [#allocation11], 1 }
 0x58e   :  { %6504 = vsyncpa [#allocation6], 1 }
 0x58f   :  { %6506 = vsyncpa [#allocation6 + $0x1], 1 }

</bundles_post_ra>
